<compile_context>
chip_gen: v5e
topology: v5e:2x2
jax: 0.10.0
libtpu: 0.0.40
codegen_flags: <defaults>
</compile_context>

<pallas_src>
import functools

import jax
import jax.numpy as jnp
from jax.experimental import pallas as pl
from jax.experimental.pallas import tpu as pltpu  # noqa: F401  (TPU backend)

_BN_EPS = 1e-5


# ----------------------------------------------------------------------------
# Fused forward kernel (single pallas_call, whole network, whole batch)
# ----------------------------------------------------------------------------
def _make_fused_kernel(B, N, K, n_blocks):
    BN = B * N

    def kernel(*refs):
        o_ref = refs[-1]
        it = iter(refs[:-1])

        def nxt():
            return next(it)

        x_in = nxt()[...]                              # (BN, C0)

        def dcdgcn(parts):
            """One DCDGCN layer applied to the whole batch.

            parts : list of (BN, Ci) values whose channel-concat is the layer
                    input (the dense concat is handled by splitting W host-side).
            Consumes refs (in order): adj (K*BN, BN), one W piece (K, Ci, Cout)
            per part, scale (1, Cout), shift (1, Cout).
            """
            adj = nxt()[...]
            w_refs = [nxt() for _ in parts]
            scale = nxt()[...]
            shift = nxt()[...]
            cout = scale.shape[-1]
            acc = jnp.zeros((BN, cout), dtype=jnp.float32)
            for part, w_ref in zip(parts, w_refs):
                # All K Chebyshev adjacencies (block-diag over batch) at once.
                ax = jnp.dot(adj, part, preferred_element_type=jnp.float32)
                for k in range(K):                      # K small & static
                    acc = acc + jnp.dot(ax[k * BN:(k + 1) * BN, :], w_ref[k],
                                        preferred_element_type=jnp.float32)
            # bias folded into shift; BatchNorm2d(eval) folded into scale/shift.
            return jnp.maximum(acc * scale + shift, 0.0)

        pieces = [dcdgcn([x_in])]                       # bottleneck
        for _ in range(n_blocks - 1):                   # DenseGCNNblock
            t = dcdgcn(pieces)                          # block1 (eats the concat)
            t = dcdgcn([t])                             # block2
            pieces.append(dcdgcn([t]))                  # block3; concat == append

        # ---- MLP head: fc2(relu(fc1(channel-major flatten))) ---------------
        # fc1 contracts over (node, channel).  Channel contraction: per-channel
        # lane-broadcast FMAs against the pre-permuted fc1 weight (Ci, BN, H).
        # Node contraction: one matmul with a (B, BN) block-row summing matrix.
        # No sublane<->lane reshape/transpose of activations is ever needed.
        w1_refs = [nxt() for _ in pieces]               # each (Ci, BN, hidden)
        ssum = nxt()[...]                               # (B, BN)
        b1 = nxt()[...]                                 # (1, hidden)
        w2 = nxt()[...]                                 # (hidden, nclass)
        b2 = nxt()[...]                                 # (1, nclass)

        hidden = b1.shape[-1]
        q = jnp.zeros((BN, hidden), dtype=jnp.float32)
        for piece, w1_ref in zip(pieces, w1_refs):
            ci = w1_ref.shape[0]
            for c in range(ci):                         # <= num_out per piece
                q = q + piece[:, c:c + 1] * w1_ref[c]
        h = jnp.dot(ssum, q, preferred_element_type=jnp.float32) + b1
        h = jnp.maximum(h, 0.0)                         # relu(fc1); dropout = id
        o_ref[...] = jnp.dot(h, w2, preferred_element_type=jnp.float32) + b2

    return kernel


# ----------------------------------------------------------------------------
# Plain-JAX host glue (graph Laplacian, Chebyshev stack, parameter folding)
# ----------------------------------------------------------------------------
def normalize_A(A):
    A = jnp.maximum(A, 0.0)
    d = jnp.sum(A, axis=1)
    d = 1.0 / jnp.sqrt(d + 1e-10)
    D = jnp.diag(d)
    return D @ A @ D


def generate_cheby_adj(L, K):
    # NOTE: matches the DDGCNN repo (powers of L), not the T_k recursion.
    supports = [jnp.eye(L.shape[0], dtype=L.dtype)]
    if K > 1:
        supports.append(L)
    for _ in range(2, K):
        supports.append(supports[-1] @ L)
    return supports[:K]


def _prep_layer_inputs(lp, piece_widths, B, K):
    """Per-layer host prep: block-diag Chebyshev vstack, per-piece W splits,
    folded BatchNorm(eval) + bias affine."""
    A, W, bias, gamma, beta = lp["A"], lp["W"], lp["b"], lp["gamma"], lp["beta"]
    L = normalize_A(A)
    cheb = generate_cheby_adj(L, K)                     # K x (N, N)
    eye_b = jnp.eye(B, dtype=jnp.float32)
    adj = jnp.concatenate([jnp.kron(eye_b, c) for c in cheb], axis=0)  # (K*BN, BN)
    scale = gamma / jnp.sqrt(1.0 + _BN_EPS)             # BN eval: mean=0, var=1
    shift = jnp.sum(bias, axis=0) * scale + beta        # bias folded into shift
    w_pieces, off = [], 0
    for w in piece_widths:
        w_pieces.append(W[:, off:off + w, :])
        off += w
    return [adj] + w_pieces + [scale[None, :], shift[None, :]]


def dense_ddgcnn_forward(x_nchw, params, *, K, n_blocks, num_out):
    """x_nchw: (B, num_features, num_nodes, 1) -> logits (B, nclass)."""
    B, C0, N, _ = x_nchw.shape
    BN = B * N

    # (B, C, N, 1) -> (B*N, C): node rows, channel lanes.
    x = jnp.transpose(x_nchw[..., 0], (0, 2, 1)).reshape(BN, C0)

    inputs = [x]
    inputs += _prep_layer_inputs(params["bottle_neck"], [C0], B, K)
    piece_widths = [num_out]
    for i in range(n_blocks - 1):
        blk = params["blocks"][i]
        half = (num_out * (i + 1)) // 2
        inputs += _prep_layer_inputs(blk["b1"], list(piece_widths), B, K)
        inputs += _prep_layer_inputs(blk["b2"], [half], B, K)
        inputs += _prep_layer_inputs(blk["b3"], [half], B, K)
        piece_widths.append(num_out)

    # FC head.  PyTorch flattens (B, C, N, 1) channel-major (idx = c*N + n);
    # permute fc1_w offline to [c, b*N+n, hidden] and split per dense piece.
    fc1_w, fc1_b = params["fc1_w"], params["fc1_b"]
    fc2_w, fc2_b = params["fc2_w"], params["fc2_b"]
    hidden = fc1_w.shape[1]
    nclass = fc2_w.shape[1]
    c_final = sum(piece_widths)
    cube = fc1_w.reshape(c_final, N, hidden)                        # [c, n, j]
    cube = jnp.broadcast_to(cube[:, None, :, :], (c_final, B, N, hidden))
    cube = cube.reshape(c_final, BN, hidden)                        # [c, b*N+n, j]
    off = 0
    for w in piece_widths:
        inputs.append(cube[off:off + w])
        off += w
    # Block-row summing matrix: h[b] = sum_n q[b*N + n].
    inputs.append(jnp.kron(jnp.eye(B, dtype=jnp.float32),
                           jnp.ones((1, N), jnp.float32)))          # (B, BN)
    inputs.append(fc1_b[None, :])
    inputs.append(fc2_w)
    inputs.append(fc2_b[None, :])

    kernel = _make_fused_kernel(B=B, N=N, K=K, n_blocks=n_blocks)
    return pl.pallas_call(
        kernel,
        out_shape=jax.ShapeDtypeStruct((B, nclass), jnp.float32),
    )(*inputs)


# ----------------------------------------------------------------------------
# Deterministic parameter construction
# ----------------------------------------------------------------------------
def _make_dcdgcn_params(key, N, Cin, Cout, K):
    ka, kw, kb = jax.random.split(key, 3)
    return {
        "A": jax.random.normal(ka, (N, N), jnp.float32) * 0.1,
        "W": jax.random.normal(kw, (K, Cin, Cout), jnp.float32) * 0.1,
        "b": jax.random.normal(kb, (K, Cout), jnp.float32) * 0.01,
        "gamma": jnp.ones((Cout,), jnp.float32),
        "beta": jnp.zeros((Cout,), jnp.float32),
    }


def make_params(key, num_nodes, num_features, num_out, K, n_blocks, nclass):
    keys = iter(jax.random.split(key, 4 + 3 * max(n_blocks - 1, 0) + 4))
    params = {
        "bottle_neck": _make_dcdgcn_params(next(keys), num_nodes,
                                           num_features, num_out, K),
        "blocks": [],
    }
    for i in range(1, n_blocks):                    # DenseGCNNblock(num_out*i -> num_out)
        in_c = num_out * i
        params["blocks"].append({
            "b1": _make_dcdgcn_params(next(keys), num_nodes, in_c, in_c // 2, K),
            "b2": _make_dcdgcn_params(next(keys), num_nodes, in_c // 2, in_c // 2, K),
            "b3": _make_dcdgcn_params(next(keys), num_nodes, in_c // 2, num_out, K),
        })
    fc1_in = num_nodes * num_out * n_blocks
    params["fc1_w"] = jax.random.normal(next(keys), (fc1_in, 64), jnp.float32) * 0.05
    params["fc1_b"] = jax.random.normal(next(keys), (64,), jnp.float32) * 0.01
    params["fc2_w"] = jax.random.normal(next(keys), (64, nclass), jnp.float32) * 0.05
    params["fc2_b"] = jax.random.normal(next(keys), (nclass,), jnp.float32) * 0.01
    return params


# ----------------------------------------------------------------------------
if __name__ == "__main__":
    B, num_features, num_nodes = 2, 4, 16           # xdim = (B, 4, 16, 1)
    K, num_out, n_blocks, nclass = 3, 8, 3, 4

    root = jax.random.PRNGKey(0)
    k_x, k_p = jax.random.split(root)
    x = jax.random.normal(k_x, (B, num_features, num_nodes, 1), jnp.float32)
    params = make_params(k_p, num_nodes, num_features, num_out, K, n_blocks, nclass)

    fwd = jax.jit(functools.partial(dense_ddgcnn_forward, K=K,
                                    n_blocks=n_blocks, num_out=num_out))
    logits = fwd(x, params)
    jax.block_until_ready(logits)
    assert logits.shape == (B, nclass)
    print("KERNEL_OK")
</pallas_src>

<mosaic_0001>
module attributes {stable_mosaic.version = 11 : i64} {
  func.func @kernel(%arg0: memref<32x4xf32, #tpu.memory_space<vmem>>, %arg1: memref<96x32xf32, #tpu.memory_space<vmem>>, %arg2: memref<3x4x8xf32, #tpu.memory_space<vmem>>, %arg3: memref<1x8xf32, #tpu.memory_space<vmem>>, %arg4: memref<1x8xf32, #tpu.memory_space<vmem>>, %arg5: memref<96x32xf32, #tpu.memory_space<vmem>>, %arg6: memref<3x8x4xf32, #tpu.memory_space<vmem>>, %arg7: memref<1x4xf32, #tpu.memory_space<vmem>>, %arg8: memref<1x4xf32, #tpu.memory_space<vmem>>, %arg9: memref<96x32xf32, #tpu.memory_space<vmem>>, %arg10: memref<3x4x4xf32, #tpu.memory_space<vmem>>, %arg11: memref<1x4xf32, #tpu.memory_space<vmem>>, %arg12: memref<1x4xf32, #tpu.memory_space<vmem>>, %arg13: memref<96x32xf32, #tpu.memory_space<vmem>>, %arg14: memref<3x4x8xf32, #tpu.memory_space<vmem>>, %arg15: memref<1x8xf32, #tpu.memory_space<vmem>>, %arg16: memref<1x8xf32, #tpu.memory_space<vmem>>, %arg17: memref<96x32xf32, #tpu.memory_space<vmem>>, %arg18: memref<3x8x8xf32, #tpu.memory_space<vmem>>, %arg19: memref<3x8x8xf32, #tpu.memory_space<vmem>>, %arg20: memref<1x8xf32, #tpu.memory_space<vmem>>, %arg21: memref<1x8xf32, #tpu.memory_space<vmem>>, %arg22: memref<96x32xf32, #tpu.memory_space<vmem>>, %arg23: memref<3x8x8xf32, #tpu.memory_space<vmem>>, %arg24: memref<1x8xf32, #tpu.memory_space<vmem>>, %arg25: memref<1x8xf32, #tpu.memory_space<vmem>>, %arg26: memref<96x32xf32, #tpu.memory_space<vmem>>, %arg27: memref<3x8x8xf32, #tpu.memory_space<vmem>>, %arg28: memref<1x8xf32, #tpu.memory_space<vmem>>, %arg29: memref<1x8xf32, #tpu.memory_space<vmem>>, %arg30: memref<8x32x64xf32, #tpu.memory_space<vmem>>, %arg31: memref<8x32x64xf32, #tpu.memory_space<vmem>>, %arg32: memref<8x32x64xf32, #tpu.memory_space<vmem>>, %arg33: memref<2x32xf32, #tpu.memory_space<vmem>>, %arg34: memref<1x64xf32, #tpu.memory_space<vmem>>, %arg35: memref<64x4xf32, #tpu.memory_space<vmem>>, %arg36: memref<1x4xf32, #tpu.memory_space<vmem>>, %arg37: memref<2x4xf32, #tpu.memory_space<vmem>>) attributes {dimension_semantics = [], scalar_prefetch = 0 : i64, scratch_operands = 0 : i64, tpu.core_type = #tpu.core_type<tc>} {
    %c0 = arith.constant 0 : index
    %c0_0 = arith.constant 0 : index
    %0 = vector.load %arg0[%c0, %c0_0] : memref<32x4xf32, #tpu.memory_space<vmem>>, vector<32x4xf32>
    %c0_1 = arith.constant 0 : index
    %c0_2 = arith.constant 0 : index
    %1 = vector.load %arg1[%c0_1, %c0_2] : memref<96x32xf32, #tpu.memory_space<vmem>>, vector<96x32xf32>
    %c0_3 = arith.constant 0 : index
    %c0_4 = arith.constant 0 : index
    %2 = vector.load %arg3[%c0_3, %c0_4] : memref<1x8xf32, #tpu.memory_space<vmem>>, vector<1x8xf32>
    %c0_5 = arith.constant 0 : index
    %c0_6 = arith.constant 0 : index
    %3 = vector.load %arg4[%c0_5, %c0_6] : memref<1x8xf32, #tpu.memory_space<vmem>>, vector<1x8xf32>
    %cst = arith.constant 0.000000e+00 : f32
    %4 = vector.broadcast %cst : f32 to vector<32x8xf32>
    %cst_7 = arith.constant dense<0.000000e+00> : vector<96x4xf32>
    %5 = tpu.matmul %1, %0, %cst_7 {dimension_numbers = #tpu.dot_dimension_numbers<[1], [0], [0], [1], [0, 0, 1, 1], [], []>} : vector<96x32xf32>, vector<32x4xf32>, vector<96x4xf32> -> vector<96x4xf32>
    %6 = vector.extract_strided_slice %5 {offsets = [0, 0], sizes = [32, 4], strides = [1, 1]} : vector<96x4xf32> to vector<32x4xf32>
    %c0_8 = arith.constant 0 : index
    %c0_9 = arith.constant 0 : index
    %c0_10 = arith.constant 0 : index
    %7 = vector.load %arg2[%c0_8, %c0_9, %c0_10] : memref<3x4x8xf32, #tpu.memory_space<vmem>>, vector<1x4x8xf32>
    %8 = vector.shape_cast %7 : vector<1x4x8xf32> to vector<4x8xf32>
    %cst_11 = arith.constant dense<0.000000e+00> : vector<32x8xf32>
    %9 = tpu.matmul %6, %8, %cst_11 {dimension_numbers = #tpu.dot_dimension_numbers<[1], [0], [0], [1], [0, 0, 1, 1], [], []>} : vector<32x4xf32>, vector<4x8xf32>, vector<32x8xf32> -> vector<32x8xf32>
    %10 = arith.addf %4, %9 : vector<32x8xf32>
    %11 = vector.extract_strided_slice %5 {offsets = [32, 0], sizes = [32, 4], strides = [1, 1]} : vector<96x4xf32> to vector<32x4xf32>
    %c1 = arith.constant 1 : index
    %c0_12 = arith.constant 0 : index
    %c0_13 = arith.constant 0 : index
    %12 = vector.load %arg2[%c1, %c0_12, %c0_13] : memref<3x4x8xf32, #tpu.memory_space<vmem>>, vector<1x4x8xf32>
    %13 = vector.shape_cast %12 : vector<1x4x8xf32> to vector<4x8xf32>
    %cst_14 = arith.constant dense<0.000000e+00> : vector<32x8xf32>
    %14 = tpu.matmul %11, %13, %cst_14 {dimension_numbers = #tpu.dot_dimension_numbers<[1], [0], [0], [1], [0, 0, 1, 1], [], []>} : vector<32x4xf32>, vector<4x8xf32>, vector<32x8xf32> -> vector<32x8xf32>
    %15 = arith.addf %10, %14 : vector<32x8xf32>
    %16 = vector.extract_strided_slice %5 {offsets = [64, 0], sizes = [32, 4], strides = [1, 1]} : vector<96x4xf32> to vector<32x4xf32>
    %c2 = arith.constant 2 : index
    %c0_15 = arith.constant 0 : index
    %c0_16 = arith.constant 0 : index
    %17 = vector.load %arg2[%c2, %c0_15, %c0_16] : memref<3x4x8xf32, #tpu.memory_space<vmem>>, vector<1x4x8xf32>
    %18 = vector.shape_cast %17 : vector<1x4x8xf32> to vector<4x8xf32>
    %cst_17 = arith.constant dense<0.000000e+00> : vector<32x8xf32>
    %19 = tpu.matmul %16, %18, %cst_17 {dimension_numbers = #tpu.dot_dimension_numbers<[1], [0], [0], [1], [0, 0, 1, 1], [], []>} : vector<32x4xf32>, vector<4x8xf32>, vector<32x8xf32> -> vector<32x8xf32>
    %20 = arith.addf %15, %19 : vector<32x8xf32>
    %21 = vector.broadcast %2 : vector<1x8xf32> to vector<32x8xf32>
    %22 = arith.mulf %20, %21 : vector<32x8xf32>
    %23 = vector.broadcast %3 : vector<1x8xf32> to vector<32x8xf32>
    %24 = arith.addf %22, %23 : vector<32x8xf32>
    %cst_18 = arith.constant 0.000000e+00 : f32
    %25 = vector.broadcast %cst_18 : f32 to vector<32x8xf32>
    %26 = arith.maximumf %24, %25 : vector<32x8xf32>
    %c0_19 = arith.constant 0 : index
    %c0_20 = arith.constant 0 : index
    %27 = vector.load %arg5[%c0_19, %c0_20] : memref<96x32xf32, #tpu.memory_space<vmem>>, vector<96x32xf32>
    %c0_21 = arith.constant 0 : index
    %c0_22 = arith.constant 0 : index
    %28 = vector.load %arg7[%c0_21, %c0_22] : memref<1x4xf32, #tpu.memory_space<vmem>>, vector<1x4xf32>
    %c0_23 = arith.constant 0 : index
    %c0_24 = arith.constant 0 : index
    %29 = vector.load %arg8[%c0_23, %c0_24] : memref<1x4xf32, #tpu.memory_space<vmem>>, vector<1x4xf32>
    %cst_25 = arith.constant 0.000000e+00 : f32
    %30 = vector.broadcast %cst_25 : f32 to vector<32x4xf32>
    %cst_26 = arith.constant dense<0.000000e+00> : vector<96x8xf32>
    %31 = tpu.matmul %27, %26, %cst_26 {dimension_numbers = #tpu.dot_dimension_numbers<[1], [0], [0], [1], [0, 0, 1, 1], [], []>} : vector<96x32xf32>, vector<32x8xf32>, vector<96x8xf32> -> vector<96x8xf32>
    %32 = vector.extract_strided_slice %31 {offsets = [0, 0], sizes = [32, 8], strides = [1, 1]} : vector<96x8xf32> to vector<32x8xf32>
    %c0_27 = arith.constant 0 : index
    %c0_28 = arith.constant 0 : index
    %c0_29 = arith.constant 0 : index
    %33 = vector.load %arg6[%c0_27, %c0_28, %c0_29] : memref<3x8x4xf32, #tpu.memory_space<vmem>>, vector<1x8x4xf32>
    %34 = vector.shape_cast %33 : vector<1x8x4xf32> to vector<8x4xf32>
    %cst_30 = arith.constant dense<0.000000e+00> : vector<32x4xf32>
    %35 = tpu.matmul %32, %34, %cst_30 {dimension_numbers = #tpu.dot_dimension_numbers<[1], [0], [0], [1], [0, 0, 1, 1], [], []>} : vector<32x8xf32>, vector<8x4xf32>, vector<32x4xf32> -> vector<32x4xf32>
    %36 = arith.addf %30, %35 : vector<32x4xf32>
    %37 = vector.extract_strided_slice %31 {offsets = [32, 0], sizes = [32, 8], strides = [1, 1]} : vector<96x8xf32> to vector<32x8xf32>
    %c1_31 = arith.constant 1 : index
    %c0_32 = arith.constant 0 : index
    %c0_33 = arith.constant 0 : index
    %38 = vector.load %arg6[%c1_31, %c0_32, %c0_33] : memref<3x8x4xf32, #tpu.memory_space<vmem>>, vector<1x8x4xf32>
    %39 = vector.shape_cast %38 : vector<1x8x4xf32> to vector<8x4xf32>
    %cst_34 = arith.constant dense<0.000000e+00> : vector<32x4xf32>
    %40 = tpu.matmul %37, %39, %cst_34 {dimension_numbers = #tpu.dot_dimension_numbers<[1], [0], [0], [1], [0, 0, 1, 1], [], []>} : vector<32x8xf32>, vector<8x4xf32>, vector<32x4xf32> -> vector<32x4xf32>
    %41 = arith.addf %36, %40 : vector<32x4xf32>
    %42 = vector.extract_strided_slice %31 {offsets = [64, 0], sizes = [32, 8], strides = [1, 1]} : vector<96x8xf32> to vector<32x8xf32>
    %c2_35 = arith.constant 2 : index
    %c0_36 = arith.constant 0 : index
    %c0_37 = arith.constant 0 : index
    %43 = vector.load %arg6[%c2_35, %c0_36, %c0_37] : memref<3x8x4xf32, #tpu.memory_space<vmem>>, vector<1x8x4xf32>
    %44 = vector.shape_cast %43 : vector<1x8x4xf32> to vector<8x4xf32>
    %cst_38 = arith.constant dense<0.000000e+00> : vector<32x4xf32>
    %45 = tpu.matmul %42, %44, %cst_38 {dimension_numbers = #tpu.dot_dimension_numbers<[1], [0], [0], [1], [0, 0, 1, 1], [], []>} : vector<32x8xf32>, vector<8x4xf32>, vector<32x4xf32> -> vector<32x4xf32>
    %46 = arith.addf %41, %45 : vector<32x4xf32>
    %47 = vector.broadcast %28 : vector<1x4xf32> to vector<32x4xf32>
    %48 = arith.mulf %46, %47 : vector<32x4xf32>
    %49 = vector.broadcast %29 : vector<1x4xf32> to vector<32x4xf32>
    %50 = arith.addf %48, %49 : vector<32x4xf32>
    %cst_39 = arith.constant 0.000000e+00 : f32
    %51 = vector.broadcast %cst_39 : f32 to vector<32x4xf32>
    %52 = arith.maximumf %50, %51 : vector<32x4xf32>
    %c0_40 = arith.constant 0 : index
    %c0_41 = arith.constant 0 : index
    %53 = vector.load %arg9[%c0_40, %c0_41] : memref<96x32xf32, #tpu.memory_space<vmem>>, vector<96x32xf32>
    %c0_42 = arith.constant 0 : index
    %c0_43 = arith.constant 0 : index
    %54 = vector.load %arg11[%c0_42, %c0_43] : memref<1x4xf32, #tpu.memory_space<vmem>>, vector<1x4xf32>
    %c0_44 = arith.constant 0 : index
    %c0_45 = arith.constant 0 : index
    %55 = vector.load %arg12[%c0_44, %c0_45] : memref<1x4xf32, #tpu.memory_space<vmem>>, vector<1x4xf32>
    %cst_46 = arith.constant 0.000000e+00 : f32
    %56 = vector.broadcast %cst_46 : f32 to vector<32x4xf32>
    %cst_47 = arith.constant dense<0.000000e+00> : vector<96x4xf32>
    %57 = tpu.matmul %53, %52, %cst_47 {dimension_numbers = #tpu.dot_dimension_numbers<[1], [0], [0], [1], [0, 0, 1, 1], [], []>} : vector<96x32xf32>, vector<32x4xf32>, vector<96x4xf32> -> vector<96x4xf32>
    %58 = vector.extract_strided_slice %57 {offsets = [0, 0], sizes = [32, 4], strides = [1, 1]} : vector<96x4xf32> to vector<32x4xf32>
    %c0_48 = arith.constant 0 : index
    %c0_49 = arith.constant 0 : index
    %c0_50 = arith.constant 0 : index
    %59 = vector.load %arg10[%c0_48, %c0_49, %c0_50] : memref<3x4x4xf32, #tpu.memory_space<vmem>>, vector<1x4x4xf32>
    %60 = vector.shape_cast %59 : vector<1x4x4xf32> to vector<4x4xf32>
    %cst_51 = arith.constant dense<0.000000e+00> : vector<32x4xf32>
    %61 = tpu.matmul %58, %60, %cst_51 {dimension_numbers = #tpu.dot_dimension_numbers<[1], [0], [0], [1], [0, 0, 1, 1], [], []>} : vector<32x4xf32>, vector<4x4xf32>, vector<32x4xf32> -> vector<32x4xf32>
    %62 = arith.addf %56, %61 : vector<32x4xf32>
    %63 = vector.extract_strided_slice %57 {offsets = [32, 0], sizes = [32, 4], strides = [1, 1]} : vector<96x4xf32> to vector<32x4xf32>
    %c1_52 = arith.constant 1 : index
    %c0_53 = arith.constant 0 : index
    %c0_54 = arith.constant 0 : index
    %64 = vector.load %arg10[%c1_52, %c0_53, %c0_54] : memref<3x4x4xf32, #tpu.memory_space<vmem>>, vector<1x4x4xf32>
    %65 = vector.shape_cast %64 : vector<1x4x4xf32> to vector<4x4xf32>
    %cst_55 = arith.constant dense<0.000000e+00> : vector<32x4xf32>
    %66 = tpu.matmul %63, %65, %cst_55 {dimension_numbers = #tpu.dot_dimension_numbers<[1], [0], [0], [1], [0, 0, 1, 1], [], []>} : vector<32x4xf32>, vector<4x4xf32>, vector<32x4xf32> -> vector<32x4xf32>
    %67 = arith.addf %62, %66 : vector<32x4xf32>
    %68 = vector.extract_strided_slice %57 {offsets = [64, 0], sizes = [32, 4], strides = [1, 1]} : vector<96x4xf32> to vector<32x4xf32>
    %c2_56 = arith.constant 2 : index
    %c0_57 = arith.constant 0 : index
    %c0_58 = arith.constant 0 : index
    %69 = vector.load %arg10[%c2_56, %c0_57, %c0_58] : memref<3x4x4xf32, #tpu.memory_space<vmem>>, vector<1x4x4xf32>
    %70 = vector.shape_cast %69 : vector<1x4x4xf32> to vector<4x4xf32>
    %cst_59 = arith.constant dense<0.000000e+00> : vector<32x4xf32>
    %71 = tpu.matmul %68, %70, %cst_59 {dimension_numbers = #tpu.dot_dimension_numbers<[1], [0], [0], [1], [0, 0, 1, 1], [], []>} : vector<32x4xf32>, vector<4x4xf32>, vector<32x4xf32> -> vector<32x4xf32>
    %72 = arith.addf %67, %71 : vector<32x4xf32>
    %73 = vector.broadcast %54 : vector<1x4xf32> to vector<32x4xf32>
    %74 = arith.mulf %72, %73 : vector<32x4xf32>
    %75 = vector.broadcast %55 : vector<1x4xf32> to vector<32x4xf32>
    %76 = arith.addf %74, %75 : vector<32x4xf32>
    %cst_60 = arith.constant 0.000000e+00 : f32
    %77 = vector.broadcast %cst_60 : f32 to vector<32x4xf32>
    %78 = arith.maximumf %76, %77 : vector<32x4xf32>
    %c0_61 = arith.constant 0 : index
    %c0_62 = arith.constant 0 : index
    %79 = vector.load %arg13[%c0_61, %c0_62] : memref<96x32xf32, #tpu.memory_space<vmem>>, vector<96x32xf32>
    %c0_63 = arith.constant 0 : index
    %c0_64 = arith.constant 0 : index
    %80 = vector.load %arg15[%c0_63, %c0_64] : memref<1x8xf32, #tpu.memory_space<vmem>>, vector<1x8xf32>
    %c0_65 = arith.constant 0 : index
    %c0_66 = arith.constant 0 : index
    %81 = vector.load %arg16[%c0_65, %c0_66] : memref<1x8xf32, #tpu.memory_space<vmem>>, vector<1x8xf32>
    %cst_67 = arith.constant 0.000000e+00 : f32
    %82 = vector.broadcast %cst_67 : f32 to vector<32x8xf32>
    %cst_68 = arith.constant dense<0.000000e+00> : vector<96x4xf32>
    %83 = tpu.matmul %79, %78, %cst_68 {dimension_numbers = #tpu.dot_dimension_numbers<[1], [0], [0], [1], [0, 0, 1, 1], [], []>} : vector<96x32xf32>, vector<32x4xf32>, vector<96x4xf32> -> vector<96x4xf32>
    %84 = vector.extract_strided_slice %83 {offsets = [0, 0], sizes = [32, 4], strides = [1, 1]} : vector<96x4xf32> to vector<32x4xf32>
    %c0_69 = arith.constant 0 : index
    %c0_70 = arith.constant 0 : index
    %c0_71 = arith.constant 0 : index
    %85 = vector.load %arg14[%c0_69, %c0_70, %c0_71] : memref<3x4x8xf32, #tpu.memory_space<vmem>>, vector<1x4x8xf32>
    %86 = vector.shape_cast %85 : vector<1x4x8xf32> to vector<4x8xf32>
    %cst_72 = arith.constant dense<0.000000e+00> : vector<32x8xf32>
    %87 = tpu.matmul %84, %86, %cst_72 {dimension_numbers = #tpu.dot_dimension_numbers<[1], [0], [0], [1], [0, 0, 1, 1], [], []>} : vector<32x4xf32>, vector<4x8xf32>, vector<32x8xf32> -> vector<32x8xf32>
    %88 = arith.addf %82, %87 : vector<32x8xf32>
    %89 = vector.extract_strided_slice %83 {offsets = [32, 0], sizes = [32, 4], strides = [1, 1]} : vector<96x4xf32> to vector<32x4xf32>
    %c1_73 = arith.constant 1 : index
    %c0_74 = arith.constant 0 : index
    %c0_75 = arith.constant 0 : index
    %90 = vector.load %arg14[%c1_73, %c0_74, %c0_75] : memref<3x4x8xf32, #tpu.memory_space<vmem>>, vector<1x4x8xf32>
    %91 = vector.shape_cast %90 : vector<1x4x8xf32> to vector<4x8xf32>
    %cst_76 = arith.constant dense<0.000000e+00> : vector<32x8xf32>
    %92 = tpu.matmul %89, %91, %cst_76 {dimension_numbers = #tpu.dot_dimension_numbers<[1], [0], [0], [1], [0, 0, 1, 1], [], []>} : vector<32x4xf32>, vector<4x8xf32>, vector<32x8xf32> -> vector<32x8xf32>
    %93 = arith.addf %88, %92 : vector<32x8xf32>
    %94 = vector.extract_strided_slice %83 {offsets = [64, 0], sizes = [32, 4], strides = [1, 1]} : vector<96x4xf32> to vector<32x4xf32>
    %c2_77 = arith.constant 2 : index
    %c0_78 = arith.constant 0 : index
    %c0_79 = arith.constant 0 : index
    %95 = vector.load %arg14[%c2_77, %c0_78, %c0_79] : memref<3x4x8xf32, #tpu.memory_space<vmem>>, vector<1x4x8xf32>
    %96 = vector.shape_cast %95 : vector<1x4x8xf32> to vector<4x8xf32>
    %cst_80 = arith.constant dense<0.000000e+00> : vector<32x8xf32>
    %97 = tpu.matmul %94, %96, %cst_80 {dimension_numbers = #tpu.dot_dimension_numbers<[1], [0], [0], [1], [0, 0, 1, 1], [], []>} : vector<32x4xf32>, vector<4x8xf32>, vector<32x8xf32> -> vector<32x8xf32>
    %98 = arith.addf %93, %97 : vector<32x8xf32>
    %99 = vector.broadcast %80 : vector<1x8xf32> to vector<32x8xf32>
    %100 = arith.mulf %98, %99 : vector<32x8xf32>
    %101 = vector.broadcast %81 : vector<1x8xf32> to vector<32x8xf32>
    %102 = arith.addf %100, %101 : vector<32x8xf32>
    %cst_81 = arith.constant 0.000000e+00 : f32
    %103 = vector.broadcast %cst_81 : f32 to vector<32x8xf32>
    %104 = arith.maximumf %102, %103 : vector<32x8xf32>
    %c0_82 = arith.constant 0 : index
    %c0_83 = arith.constant 0 : index
    %105 = vector.load %arg17[%c0_82, %c0_83] : memref<96x32xf32, #tpu.memory_space<vmem>>, vector<96x32xf32>
    %c0_84 = arith.constant 0 : index
    %c0_85 = arith.constant 0 : index
    %106 = vector.load %arg20[%c0_84, %c0_85] : memref<1x8xf32, #tpu.memory_space<vmem>>, vector<1x8xf32>
    %c0_86 = arith.constant 0 : index
    %c0_87 = arith.constant 0 : index
    %107 = vector.load %arg21[%c0_86, %c0_87] : memref<1x8xf32, #tpu.memory_space<vmem>>, vector<1x8xf32>
    %cst_88 = arith.constant 0.000000e+00 : f32
    %108 = vector.broadcast %cst_88 : f32 to vector<32x8xf32>
    %cst_89 = arith.constant dense<0.000000e+00> : vector<96x8xf32>
    %109 = tpu.matmul %105, %26, %cst_89 {dimension_numbers = #tpu.dot_dimension_numbers<[1], [0], [0], [1], [0, 0, 1, 1], [], []>} : vector<96x32xf32>, vector<32x8xf32>, vector<96x8xf32> -> vector<96x8xf32>
    %110 = vector.extract_strided_slice %109 {offsets = [0, 0], sizes = [32, 8], strides = [1, 1]} : vector<96x8xf32> to vector<32x8xf32>
    %c0_90 = arith.constant 0 : index
    %c0_91 = arith.constant 0 : index
    %c0_92 = arith.constant 0 : index
    %111 = vector.load %arg18[%c0_90, %c0_91, %c0_92] : memref<3x8x8xf32, #tpu.memory_space<vmem>>, vector<1x8x8xf32>
    %112 = vector.shape_cast %111 : vector<1x8x8xf32> to vector<8x8xf32>
    %cst_93 = arith.constant dense<0.000000e+00> : vector<32x8xf32>
    %113 = tpu.matmul %110, %112, %cst_93 {dimension_numbers = #tpu.dot_dimension_numbers<[1], [0], [0], [1], [0, 0, 1, 1], [], []>} : vector<32x8xf32>, vector<8x8xf32>, vector<32x8xf32> -> vector<32x8xf32>
    %114 = arith.addf %108, %113 : vector<32x8xf32>
    %115 = vector.extract_strided_slice %109 {offsets = [32, 0], sizes = [32, 8], strides = [1, 1]} : vector<96x8xf32> to vector<32x8xf32>
    %c1_94 = arith.constant 1 : index
    %c0_95 = arith.constant 0 : index
    %c0_96 = arith.constant 0 : index
    %116 = vector.load %arg18[%c1_94, %c0_95, %c0_96] : memref<3x8x8xf32, #tpu.memory_space<vmem>>, vector<1x8x8xf32>
    %117 = vector.shape_cast %116 : vector<1x8x8xf32> to vector<8x8xf32>
    %cst_97 = arith.constant dense<0.000000e+00> : vector<32x8xf32>
    %118 = tpu.matmul %115, %117, %cst_97 {dimension_numbers = #tpu.dot_dimension_numbers<[1], [0], [0], [1], [0, 0, 1, 1], [], []>} : vector<32x8xf32>, vector<8x8xf32>, vector<32x8xf32> -> vector<32x8xf32>
    %119 = arith.addf %114, %118 : vector<32x8xf32>
    %120 = vector.extract_strided_slice %109 {offsets = [64, 0], sizes = [32, 8], strides = [1, 1]} : vector<96x8xf32> to vector<32x8xf32>
    %c2_98 = arith.constant 2 : index
    %c0_99 = arith.constant 0 : index
    %c0_100 = arith.constant 0 : index
    %121 = vector.load %arg18[%c2_98, %c0_99, %c0_100] : memref<3x8x8xf32, #tpu.memory_space<vmem>>, vector<1x8x8xf32>
    %122 = vector.shape_cast %121 : vector<1x8x8xf32> to vector<8x8xf32>
    %cst_101 = arith.constant dense<0.000000e+00> : vector<32x8xf32>
    %123 = tpu.matmul %120, %122, %cst_101 {dimension_numbers = #tpu.dot_dimension_numbers<[1], [0], [0], [1], [0, 0, 1, 1], [], []>} : vector<32x8xf32>, vector<8x8xf32>, vector<32x8xf32> -> vector<32x8xf32>
    %124 = arith.addf %119, %123 : vector<32x8xf32>
    %cst_102 = arith.constant dense<0.000000e+00> : vector<96x8xf32>
    %125 = tpu.matmul %105, %104, %cst_102 {dimension_numbers = #tpu.dot_dimension_numbers<[1], [0], [0], [1], [0, 0, 1, 1], [], []>} : vector<96x32xf32>, vector<32x8xf32>, vector<96x8xf32> -> vector<96x8xf32>
    %126 = vector.extract_strided_slice %125 {offsets = [0, 0], sizes = [32, 8], strides = [1, 1]} : vector<96x8xf32> to vector<32x8xf32>
    %c0_103 = arith.constant 0 : index
    %c0_104 = arith.constant 0 : index
    %c0_105 = arith.constant 0 : index
    %127 = vector.load %arg19[%c0_103, %c0_104, %c0_105] : memref<3x8x8xf32, #tpu.memory_space<vmem>>, vector<1x8x8xf32>
    %128 = vector.shape_cast %127 : vector<1x8x8xf32> to vector<8x8xf32>
    %cst_106 = arith.constant dense<0.000000e+00> : vector<32x8xf32>
    %129 = tpu.matmul %126, %128, %cst_106 {dimension_numbers = #tpu.dot_dimension_numbers<[1], [0], [0], [1], [0, 0, 1, 1], [], []>} : vector<32x8xf32>, vector<8x8xf32>, vector<32x8xf32> -> vector<32x8xf32>
    %130 = arith.addf %124, %129 : vector<32x8xf32>
    %131 = vector.extract_strided_slice %125 {offsets = [32, 0], sizes = [32, 8], strides = [1, 1]} : vector<96x8xf32> to vector<32x8xf32>
    %c1_107 = arith.constant 1 : index
    %c0_108 = arith.constant 0 : index
    %c0_109 = arith.constant 0 : index
    %132 = vector.load %arg19[%c1_107, %c0_108, %c0_109] : memref<3x8x8xf32, #tpu.memory_space<vmem>>, vector<1x8x8xf32>
    %133 = vector.shape_cast %132 : vector<1x8x8xf32> to vector<8x8xf32>
    %cst_110 = arith.constant dense<0.000000e+00> : vector<32x8xf32>
    %134 = tpu.matmul %131, %133, %cst_110 {dimension_numbers = #tpu.dot_dimension_numbers<[1], [0], [0], [1], [0, 0, 1, 1], [], []>} : vector<32x8xf32>, vector<8x8xf32>, vector<32x8xf32> -> vector<32x8xf32>
    %135 = arith.addf %130, %134 : vector<32x8xf32>
    %136 = vector.extract_strided_slice %125 {offsets = [64, 0], sizes = [32, 8], strides = [1, 1]} : vector<96x8xf32> to vector<32x8xf32>
    %c2_111 = arith.constant 2 : index
    %c0_112 = arith.constant 0 : index
    %c0_113 = arith.constant 0 : index
    %137 = vector.load %arg19[%c2_111, %c0_112, %c0_113] : memref<3x8x8xf32, #tpu.memory_space<vmem>>, vector<1x8x8xf32>
    %138 = vector.shape_cast %137 : vector<1x8x8xf32> to vector<8x8xf32>
    %cst_114 = arith.constant dense<0.000000e+00> : vector<32x8xf32>
    %139 = tpu.matmul %136, %138, %cst_114 {dimension_numbers = #tpu.dot_dimension_numbers<[1], [0], [0], [1], [0, 0, 1, 1], [], []>} : vector<32x8xf32>, vector<8x8xf32>, vector<32x8xf32> -> vector<32x8xf32>
    %140 = arith.addf %135, %139 : vector<32x8xf32>
    %141 = vector.broadcast %106 : vector<1x8xf32> to vector<32x8xf32>
    %142 = arith.mulf %140, %141 : vector<32x8xf32>
    %143 = vector.broadcast %107 : vector<1x8xf32> to vector<32x8xf32>
    %144 = arith.addf %142, %143 : vector<32x8xf32>
    %cst_115 = arith.constant 0.000000e+00 : f32
    %145 = vector.broadcast %cst_115 : f32 to vector<32x8xf32>
    %146 = arith.maximumf %144, %145 : vector<32x8xf32>
    %c0_116 = arith.constant 0 : index
    %c0_117 = arith.constant 0 : index
    %147 = vector.load %arg22[%c0_116, %c0_117] : memref<96x32xf32, #tpu.memory_space<vmem>>, vector<96x32xf32>
    %c0_118 = arith.constant 0 : index
    %c0_119 = arith.constant 0 : index
    %148 = vector.load %arg24[%c0_118, %c0_119] : memref<1x8xf32, #tpu.memory_space<vmem>>, vector<1x8xf32>
    %c0_120 = arith.constant 0 : index
    %c0_121 = arith.constant 0 : index
    %149 = vector.load %arg25[%c0_120, %c0_121] : memref<1x8xf32, #tpu.memory_space<vmem>>, vector<1x8xf32>
    %cst_122 = arith.constant 0.000000e+00 : f32
    %150 = vector.broadcast %cst_122 : f32 to vector<32x8xf32>
    %cst_123 = arith.constant dense<0.000000e+00> : vector<96x8xf32>
    %151 = tpu.matmul %147, %146, %cst_123 {dimension_numbers = #tpu.dot_dimension_numbers<[1], [0], [0], [1], [0, 0, 1, 1], [], []>} : vector<96x32xf32>, vector<32x8xf32>, vector<96x8xf32> -> vector<96x8xf32>
    %152 = vector.extract_strided_slice %151 {offsets = [0, 0], sizes = [32, 8], strides = [1, 1]} : vector<96x8xf32> to vector<32x8xf32>
    %c0_124 = arith.constant 0 : index
    %c0_125 = arith.constant 0 : index
    %c0_126 = arith.constant 0 : index
    %153 = vector.load %arg23[%c0_124, %c0_125, %c0_126] : memref<3x8x8xf32, #tpu.memory_space<vmem>>, vector<1x8x8xf32>
    %154 = vector.shape_cast %153 : vector<1x8x8xf32> to vector<8x8xf32>
    %cst_127 = arith.constant dense<0.000000e+00> : vector<32x8xf32>
    %155 = tpu.matmul %152, %154, %cst_127 {dimension_numbers = #tpu.dot_dimension_numbers<[1], [0], [0], [1], [0, 0, 1, 1], [], []>} : vector<32x8xf32>, vector<8x8xf32>, vector<32x8xf32> -> vector<32x8xf32>
    %156 = arith.addf %150, %155 : vector<32x8xf32>
    %157 = vector.extract_strided_slice %151 {offsets = [32, 0], sizes = [32, 8], strides = [1, 1]} : vector<96x8xf32> to vector<32x8xf32>
    %c1_128 = arith.constant 1 : index
    %c0_129 = arith.constant 0 : index
    %c0_130 = arith.constant 0 : index
    %158 = vector.load %arg23[%c1_128, %c0_129, %c0_130] : memref<3x8x8xf32, #tpu.memory_space<vmem>>, vector<1x8x8xf32>
    %159 = vector.shape_cast %158 : vector<1x8x8xf32> to vector<8x8xf32>
    %cst_131 = arith.constant dense<0.000000e+00> : vector<32x8xf32>
    %160 = tpu.matmul %157, %159, %cst_131 {dimension_numbers = #tpu.dot_dimension_numbers<[1], [0], [0], [1], [0, 0, 1, 1], [], []>} : vector<32x8xf32>, vector<8x8xf32>, vector<32x8xf32> -> vector<32x8xf32>
    %161 = arith.addf %156, %160 : vector<32x8xf32>
    %162 = vector.extract_strided_slice %151 {offsets = [64, 0], sizes = [32, 8], strides = [1, 1]} : vector<96x8xf32> to vector<32x8xf32>
    %c2_132 = arith.constant 2 : index
    %c0_133 = arith.constant 0 : index
    %c0_134 = arith.constant 0 : index
    %163 = vector.load %arg23[%c2_132, %c0_133, %c0_134] : memref<3x8x8xf32, #tpu.memory_space<vmem>>, vector<1x8x8xf32>
    %164 = vector.shape_cast %163 : vector<1x8x8xf32> to vector<8x8xf32>
    %cst_135 = arith.constant dense<0.000000e+00> : vector<32x8xf32>
    %165 = tpu.matmul %162, %164, %cst_135 {dimension_numbers = #tpu.dot_dimension_numbers<[1], [0], [0], [1], [0, 0, 1, 1], [], []>} : vector<32x8xf32>, vector<8x8xf32>, vector<32x8xf32> -> vector<32x8xf32>
    %166 = arith.addf %161, %165 : vector<32x8xf32>
    %167 = vector.broadcast %148 : vector<1x8xf32> to vector<32x8xf32>
    %168 = arith.mulf %166, %167 : vector<32x8xf32>
    %169 = vector.broadcast %149 : vector<1x8xf32> to vector<32x8xf32>
    %170 = arith.addf %168, %169 : vector<32x8xf32>
    %cst_136 = arith.constant 0.000000e+00 : f32
    %171 = vector.broadcast %cst_136 : f32 to vector<32x8xf32>
    %172 = arith.maximumf %170, %171 : vector<32x8xf32>
    %c0_137 = arith.constant 0 : index
    %c0_138 = arith.constant 0 : index
    %173 = vector.load %arg26[%c0_137, %c0_138] : memref<96x32xf32, #tpu.memory_space<vmem>>, vector<96x32xf32>
    %c0_139 = arith.constant 0 : index
    %c0_140 = arith.constant 0 : index
    %174 = vector.load %arg28[%c0_139, %c0_140] : memref<1x8xf32, #tpu.memory_space<vmem>>, vector<1x8xf32>
    %c0_141 = arith.constant 0 : index
    %c0_142 = arith.constant 0 : index
    %175 = vector.load %arg29[%c0_141, %c0_142] : memref<1x8xf32, #tpu.memory_space<vmem>>, vector<1x8xf32>
    %cst_143 = arith.constant 0.000000e+00 : f32
    %176 = vector.broadcast %cst_143 : f32 to vector<32x8xf32>
    %cst_144 = arith.constant dense<0.000000e+00> : vector<96x8xf32>
    %177 = tpu.matmul %173, %172, %cst_144 {dimension_numbers = #tpu.dot_dimension_numbers<[1], [0], [0], [1], [0, 0, 1, 1], [], []>} : vector<96x32xf32>, vector<32x8xf32>, vector<96x8xf32> -> vector<96x8xf32>
    %178 = vector.extract_strided_slice %177 {offsets = [0, 0], sizes = [32, 8], strides = [1, 1]} : vector<96x8xf32> to vector<32x8xf32>
    %c0_145 = arith.constant 0 : index
    %c0_146 = arith.constant 0 : index
    %c0_147 = arith.constant 0 : index
    %179 = vector.load %arg27[%c0_145, %c0_146, %c0_147] : memref<3x8x8xf32, #tpu.memory_space<vmem>>, vector<1x8x8xf32>
    %180 = vector.shape_cast %179 : vector<1x8x8xf32> to vector<8x8xf32>
    %cst_148 = arith.constant dense<0.000000e+00> : vector<32x8xf32>
    %181 = tpu.matmul %178, %180, %cst_148 {dimension_numbers = #tpu.dot_dimension_numbers<[1], [0], [0], [1], [0, 0, 1, 1], [], []>} : vector<32x8xf32>, vector<8x8xf32>, vector<32x8xf32> -> vector<32x8xf32>
    %182 = arith.addf %176, %181 : vector<32x8xf32>
    %183 = vector.extract_strided_slice %177 {offsets = [32, 0], sizes = [32, 8], strides = [1, 1]} : vector<96x8xf32> to vector<32x8xf32>
    %c1_149 = arith.constant 1 : index
    %c0_150 = arith.constant 0 : index
    %c0_151 = arith.constant 0 : index
    %184 = vector.load %arg27[%c1_149, %c0_150, %c0_151] : memref<3x8x8xf32, #tpu.memory_space<vmem>>, vector<1x8x8xf32>
    %185 = vector.shape_cast %184 : vector<1x8x8xf32> to vector<8x8xf32>
    %cst_152 = arith.constant dense<0.000000e+00> : vector<32x8xf32>
    %186 = tpu.matmul %183, %185, %cst_152 {dimension_numbers = #tpu.dot_dimension_numbers<[1], [0], [0], [1], [0, 0, 1, 1], [], []>} : vector<32x8xf32>, vector<8x8xf32>, vector<32x8xf32> -> vector<32x8xf32>
    %187 = arith.addf %182, %186 : vector<32x8xf32>
    %188 = vector.extract_strided_slice %177 {offsets = [64, 0], sizes = [32, 8], strides = [1, 1]} : vector<96x8xf32> to vector<32x8xf32>
    %c2_153 = arith.constant 2 : index
    %c0_154 = arith.constant 0 : index
    %c0_155 = arith.constant 0 : index
    %189 = vector.load %arg27[%c2_153, %c0_154, %c0_155] : memref<3x8x8xf32, #tpu.memory_space<vmem>>, vector<1x8x8xf32>
    %190 = vector.shape_cast %189 : vector<1x8x8xf32> to vector<8x8xf32>
    %cst_156 = arith.constant dense<0.000000e+00> : vector<32x8xf32>
    %191 = tpu.matmul %188, %190, %cst_156 {dimension_numbers = #tpu.dot_dimension_numbers<[1], [0], [0], [1], [0, 0, 1, 1], [], []>} : vector<32x8xf32>, vector<8x8xf32>, vector<32x8xf32> -> vector<32x8xf32>
    %192 = arith.addf %187, %191 : vector<32x8xf32>
    %193 = vector.broadcast %174 : vector<1x8xf32> to vector<32x8xf32>
    %194 = arith.mulf %192, %193 : vector<32x8xf32>
    %195 = vector.broadcast %175 : vector<1x8xf32> to vector<32x8xf32>
    %196 = arith.addf %194, %195 : vector<32x8xf32>
    %cst_157 = arith.constant 0.000000e+00 : f32
    %197 = vector.broadcast %cst_157 : f32 to vector<32x8xf32>
    %198 = arith.maximumf %196, %197 : vector<32x8xf32>
    %c0_158 = arith.constant 0 : index
    %c0_159 = arith.constant 0 : index
    %199 = vector.load %arg33[%c0_158, %c0_159] : memref<2x32xf32, #tpu.memory_space<vmem>>, vector<2x32xf32>
    %c0_160 = arith.constant 0 : index
    %c0_161 = arith.constant 0 : index
    %200 = vector.load %arg34[%c0_160, %c0_161] : memref<1x64xf32, #tpu.memory_space<vmem>>, vector<1x64xf32>
    %c0_162 = arith.constant 0 : index
    %c0_163 = arith.constant 0 : index
    %201 = vector.load %arg35[%c0_162, %c0_163] : memref<64x4xf32, #tpu.memory_space<vmem>>, vector<64x4xf32>
    %c0_164 = arith.constant 0 : index
    %c0_165 = arith.constant 0 : index
    %202 = vector.load %arg36[%c0_164, %c0_165] : memref<1x4xf32, #tpu.memory_space<vmem>>, vector<1x4xf32>
    %cst_166 = arith.constant 0.000000e+00 : f32
    %203 = vector.broadcast %cst_166 : f32 to vector<32x64xf32>
    %204 = vector.extract_strided_slice %26 {offsets = [0, 0], sizes = [32, 1], strides = [1, 1]} : vector<32x8xf32> to vector<32x1xf32>
    %c0_167 = arith.constant 0 : index
    %c0_168 = arith.constant 0 : index
    %c0_169 = arith.constant 0 : index
    %205 = vector.load %arg30[%c0_167, %c0_168, %c0_169] : memref<8x32x64xf32, #tpu.memory_space<vmem>>, vector<1x32x64xf32>
    %206 = vector.shape_cast %205 : vector<1x32x64xf32> to vector<32x64xf32>
    %207 = vector.broadcast %204 : vector<32x1xf32> to vector<32x64xf32>
    %208 = arith.mulf %207, %206 : vector<32x64xf32>
    %209 = arith.addf %203, %208 : vector<32x64xf32>
    %210 = vector.extract_strided_slice %26 {offsets = [0, 1], sizes = [32, 1], strides = [1, 1]} : vector<32x8xf32> to vector<32x1xf32>
    %c1_170 = arith.constant 1 : index
    %c0_171 = arith.constant 0 : index
    %c0_172 = arith.constant 0 : index
    %211 = vector.load %arg30[%c1_170, %c0_171, %c0_172] : memref<8x32x64xf32, #tpu.memory_space<vmem>>, vector<1x32x64xf32>
    %212 = vector.shape_cast %211 : vector<1x32x64xf32> to vector<32x64xf32>
    %213 = vector.broadcast %210 : vector<32x1xf32> to vector<32x64xf32>
    %214 = arith.mulf %213, %212 : vector<32x64xf32>
    %215 = arith.addf %209, %214 : vector<32x64xf32>
    %216 = vector.extract_strided_slice %26 {offsets = [0, 2], sizes = [32, 1], strides = [1, 1]} : vector<32x8xf32> to vector<32x1xf32>
    %c2_173 = arith.constant 2 : index
    %c0_174 = arith.constant 0 : index
    %c0_175 = arith.constant 0 : index
    %217 = vector.load %arg30[%c2_173, %c0_174, %c0_175] : memref<8x32x64xf32, #tpu.memory_space<vmem>>, vector<1x32x64xf32>
    %218 = vector.shape_cast %217 : vector<1x32x64xf32> to vector<32x64xf32>
    %219 = vector.broadcast %216 : vector<32x1xf32> to vector<32x64xf32>
    %220 = arith.mulf %219, %218 : vector<32x64xf32>
    %221 = arith.addf %215, %220 : vector<32x64xf32>
    %222 = vector.extract_strided_slice %26 {offsets = [0, 3], sizes = [32, 1], strides = [1, 1]} : vector<32x8xf32> to vector<32x1xf32>
    %c3 = arith.constant 3 : index
    %c0_176 = arith.constant 0 : index
    %c0_177 = arith.constant 0 : index
    %223 = vector.load %arg30[%c3, %c0_176, %c0_177] : memref<8x32x64xf32, #tpu.memory_space<vmem>>, vector<1x32x64xf32>
    %224 = vector.shape_cast %223 : vector<1x32x64xf32> to vector<32x64xf32>
    %225 = vector.broadcast %222 : vector<32x1xf32> to vector<32x64xf32>
    %226 = arith.mulf %225, %224 : vector<32x64xf32>
    %227 = arith.addf %221, %226 : vector<32x64xf32>
    %228 = vector.extract_strided_slice %26 {offsets = [0, 4], sizes = [32, 1], strides = [1, 1]} : vector<32x8xf32> to vector<32x1xf32>
    %c4 = arith.constant 4 : index
    %c0_178 = arith.constant 0 : index
    %c0_179 = arith.constant 0 : index
    %229 = vector.load %arg30[%c4, %c0_178, %c0_179] : memref<8x32x64xf32, #tpu.memory_space<vmem>>, vector<1x32x64xf32>
    %230 = vector.shape_cast %229 : vector<1x32x64xf32> to vector<32x64xf32>
    %231 = vector.broadcast %228 : vector<32x1xf32> to vector<32x64xf32>
    %232 = arith.mulf %231, %230 : vector<32x64xf32>
    %233 = arith.addf %227, %232 : vector<32x64xf32>
    %234 = vector.extract_strided_slice %26 {offsets = [0, 5], sizes = [32, 1], strides = [1, 1]} : vector<32x8xf32> to vector<32x1xf32>
    %c5 = arith.constant 5 : index
    %c0_180 = arith.constant 0 : index
    %c0_181 = arith.constant 0 : index
    %235 = vector.load %arg30[%c5, %c0_180, %c0_181] : memref<8x32x64xf32, #tpu.memory_space<vmem>>, vector<1x32x64xf32>
    %236 = vector.shape_cast %235 : vector<1x32x64xf32> to vector<32x64xf32>
    %237 = vector.broadcast %234 : vector<32x1xf32> to vector<32x64xf32>
    %238 = arith.mulf %237, %236 : vector<32x64xf32>
    %239 = arith.addf %233, %238 : vector<32x64xf32>
    %240 = vector.extract_strided_slice %26 {offsets = [0, 6], sizes = [32, 1], strides = [1, 1]} : vector<32x8xf32> to vector<32x1xf32>
    %c6 = arith.constant 6 : index
    %c0_182 = arith.constant 0 : index
    %c0_183 = arith.constant 0 : index
    %241 = vector.load %arg30[%c6, %c0_182, %c0_183] : memref<8x32x64xf32, #tpu.memory_space<vmem>>, vector<1x32x64xf32>
    %242 = vector.shape_cast %241 : vector<1x32x64xf32> to vector<32x64xf32>
    %243 = vector.broadcast %240 : vector<32x1xf32> to vector<32x64xf32>
    %244 = arith.mulf %243, %242 : vector<32x64xf32>
    %245 = arith.addf %239, %244 : vector<32x64xf32>
    %246 = vector.extract_strided_slice %26 {offsets = [0, 7], sizes = [32, 1], strides = [1, 1]} : vector<32x8xf32> to vector<32x1xf32>
    %c7 = arith.constant 7 : index
    %c0_184 = arith.constant 0 : index
    %c0_185 = arith.constant 0 : index
    %247 = vector.load %arg30[%c7, %c0_184, %c0_185] : memref<8x32x64xf32, #tpu.memory_space<vmem>>, vector<1x32x64xf32>
    %248 = vector.shape_cast %247 : vector<1x32x64xf32> to vector<32x64xf32>
    %249 = vector.broadcast %246 : vector<32x1xf32> to vector<32x64xf32>
    %250 = arith.mulf %249, %248 : vector<32x64xf32>
    %251 = arith.addf %245, %250 : vector<32x64xf32>
    %252 = vector.extract_strided_slice %104 {offsets = [0, 0], sizes = [32, 1], strides = [1, 1]} : vector<32x8xf32> to vector<32x1xf32>
    %c0_186 = arith.constant 0 : index
    %c0_187 = arith.constant 0 : index
    %c0_188 = arith.constant 0 : index
    %253 = vector.load %arg31[%c0_186, %c0_187, %c0_188] : memref<8x32x64xf32, #tpu.memory_space<vmem>>, vector<1x32x64xf32>
    %254 = vector.shape_cast %253 : vector<1x32x64xf32> to vector<32x64xf32>
    %255 = vector.broadcast %252 : vector<32x1xf32> to vector<32x64xf32>
    %256 = arith.mulf %255, %254 : vector<32x64xf32>
    %257 = arith.addf %251, %256 : vector<32x64xf32>
    %258 = vector.extract_strided_slice %104 {offsets = [0, 1], sizes = [32, 1], strides = [1, 1]} : vector<32x8xf32> to vector<32x1xf32>
    %c1_189 = arith.constant 1 : index
    %c0_190 = arith.constant 0 : index
    %c0_191 = arith.constant 0 : index
    %259 = vector.load %arg31[%c1_189, %c0_190, %c0_191] : memref<8x32x64xf32, #tpu.memory_space<vmem>>, vector<1x32x64xf32>
    %260 = vector.shape_cast %259 : vector<1x32x64xf32> to vector<32x64xf32>
    %261 = vector.broadcast %258 : vector<32x1xf32> to vector<32x64xf32>
    %262 = arith.mulf %261, %260 : vector<32x64xf32>
    %263 = arith.addf %257, %262 : vector<32x64xf32>
    %264 = vector.extract_strided_slice %104 {offsets = [0, 2], sizes = [32, 1], strides = [1, 1]} : vector<32x8xf32> to vector<32x1xf32>
    %c2_192 = arith.constant 2 : index
    %c0_193 = arith.constant 0 : index
    %c0_194 = arith.constant 0 : index
    %265 = vector.load %arg31[%c2_192, %c0_193, %c0_194] : memref<8x32x64xf32, #tpu.memory_space<vmem>>, vector<1x32x64xf32>
    %266 = vector.shape_cast %265 : vector<1x32x64xf32> to vector<32x64xf32>
    %267 = vector.broadcast %264 : vector<32x1xf32> to vector<32x64xf32>
    %268 = arith.mulf %267, %266 : vector<32x64xf32>
    %269 = arith.addf %263, %268 : vector<32x64xf32>
    %270 = vector.extract_strided_slice %104 {offsets = [0, 3], sizes = [32, 1], strides = [1, 1]} : vector<32x8xf32> to vector<32x1xf32>
    %c3_195 = arith.constant 3 : index
    %c0_196 = arith.constant 0 : index
    %c0_197 = arith.constant 0 : index
    %271 = vector.load %arg31[%c3_195, %c0_196, %c0_197] : memref<8x32x64xf32, #tpu.memory_space<vmem>>, vector<1x32x64xf32>
    %272 = vector.shape_cast %271 : vector<1x32x64xf32> to vector<32x64xf32>
    %273 = vector.broadcast %270 : vector<32x1xf32> to vector<32x64xf32>
    %274 = arith.mulf %273, %272 : vector<32x64xf32>
    %275 = arith.addf %269, %274 : vector<32x64xf32>
    %276 = vector.extract_strided_slice %104 {offsets = [0, 4], sizes = [32, 1], strides = [1, 1]} : vector<32x8xf32> to vector<32x1xf32>
    %c4_198 = arith.constant 4 : index
    %c0_199 = arith.constant 0 : index
    %c0_200 = arith.constant 0 : index
    %277 = vector.load %arg31[%c4_198, %c0_199, %c0_200] : memref<8x32x64xf32, #tpu.memory_space<vmem>>, vector<1x32x64xf32>
    %278 = vector.shape_cast %277 : vector<1x32x64xf32> to vector<32x64xf32>
    %279 = vector.broadcast %276 : vector<32x1xf32> to vector<32x64xf32>
    %280 = arith.mulf %279, %278 : vector<32x64xf32>
    %281 = arith.addf %275, %280 : vector<32x64xf32>
    %282 = vector.extract_strided_slice %104 {offsets = [0, 5], sizes = [32, 1], strides = [1, 1]} : vector<32x8xf32> to vector<32x1xf32>
    %c5_201 = arith.constant 5 : index
    %c0_202 = arith.constant 0 : index
    %c0_203 = arith.constant 0 : index
    %283 = vector.load %arg31[%c5_201, %c0_202, %c0_203] : memref<8x32x64xf32, #tpu.memory_space<vmem>>, vector<1x32x64xf32>
    %284 = vector.shape_cast %283 : vector<1x32x64xf32> to vector<32x64xf32>
    %285 = vector.broadcast %282 : vector<32x1xf32> to vector<32x64xf32>
    %286 = arith.mulf %285, %284 : vector<32x64xf32>
    %287 = arith.addf %281, %286 : vector<32x64xf32>
    %288 = vector.extract_strided_slice %104 {offsets = [0, 6], sizes = [32, 1], strides = [1, 1]} : vector<32x8xf32> to vector<32x1xf32>
    %c6_204 = arith.constant 6 : index
    %c0_205 = arith.constant 0 : index
    %c0_206 = arith.constant 0 : index
    %289 = vector.load %arg31[%c6_204, %c0_205, %c0_206] : memref<8x32x64xf32, #tpu.memory_space<vmem>>, vector<1x32x64xf32>
    %290 = vector.shape_cast %289 : vector<1x32x64xf32> to vector<32x64xf32>
    %291 = vector.broadcast %288 : vector<32x1xf32> to vector<32x64xf32>
    %292 = arith.mulf %291, %290 : vector<32x64xf32>
    %293 = arith.addf %287, %292 : vector<32x64xf32>
    %294 = vector.extract_strided_slice %104 {offsets = [0, 7], sizes = [32, 1], strides = [1, 1]} : vector<32x8xf32> to vector<32x1xf32>
    %c7_207 = arith.constant 7 : index
    %c0_208 = arith.constant 0 : index
    %c0_209 = arith.constant 0 : index
    %295 = vector.load %arg31[%c7_207, %c0_208, %c0_209] : memref<8x32x64xf32, #tpu.memory_space<vmem>>, vector<1x32x64xf32>
    %296 = vector.shape_cast %295 : vector<1x32x64xf32> to vector<32x64xf32>
    %297 = vector.broadcast %294 : vector<32x1xf32> to vector<32x64xf32>
    %298 = arith.mulf %297, %296 : vector<32x64xf32>
    %299 = arith.addf %293, %298 : vector<32x64xf32>
    %300 = vector.extract_strided_slice %198 {offsets = [0, 0], sizes = [32, 1], strides = [1, 1]} : vector<32x8xf32> to vector<32x1xf32>
    %c0_210 = arith.constant 0 : index
    %c0_211 = arith.constant 0 : index
    %c0_212 = arith.constant 0 : index
    %301 = vector.load %arg32[%c0_210, %c0_211, %c0_212] : memref<8x32x64xf32, #tpu.memory_space<vmem>>, vector<1x32x64xf32>
    %302 = vector.shape_cast %301 : vector<1x32x64xf32> to vector<32x64xf32>
    %303 = vector.broadcast %300 : vector<32x1xf32> to vector<32x64xf32>
    %304 = arith.mulf %303, %302 : vector<32x64xf32>
    %305 = arith.addf %299, %304 : vector<32x64xf32>
    %306 = vector.extract_strided_slice %198 {offsets = [0, 1], sizes = [32, 1], strides = [1, 1]} : vector<32x8xf32> to vector<32x1xf32>
    %c1_213 = arith.constant 1 : index
    %c0_214 = arith.constant 0 : index
    %c0_215 = arith.constant 0 : index
    %307 = vector.load %arg32[%c1_213, %c0_214, %c0_215] : memref<8x32x64xf32, #tpu.memory_space<vmem>>, vector<1x32x64xf32>
    %308 = vector.shape_cast %307 : vector<1x32x64xf32> to vector<32x64xf32>
    %309 = vector.broadcast %306 : vector<32x1xf32> to vector<32x64xf32>
    %310 = arith.mulf %309, %308 : vector<32x64xf32>
    %311 = arith.addf %305, %310 : vector<32x64xf32>
    %312 = vector.extract_strided_slice %198 {offsets = [0, 2], sizes = [32, 1], strides = [1, 1]} : vector<32x8xf32> to vector<32x1xf32>
    %c2_216 = arith.constant 2 : index
    %c0_217 = arith.constant 0 : index
    %c0_218 = arith.constant 0 : index
    %313 = vector.load %arg32[%c2_216, %c0_217, %c0_218] : memref<8x32x64xf32, #tpu.memory_space<vmem>>, vector<1x32x64xf32>
    %314 = vector.shape_cast %313 : vector<1x32x64xf32> to vector<32x64xf32>
    %315 = vector.broadcast %312 : vector<32x1xf32> to vector<32x64xf32>
    %316 = arith.mulf %315, %314 : vector<32x64xf32>
    %317 = arith.addf %311, %316 : vector<32x64xf32>
    %318 = vector.extract_strided_slice %198 {offsets = [0, 3], sizes = [32, 1], strides = [1, 1]} : vector<32x8xf32> to vector<32x1xf32>
    %c3_219 = arith.constant 3 : index
    %c0_220 = arith.constant 0 : index
    %c0_221 = arith.constant 0 : index
    %319 = vector.load %arg32[%c3_219, %c0_220, %c0_221] : memref<8x32x64xf32, #tpu.memory_space<vmem>>, vector<1x32x64xf32>
    %320 = vector.shape_cast %319 : vector<1x32x64xf32> to vector<32x64xf32>
    %321 = vector.broadcast %318 : vector<32x1xf32> to vector<32x64xf32>
    %322 = arith.mulf %321, %320 : vector<32x64xf32>
    %323 = arith.addf %317, %322 : vector<32x64xf32>
    %324 = vector.extract_strided_slice %198 {offsets = [0, 4], sizes = [32, 1], strides = [1, 1]} : vector<32x8xf32> to vector<32x1xf32>
    %c4_222 = arith.constant 4 : index
    %c0_223 = arith.constant 0 : index
    %c0_224 = arith.constant 0 : index
    %325 = vector.load %arg32[%c4_222, %c0_223, %c0_224] : memref<8x32x64xf32, #tpu.memory_space<vmem>>, vector<1x32x64xf32>
    %326 = vector.shape_cast %325 : vector<1x32x64xf32> to vector<32x64xf32>
    %327 = vector.broadcast %324 : vector<32x1xf32> to vector<32x64xf32>
    %328 = arith.mulf %327, %326 : vector<32x64xf32>
    %329 = arith.addf %323, %328 : vector<32x64xf32>
    %330 = vector.extract_strided_slice %198 {offsets = [0, 5], sizes = [32, 1], strides = [1, 1]} : vector<32x8xf32> to vector<32x1xf32>
    %c5_225 = arith.constant 5 : index
    %c0_226 = arith.constant 0 : index
    %c0_227 = arith.constant 0 : index
    %331 = vector.load %arg32[%c5_225, %c0_226, %c0_227] : memref<8x32x64xf32, #tpu.memory_space<vmem>>, vector<1x32x64xf32>
    %332 = vector.shape_cast %331 : vector<1x32x64xf32> to vector<32x64xf32>
    %333 = vector.broadcast %330 : vector<32x1xf32> to vector<32x64xf32>
    %334 = arith.mulf %333, %332 : vector<32x64xf32>
    %335 = arith.addf %329, %334 : vector<32x64xf32>
    %336 = vector.extract_strided_slice %198 {offsets = [0, 6], sizes = [32, 1], strides = [1, 1]} : vector<32x8xf32> to vector<32x1xf32>
    %c6_228 = arith.constant 6 : index
    %c0_229 = arith.constant 0 : index
    %c0_230 = arith.constant 0 : index
    %337 = vector.load %arg32[%c6_228, %c0_229, %c0_230] : memref<8x32x64xf32, #tpu.memory_space<vmem>>, vector<1x32x64xf32>
    %338 = vector.shape_cast %337 : vector<1x32x64xf32> to vector<32x64xf32>
    %339 = vector.broadcast %336 : vector<32x1xf32> to vector<32x64xf32>
    %340 = arith.mulf %339, %338 : vector<32x64xf32>
    %341 = arith.addf %335, %340 : vector<32x64xf32>
    %342 = vector.extract_strided_slice %198 {offsets = [0, 7], sizes = [32, 1], strides = [1, 1]} : vector<32x8xf32> to vector<32x1xf32>
    %c7_231 = arith.constant 7 : index
    %c0_232 = arith.constant 0 : index
    %c0_233 = arith.constant 0 : index
    %343 = vector.load %arg32[%c7_231, %c0_232, %c0_233] : memref<8x32x64xf32, #tpu.memory_space<vmem>>, vector<1x32x64xf32>
    %344 = vector.shape_cast %343 : vector<1x32x64xf32> to vector<32x64xf32>
    %345 = vector.broadcast %342 : vector<32x1xf32> to vector<32x64xf32>
    %346 = arith.mulf %345, %344 : vector<32x64xf32>
    %347 = arith.addf %341, %346 : vector<32x64xf32>
    %cst_234 = arith.constant dense<0.000000e+00> : vector<2x64xf32>
    %348 = tpu.matmul %199, %347, %cst_234 {dimension_numbers = #tpu.dot_dimension_numbers<[1], [0], [0], [1], [0, 0, 1, 1], [], []>} : vector<2x32xf32>, vector<32x64xf32>, vector<2x64xf32> -> vector<2x64xf32>
    %349 = vector.broadcast %200 : vector<1x64xf32> to vector<2x64xf32>
    %350 = arith.addf %348, %349 : vector<2x64xf32>
    %cst_235 = arith.constant 0.000000e+00 : f32
    %351 = vector.broadcast %cst_235 : f32 to vector<2x64xf32>
    %352 = arith.maximumf %350, %351 : vector<2x64xf32>
    %cst_236 = arith.constant dense<0.000000e+00> : vector<2x4xf32>
    %353 = tpu.matmul %352, %201, %cst_236 {dimension_numbers = #tpu.dot_dimension_numbers<[1], [0], [0], [1], [0, 0, 1, 1], [], []>} : vector<2x64xf32>, vector<64x4xf32>, vector<2x4xf32> -> vector<2x4xf32>
    %354 = vector.broadcast %202 : vector<1x4xf32> to vector<2x4xf32>
    %355 = arith.addf %353, %354 : vector<2x4xf32>
    %c0_237 = arith.constant 0 : index
    %c0_238 = arith.constant 0 : index
    %356 = vector.load %arg37[%c0_237, %c0_238] : memref<2x4xf32, #tpu.memory_space<vmem>>, vector<2x4xf32>
    tpu.vector_store %arg37[%c0_237, %c0_238], %355 {strides = array<i32>} : memref<2x4xf32, #tpu.memory_space<vmem>>, vector<2x4xf32>,
    return
  }
}

</mosaic_0001>

<bundles_post_ra>
// kernel: dense_ddgcnn_forward.1
= control target key start
LH: loop header
LB: loop body
LE: loop exit
PB: predicated region body
PF: predicated region fallthrough
CT: control target
= control target key end

     0   :  { %s3465_s6 = smov 1   ;;  %s3466_s10 = smov 2   ;;  %s4431_s0 = inlined_call_operand.smem [shape: u32[38], index: -1, kind: input, shape index: {}] }
   0x1   :  { %s3519_s5 = sld [smem:[%s4431_s0]]   ;;  %s3467_s14 = smov 3  }
   0x2   :  { %s3524_s9 = sld [smem:[%s4431_s0 + %s3465_s6]]   ;;  %s3468_s18 = smov 4  }
   0x3   :  { %s3529_s13 = sld [smem:[%s4431_s0 + %s3466_s10]]   ;;  %s3469_s22 = smov 5  }
   0x4   :  { %s3534_s17 = sld [smem:[%s4431_s0 + %s3467_s14]]   ;;  %s3470_s26 = smov 6  }
   0x5   :  { %s3539_s21 = sld [smem:[%s4431_s0 + %s3468_s18]]   ;;  %s3471_s30 = smov 7  }
   0x6   :  { %s3544_s25 = sld [smem:[%s4431_s0 + %s3469_s22]]   ;;  %s3472_s4 = smov 8  }
   0x7   :  { %s3549_s29 = sld [smem:[%s4431_s0 + %s3470_s26]]   ;;  %s3473_s10 = smov 9  }
   0x8   :  { %s3554_s3 = sld [smem:[%s4431_s0 + %s3471_s30]]   ;;  %s3474_s15 = smov 10  }
   0x9   :  { %s3559_s8 = sld [smem:[%s4431_s0 + %s3472_s4]]   ;;  %s3475_s20 = smov 11  }
   0xa   :  { %s3564_s14 = sld [smem:[%s4431_s0 + %s3473_s10]]   ;;  %s3476_s26 = smov 12  }
   0xb   :  { %s3569_s19 = sld [smem:[%s4431_s0 + %s3474_s15]]   ;;  %s3477_s1 = smov 13  }
   0xc   :  { %s3574_s24 = sld [smem:[%s4431_s0 + %s3475_s20]]   ;;  %s3478_s7 = smov 14  }
   0xd   :  { %s3579_s30 = sld [smem:[%s4431_s0 + %s3476_s26]]   ;;  %s3479_s15 = smov 15  }
   0xe   :  { %s3584_s6 = sld [smem:[%s4431_s0 + %s3477_s1]]   ;;  %s3480_s22 = smov 16  }
   0xf   :  { %s3589_s12 = sld [smem:[%s4431_s0 + %s3478_s7]]   ;;  %s3481_s28 = smov 17  }
  0x10   :  { %s3594_s20 = sld [smem:[%s4431_s0 + %s3479_s15]]   ;;  %s3482_s7 = smov 18  }
  0x11   :  { %s3599_s27 = sld [smem:[%s4431_s0 + %s3480_s22]]   ;;  %s3483_s15 = smov 19  }
  0x12   :  { %s3604_s4 = sld [smem:[%s4431_s0 + %s3481_s28]]   ;;  %s3484_s22 = smov 20  }
  0x13   :  { %4442 = sst [smem:[#allocation5_spill]] %s3579_s30  ;;  %s3485_s28 = smov 21  }
  0x14   :  { %4443 = sst [smem:[#allocation6_spill]] %s3584_s6 }
  0x15   :  { %s3609_s6 = sld [smem:[%s4431_s0 + %s3482_s7]]   ;;  %s3486_s7 = smov 22  }
  0x16   :  { %4444 = sst [smem:[#allocation7_spill]] %s3594_s20 }
  0x17   :  { %4445 = sst [smem:[#allocation8_spill]] %s3599_s27 }
  0x18   :  { %4446 = sst [smem:[#allocation9_spill]] %s3604_s4 }
  0x19   :  { %s3614_s20 = sld [smem:[%s4431_s0 + %s3483_s15]]   ;;  %s3487_s15 = smov 23  }
  0x1a   :  { %s3619_s27 = sld [smem:[%s4431_s0 + %s3484_s22]]   ;;  %s3488_s22 = smov 24  }
  0x1b   :  { %4447 = sst [smem:[#allocation10_spill]] %s3609_s6 }
  0x1c   :  { %s3624_s4 = sld [smem:[%s4431_s0 + %s3485_s28]]   ;;  %s3489_s28 = smov 25  }
  0x1d   :  { %s3629_s6 = sld [smem:[%s4431_s0 + %s3486_s7]]   ;;  %s3490_s7 = smov 26  }
  0x1f   :  { %4448 = sst [smem:[#allocation11_spill]] %s3614_s20 }
  0x20   :  { %4449 = sst [smem:[#allocation12_spill]] %s3619_s27 }
  0x21   :  { %s3634_s20 = sld [smem:[%s4431_s0 + %s3487_s15]]   ;;  %s3491_s15 = smov 27  }
  0x22   :  { %4450 = sst [smem:[#allocation13_spill]] %s3624_s4 }
  0x23   :  { %4451 = sst [smem:[#allocation14_spill]] %s3629_s6 }
  0x24   :  { %s3639_s27 = sld [smem:[%s4431_s0 + %s3488_s22]]   ;;  %s3492_s22 = smov 28  }
  0x25   :  { %s3644_s4 = sld [smem:[%s4431_s0 + %s3489_s28]]   ;;  %s3493_s28 = smov 29  }
  0x26   :  { %s3649_s6 = sld [smem:[%s4431_s0 + %s3490_s7]]   ;;  %s3494_s7 = smov 30  }
  0x27   :  { %4452 = sst [smem:[#allocation15_spill]] %s3634_s20 }
  0x28   :  { %s3654_s20 = sld [smem:[%s4431_s0 + %s3491_s15]]   ;;  %s3495_s15 = smov 31  }
  0x2a   :  { %4453 = sst [smem:[#allocation16_spill]] %s3639_s27 }
  0x2b   :  { %4454 = sst [smem:[#allocation17_spill]] %s3644_s4 }
  0x2c   :  { %4455 = sst [smem:[#allocation18_spill]] %s3649_s6 }
  0x2d   :  { %s3659_s27 = sld [smem:[%s4431_s0 + %s3492_s22]]   ;;  %s3496_s22 = smov 32  }
  0x2e   :  { %4456 = sst [smem:[#allocation19_spill]] %s3654_s20 }
  0x2f   :  { %s3664_s4 = sld [smem:[%s4431_s0 + %s3493_s28]]   ;;  %s3497_s28 = smov 33  }
  0x30   :  { %s3669_s6 = sld [smem:[%s4431_s0 + %s3494_s7]]   ;;  %s3498_s7 = smov 34  }
  0x31   :  { %s3674_s20 = sld [smem:[%s4431_s0 + %s3495_s15]]   ;;  %s3499_s15 = smov 35  }
  0x32   :  { %s3689_s30 = sld [smem:[%s4431_s0 + %s3498_s7]]  }
  0x33   :  { %4457 = sst [smem:[#allocation20_spill]] %s3659_s27 }
  0x34   :  { %s3679_s27 = sld [smem:[%s4431_s0 + %s3496_s22]]   ;;  %s3500_s22 = smov 36  }
  0x35   :  { %4458 = sst [smem:[#allocation21_spill]] %s3664_s4 }
  0x36   :  { %s3684_s4 = sld [smem:[%s4431_s0 + %s3497_s28]]   ;;  %s3501_s28 = smov 37  }
  0x37   :  { %4459 = sst [smem:[#allocation22_spill]] %s3674_s20 }
  0x38   :  { %s3694_s20 = sld [smem:[%s4431_s0 + %s3499_s15]]  }
  0x3a   :  { %4460 = sst [smem:[#allocation23_spill]] %s3679_s27 }
  0x3b   :  { %s3699_s27 = sld [smem:[%s4431_s0 + %s3500_s22]]  }
  0x3c   :  { %4461 = sst [smem:[#allocation24_spill]] %s3684_s4 }
  0x3d   :  { %s3704_s4 = sld [smem:[%s4431_s0 + %s3501_s28]]  }
  0x3e   :  { %v158_v0 = vld [vmem:[%s3519_s5 + $0x18] sm:$0xff]  ;;  %v157_v1 = vld [vmem:[%s3519_s5 + $0x10] sm:$0xff]  ;;  %v156_v2 = vld [vmem:[%s3519_s5 + $0x8] sm:$0xff]  ;;  %vm173_vm0 = vcmask 261120  }
  0x3f   :  { %222 = vmatpush.msra.mxu0 %v158_v0  ;;  %v155_v3 = vld [vmem:[%s3519_s5] sm:$0xff] }
  0x40   :  { %v159_v4 = vld [vmem:[%s3524_s9] sm:$0xff] }
  0x41   :  { %223 = vmatpush.msra.mxu0 %v157_v1 }
  0x43   :  { %224 = vmatpush.msra.mxu0 %v156_v2 }
  0x45   :  { %225 = vmatpush.msra.mxu0 %v155_v3 }
  0x46   :  { %2979 = vmatmul.msk.f32.vlgmr.msra.gmra.mxu0 %vm173_vm0, %v159_v4 }
  0x47   :  { %80 = vsyncpa [#allocation3], 0  ;;  %v160_v5 = vld [vmem:[%s3524_s9 + $0x8] sm:$0xff]  ;;  %v161_v6 = vld [vmem:[%s3524_s9 + $0x10] sm:$0xff]  ;;  %vm279_vm1 = vcmask 1043456   ;;  %vm266_vm2 = vcmask 31744  }
  0x48   :  { %v162_v7 = vld [vmem:[%s3524_s9 + $0x18] sm:$0xff]  ;;  %v163_v8 = vld [vmem:[%s3524_s9 + $0x20] sm:$0xff]  ;;  %v164_v9 = vld [vmem:[%s3524_s9 + $0x28] sm:$0xff]  ;;  %v3502_v31 = vmov 3   ;;  %v3503_v32 = vmov 1   ;;  %v3504_v33 = vmov 0  }
  0x49   :  { %v165_v10 = vld [vmem:[%s3524_s9 + $0x30] sm:$0xff]  ;;  %v166_v11 = vld [vmem:[%s3524_s9 + $0x38] sm:$0xff]  ;;  %v167_v12 = vld [vmem:[%s3524_s9 + $0x40] sm:$0xff]  ;;  %3332 = vset.pattern.permute.xlu1 %v3502_v31  ;;  %3330 = vset.pattern.permute.xlu2 %v3503_v32  ;;  %v3505_v51 = vmov 6   ;;  %v3506_v52 = vmov 2   ;;  %v3507_v55 = vmov 4  }
  0x4a   :  { %v168_v13 = vld [vmem:[%s3524_s9 + $0x48] sm:$0xff]  ;;  %v169_v14 = vld [vmem:[%s3524_s9 + $0x50] sm:$0xff]  ;;  %v170_v15 = vld [vmem:[%s3524_s9 + $0x58] sm:$0xff]  ;;  %3329 = vset.pattern.permute.xlu0 %v3504_v33  ;;  %v3508_v3 = vmov 5   ;;  %vm530_vm3 = vcmask 64512   ;;  %s4462_s0 = sld [smem:[#allocation5_spill]] }
  0x4b   :  { %v263_v16 = vld [vmem:[%s3529_s13] sm:$0xf]  ;;  %v2991_v17 = vld [vmem:[%s3529_s13 + $0x4] sm:$0xf]  ;;  %v3002_v22 = vld [vmem:[%s3529_s13 + $0x8] sm:$0xf] }
  0x4c   :  { %2997 = vmatpush.msk.msrb.mxu0 %vm279_vm1, %v263_v16  ;;  %3282 = vmatpush.msk.msra.mxu2 %vm279_vm1, %v263_v16  ;;  %v3423_v37 = vld [vmem:[%s3534_s17] ss:$0 sm:$0xff]  ;;  %v431_v16 = vld [vmem:[%s3544_s25 + $0x38] sm:$0xff]  ;;  %s4463_s5 = sld [smem:[#allocation6_spill]]  ;;  %vm2900_vm4 = vcmask 523264   ;;  %s3510_s16 = smov [#allocation2]  }
  0x4d   :  { %2992 = vmatpush.msk.msra.mxu1 %vm279_vm1, %v2991_v17  ;;  %3003 = vmatpush.msk.msra.mxu3 %vm279_vm1, %v3002_v22  ;;  %v3424_v41 = vld [vmem:[%s3539_s21] ss:$0 sm:$0xff]  ;;  %s4464_s9 = sld [smem:[#allocation9_spill]]  ;;  %s2931_s18 = sshll.u32 %s3510_s16, 4  ;;  %vm2924_vm5 = vcmask 25600   ;;  %s2932_s18 = int_to_ptr.vmem [resolvable:$true] %s2931_s18 }
  0x4e   :  { %2980 = vmatmul.msk.f32.gmra.mxu0 %vm173_vm0, %v160_v5  ;;  %v3196_v22 = vld [vmem:[%s3669_s6 + $0x20] sm:$0xff]  ;;  %s4465_s13 = sld [smem:[#allocation7_spill]]  ;;  %s2933_s22 = sshll.u32 %s3704_s4, 4  ;;  %s2934_s22 = int_to_ptr.hbm [resolvable:$true] %s2933_s22 }
  0x4f   :  { %s4466_s17 = sld [smem:[#allocation8_spill]]  ;;  %s3451_s23 = sshra.s32 %s2934_s22, 4  ;;  %s3452_s23 = int_to_ptr.hbm [resolvable:$true] %s3451_s23 }
  0x50   :  { %s4467_s21 = sld [smem:[#allocation10_spill]]  ;;  %s3455_s26 = scalar_lea.hbm %s3704_s4, 2 }
  0x51   :  { %s4477_s7 = sld [smem:[#allocation19_spill]]  ;;  %p3456_p1 = scmp.lt.s32.totalorder %s3452_s23, %s3704_s4 }
  0x52   :  { %s4478_s10 = sld [smem:[#allocation20_spill]] }
  0x53   :  { %s4479_s11 = sld [smem:[#allocation21_spill]] }
  0x54   :  { %s4480_s15 = sld [smem:[#allocation23_spill]] }
  0x56   :  { %2981 = vmatmul.msk.f32.gmra.mxu0 %vm173_vm0, %v161_v6 }
  0x5e   :  { %2982 = vmatmul.msk.f32.gmra.mxu0 %vm173_vm0, %v162_v7 }
  0x66   :  { %2983 = vmatmul.msk.f32.gmra.mxu0 %vm173_vm0, %v163_v8  ;;  %v3509_v8 = vmov 7  }
  0x6e   :  { %2984 = vmatmul.msk.f32.gmra.mxu0 %vm173_vm0, %v164_v9  ;;  %v424_v9 = vld [vmem:[%s3544_s25] sm:$0xff] }
  0x76   :  { %2985 = vmatmul.msk.f32.gmra.mxu0 %vm173_vm0, %v165_v10  ;;  %v425_v10 = vld [vmem:[%s3544_s25 + $0x8] sm:$0xff] }
  0x7e   :  { %2986 = vmatmul.msk.f32.gmra.mxu0 %vm173_vm0, %v166_v11  ;;  %v426_v11 = vld [vmem:[%s3544_s25 + $0x10] sm:$0xff] }
  0x86   :  { %2987 = vmatmul.msk.f32.gmra.mxu0 %vm173_vm0, %v167_v12  ;;  %v427_v12 = vld [vmem:[%s3544_s25 + $0x18] sm:$0xff] }
  0x8e   :  { %2988 = vmatmul.msk.f32.gmra.mxu0 %vm173_vm0, %v168_v13  ;;  %v428_v13 = vld [vmem:[%s3544_s25 + $0x20] sm:$0xff] }
  0x96   :  { %2989 = vmatmul.msk.f32.gmra.mxu0 %vm173_vm0, %v169_v14  ;;  %v429_v14 = vld [vmem:[%s3544_s25 + $0x28] sm:$0xff] }
  0x9e   :  { %2990 = vmatmul.msk.f32.gmra.mxu0 %vm173_vm0, %v170_v15  ;;  %v430_v15 = vld [vmem:[%s3544_s25 + $0x30] sm:$0xff] }
  0xc3   :  { %v227_v18 = vpop.f32.mrf.mxu0 }
  0xc4   :  { %2998 = vmatmul.msk.f32.vlgmr.msrb.gmra.mxu0 %vm266_vm2, %v227_v18  ;;  %v432_v18 = vld [vmem:[%s3544_s25 + $0x40] sm:$0xff] }
  0xcb   :  { %v230_v19 = vpop.f32.mrf.mxu0 }
  0xcc   :  { %2999 = vmatmul.msk.f32.gmra.mxu0 %vm266_vm2, %v230_v19 }
  0xd3   :  { %v233_v20 = vpop.f32.mrf.mxu0 }
  0xd4   :  { %3000 = vmatmul.msk.f32.gmra.mxu0 %vm266_vm2, %v233_v20  ;;  %v433_v20 = vld [vmem:[%s3544_s25 + $0x48] sm:$0xff] }
  0xdb   :  { %v236_v21 = vpop.f32.mrf.mxu0 }
  0xdc   :  { %3001 = vmatmul.msk.f32.vlgmr.msra.gmra.mxu2 %vm266_vm2, %v236_v21 }
  0xe3   :  { %v239_v23 = vpop.f32.mrf.mxu0 }
  0xe4   :  { %2993 = vmatmul.msk.f32.vlgmr.msra.gmra.mxu1 %vm266_vm2, %v239_v23  ;;  %v434_v23 = vld [vmem:[%s3544_s25 + $0x50] sm:$0xff] }
  0xeb   :  { %v242_v24 = vpop.f32.mrf.mxu0 }
  0xec   :  { %2994 = vmatmul.msk.f32.gmra.mxu1 %vm266_vm2, %v242_v24  ;;  %v2165_v24 = vld [vmem:[%s3669_s6] sm:$0xff] }
  0xf3   :  { %v245_v25 = vpop.f32.mrf.mxu0 }
  0xf4   :  { %2995 = vmatmul.msk.f32.gmra.mxu1 %vm266_vm2, %v245_v25 }
  0xfb   :  { %v248_v26 = vpop.f32.mrf.mxu0 }
  0xfc   :  { %2996 = vmatmul.msk.f32.gmra.mxu1 %vm266_vm2, %v248_v26  ;;  %v3200_v26 = vld [vmem:[%s3669_s6 + $0x40] sm:$0xff] }
 0x103   :  { %v251_v27 = vpop.f32.mrf.mxu0 }
 0x104   :  { %3004 = vmatmul.msk.f32.vlgmr.msra.gmra.mxu3 %vm266_vm2, %v251_v27 }
 0x10b   :  { %v254_v28 = vpop.f32.mrf.mxu0 }
 0x10c   :  { %3005 = vmatmul.msk.f32.gmra.mxu3 %vm266_vm2, %v254_v28 }
 0x113   :  { %v257_v29 = vpop.f32.mrf.mxu0 }
 0x114   :  { %3006 = vmatmul.msk.f32.gmra.mxu3 %vm266_vm2, %v257_v29 }
 0x11b   :  { %v260_v30 = vpop.f32.mrf.mxu0 }
 0x11c   :  { %3007 = vmatmul.msk.f32.gmra.mxu3 %vm266_vm2, %v260_v30  ;;  %v3204_v30 = vld [vmem:[%s3669_s6 + $0x60] sm:$0xff] }
 0x141   :  { %v344_v35 = vpop.f32.mrf.mxu0 }
 0x149   :  { %v347_v45 = vpop.f32.mrf.mxu0 }
 0x151   :  { %v350_v53 = vpop.f32.mrf.mxu0 }
 0x15f   :  { %v353_v59 = vpop.f32.mrf.mxu2 }
 0x161   :  { %v300_v34 = vpop.f32.mrf.mxu1 }
 0x162   :  { %v345_v36 = vadd.f32 %v344_v35, %v300_v34 }
 0x169   :  { %v303_v38 = vpop.f32.mrf.mxu1 }
 0x16a   :  { %v348_v48 = vadd.f32 %v347_v45, %v303_v38 }
 0x171   :  { %v306_v47 = vpop.f32.mrf.mxu1 }
 0x172   :  { %v351_v56 = vadd.f32 %v350_v53, %v306_v47  ;;  %v3216_v47 = vld [vmem:[%s3669_s6 + $0xc0] sm:$0xff] }
 0x173   :  { %v3220_v53 = vld [vmem:[%s3669_s6 + $0xe0] sm:$0xff] }
 0x179   :  { %v309_v57 = vpop.f32.mrf.mxu1 }
 0x17a   :  { %v354_v61 = vadd.f32 %v353_v59, %v309_v57 }
 0x187   :  { %v390_v39 = vpop.f32.mrf.mxu3 }
 0x188   :  { %v402_v40 = vadd.f32 %v390_v39, %v345_v36  ;;  %v435_v39 = vld [vmem:[%s3544_s25 + $0x58] sm:$0xff]  ;;  %s4468_s25 = sld [smem:[#allocation22_spill]] }
 0x18a   :  { %v409_v42 = vmul.f32 %v3423_v37, %v402_v40 }
 0x18c   :  { %v416_v43 = vadd.f32 %v3424_v41, %v409_v42 }
 0x18e   :  { %v3758_v44 = vmax.f32 %v416_v43, 0.0  ;;  %v3212_v43 = vld [vmem:[%s3669_s6 + $0xa0] sm:$0xff] }
 0x18f   :  { %v393_v46 = vpop.f32.mrf.mxu3 }
 0x190   :  { %2261 = vperm.xlu1 %3332, %v3758_v44   ;;  %2203 = vperm.xlu2 %3330, %v3758_v44   ;;  %v403_v49 = vadd.f32 %v393_v46, %v348_v48  ;;  %v527_v48 = vld [vmem:[%s3549_s29] sm:$0xff] }
 0x191   :  { %2171 = vperm.xlu0 %3329, %v3758_v44   ;;  %599 = vmatpush.msrb.mxu3 %v527_v48 }
 0x192   :  { %v410_v54 = vmul.f32 %v3423_v37, %v403_v49 }
 0x194   :  { %v417_v60 = vadd.f32 %v3424_v41, %v410_v54 }
 0x196   :  { %v3769_v1 = vmax.f32 %v417_v60, 0.0  ;;  %v3197_v60 = vld [vmem:[%s3669_s6 + $0x28] sm:$0xff] }
 0x197   :  { %v396_v50 = vpop.f32.mrf.mxu3 }
 0x198   :  { %3335 = vset.pattern.permute.xlu1 %v3505_v51  ;;  %3331 = vset.pattern.permute.xlu2 %v3506_v52  ;;  %v404_v58 = vadd.f32 %v396_v50, %v351_v56 }
 0x199   :  { %3333 = vset.pattern.permute.xlu0 %v3507_v55  ;;  %2348 = vperm.xlu1 %3335, %v3758_v44  }
 0x19a   :  { %2232 = vperm.xlu2 %3331, %v3758_v44   ;;  %2290 = vperm.xlu0 %3333, %v3758_v44   ;;  %v411_v63 = vmul.f32 %v3423_v37, %v404_v58 }
 0x19c   :  { %v418_v4 = vadd.f32 %v3424_v41, %v411_v63 }
 0x19e   :  { %v3779_v7 = vmax.f32 %v418_v4, 0.0 }
 0x19f   :  { %v399_v62 = vpop.f32.mrf.mxu3 }
 0x1a0   :  { %v405_v0 = vadd.f32 %v399_v62, %v354_v61  ;;  %v2166_v61 = vld [vmem:[%s3669_s6 + $0x8] sm:$0xff] }
 0x1a1   :  { %3339 = vset.pattern.permute.xlu1 %v3506_v52 }
 0x1a2   :  { %v412_v2 = vmul.f32 %v3423_v37, %v405_v0  ;;  %3334 = vset.pattern.permute.xlu2 %v3508_v3  ;;  %3337 = vset.pattern.permute.xlu0 %v3504_v33  ;;  %v3201_v0 = vld [vmem:[%s3669_s6 + $0x48] sm:$0xff] }
 0x1a3   :  { %2236 = vperm.xlu1 %3339, %v3769_v1   ;;  %2319 = vperm.xlu2 %3334, %v3758_v44  }
 0x1a4   :  { %v419_v5 = vadd.f32 %v3424_v41, %v412_v2  ;;  %2176 = vperm.xlu0 %3337, %v3769_v1   ;;  %v3208_v41 = vld [vmem:[%s3669_s6 + $0x80] sm:$0xff] }
 0x1a6   :  { %v3777_v6 = vmax.f32 %v419_v5, 0.0 }
 0x1a8   :  { %486 = vmatpush.msrb.mxu1 %v3777_v6 }
 0x1aa   :  { %487 = vmatpush.msrb.mxu1 %v3779_v7 }
 0x1ab   :  { %3341 = vset.pattern.permute.xlu1 %v3507_v55  ;;  %3336 = vset.pattern.permute.xlu2 %v3509_v8 }
 0x1ac   :  { %3342 = vset.pattern.permute.xlu0 %v3508_v3  ;;  %2294 = vperm.xlu1 %3341, %v3769_v1  }
 0x1ad   :  { %2377 = vperm.xlu2 %3336, %v3758_v44   ;;  %2323 = vperm.xlu0 %3342, %v3769_v1  }
 0x1ae   :  { %488 = vmatpush.msrb.mxu1 %v3769_v1 }
 0x1b0   :  { %489 = vmatpush.msrb.mxu1 %v3758_v44 }
 0x1b1   :  { %3008 = vmatmul.msk.f32.vlgmr.msrb.gmra.mxu1 %vm173_vm0, %v424_v9  ;;  %v3205_v9 = vld [vmem:[%s3669_s6 + $0x68] sm:$0xff] }
 0x1b4   :  { %3344 = vset.pattern.permute.xlu1 %v3509_v8 }
 0x1b5   :  { %3338 = vset.pattern.permute.xlu2 %v3503_v32  ;;  %3346 = vset.pattern.permute.xlu0 %v3503_v32 }
 0x1b6   :  { %2381 = vperm.xlu1 %3344, %v3769_v1   ;;  %2207 = vperm.xlu2 %3338, %v3769_v1  }
 0x1b7   :  { %2211 = vperm.xlu0 %3346, %v3779_v7  }
 0x1b9   :  { %3009 = vmatmul.msk.f32.gmra.mxu1 %vm173_vm0, %v425_v10 }
 0x1be   :  { %3345 = vset.pattern.permute.xlu1 %v3504_v33  ;;  %3340 = vset.pattern.permute.xlu2 %v3502_v31 }
 0x1bf   :  { %3351 = vset.pattern.permute.xlu0 %v3505_v51  ;;  %2181 = vperm.xlu1 %3345, %v3779_v7  }
 0x1c0   :  { %2265 = vperm.xlu2 %3340, %v3769_v1   ;;  %2356 = vperm.xlu0 %3351, %v3779_v7  }
 0x1c1   :  { %3010 = vmatmul.msk.f32.gmra.mxu1 %vm173_vm0, %v426_v11 }
 0x1c7   :  { %3348 = vset.pattern.permute.xlu1 %v3502_v31 }
 0x1c8   :  { %3343 = vset.pattern.permute.xlu2 %v3505_v51  ;;  %3355 = vset.pattern.permute.xlu0 %v3506_v52 }
 0x1c9   :  { %2269 = vperm.xlu1 %3348, %v3779_v7   ;;  %2352 = vperm.xlu2 %3343, %v3769_v1  }
 0x1ca   :  { %2244 = vperm.xlu0 %3355, %v3777_v6   ;;  %3011 = vmatmul.msk.f32.gmra.mxu1 %vm173_vm0, %v427_v12 }
 0x1d1   :  { %3350 = vset.pattern.permute.xlu1 %v3508_v3  ;;  %3347 = vset.pattern.permute.xlu2 %v3506_v52 }
 0x1d2   :  { %3360 = vset.pattern.permute.xlu0 %v3509_v8  ;;  %2327 = vperm.xlu1 %3350, %v3779_v7  }
 0x1d3   :  { %2240 = vperm.xlu2 %3347, %v3779_v7   ;;  %2389 = vperm.xlu0 %3360, %v3777_v6  }
 0x1d4   :  { %3012 = vmatmul.msk.f32.gmra.mxu1 %vm173_vm0, %v428_v13 }
 0x1da   :  { %3353 = vset.pattern.permute.xlu1 %v3504_v33 }
 0x1db   :  { %3349 = vset.pattern.permute.xlu2 %v3507_v55  ;;  %2186 = vperm.xlu1 %3353, %v3777_v6  }
 0x1dc   :  { %3013 = vmatmul.msk.f32.gmra.mxu1 %vm173_vm0, %v429_v14  ;;  %2298 = vperm.xlu2 %3349, %v3779_v7  }
 0x1dd   :  { %3362 = vset.pattern.permute.xlu0 %v3503_v32 }
 0x1e3   :  { %3354 = vset.pattern.permute.xlu1 %v3503_v32 }
 0x1e4   :  { %3014 = vmatmul.msk.f32.gmra.mxu1 %vm173_vm0, %v430_v15  ;;  %3352 = vset.pattern.permute.xlu2 %v3509_v8  ;;  %v3209_v15 = vld [vmem:[%s3669_s6 + $0x88] sm:$0xff] }
 0x1e5   :  { %2215 = vperm.xlu1 %3354, %v3777_v6   ;;  %2385 = vperm.xlu2 %3352, %v3779_v7  }
 0x1ea   :  { %v2204_v17 = vpop.permute.xlu2 %2203 }
 0x1eb   :  { %v2218_v28 = vmul.f32 %v3196_v22, %v2204_v17 }
 0x1ec   :  { %3015 = vmatmul.msk.f32.gmra.mxu1 %vm173_vm0, %v431_v16 }
 0x1ed   :  { %3357 = vset.pattern.permute.xlu1 %v3507_v55  ;;  %3356 = vset.pattern.permute.xlu2 %v3502_v31 }
 0x1ee   :  { %2302 = vperm.xlu1 %3357, %v3777_v6   ;;  %2273 = vperm.xlu2 %3356, %v3777_v6  }
 0x1f4   :  { %3016 = vmatmul.msk.f32.gmra.mxu1 %vm173_vm0, %v432_v18  ;;  %v2233_v19 = vpop.permute.xlu2 %2232  ;;  %v3213_v18 = vld [vmem:[%s3669_s6 + $0xa8] sm:$0xff] }
 0x1f5   :  { %v2247_v34 = vmul.f32 %v3200_v26, %v2233_v19 }
 0x1f6   :  { %3359 = vset.pattern.permute.xlu1 %v3505_v51  ;;  %3358 = vset.pattern.permute.xlu2 %v3508_v3 }
 0x1f7   :  { %2360 = vperm.xlu1 %3359, %v3777_v6   ;;  %2331 = vperm.xlu2 %3358, %v3777_v6  }
 0x1fc   :  { %3017 = vmatmul.msk.f32.gmra.mxu1 %vm173_vm0, %v433_v20 }
 0x1fd   :  { %v2320_v21 = vpop.permute.xlu2 %2319 }
 0x1fe   :  { %v2334_v49 = vmul.f32 %v3212_v43, %v2320_v21 }
 0x1ff   :  { %3361 = vset.pattern.permute.xlu1 %v3504_v33  ;;  %3363 = vset.pattern.permute.xlu2 %v3506_v52 }
 0x202   :  { %v2262_v25 = vpop.permute.xlu1 %2261 }
 0x203   :  { %v2172_v27 = vpop.permute.xlu0 %2171  ;;  %v2276_v37 = vmul.f32 %v3204_v30, %v2262_v25 }
 0x204   :  { %3018 = vmatmul.msk.f32.gmra.mxu1 %vm173_vm0, %v434_v23  ;;  %v2189_v29 = vmul.f32 %v2172_v27, %v2165_v24  ;;  %v3217_v23 = vld [vmem:[%s3669_s6 + $0xc8] sm:$0xff] }
 0x206   :  { %v2222_v35 = vadd.f32 %v2218_v28, %v2189_v29  ;;  %v3221_v28 = vld [vmem:[%s3669_s6 + $0xe8] sm:$0xff] }
 0x207   :  { %v2378_v36 = vpop.permute.xlu2 %2377 }
 0x208   :  { %v2251_v38 = vadd.f32 %v2247_v34, %v2222_v35  ;;  %v2392_v58 = vmul.f32 %v3220_v53, %v2378_v36  ;;  %v3198_v36 = vld [vmem:[%s3669_s6 + $0x30] sm:$0xff] }
 0x209   :  { %v3210_v53 = vld [vmem:[%s3669_s6 + $0x90] sm:$0xff] }
 0x20a   :  { %v2280_v40 = vadd.f32 %v2276_v37, %v2251_v38  ;;  %v2167_v38 = vld [vmem:[%s3669_s6 + $0x10] sm:$0xff] }
 0x20b   :  { %v2349_v42 = vpop.permute.xlu1 %2348 }
 0x20c   :  { %3019 = vmatmul.msk.f32.gmra.mxu1 %vm173_vm0, %v435_v39  ;;  %v2291_v45 = vpop.permute.xlu0 %2290  ;;  %v2363_v56 = vmul.f32 %v3216_v47, %v2349_v42  ;;  %v3020_v39 = vld [vmem:[%s3549_s29 + $0x8] sm:$0xff] }
 0x20d   :  { %v2305_v46 = vmul.f32 %v3208_v41, %v2291_v45  ;;  %558 = vmatpush.msrb.mxu2 %v3020_v39 }
 0x20f   :  { %v2309_v50 = vadd.f32 %v2305_v46, %v2280_v40  ;;  %v3202_v40 = vld [vmem:[%s3669_s6 + $0x50] sm:$0xff] }
 0x210   :  { %v2208_v54 = vpop.permute.xlu2 %2207 }
 0x211   :  { %v2338_v57 = vadd.f32 %v2334_v49, %v2309_v50  ;;  %v2219_v4 = vmul.f32 %v3197_v60, %v2208_v54  ;;  %v3206_v50 = vld [vmem:[%s3669_s6 + $0x70] sm:$0xff] }
 0x213   :  { %v2367_v59 = vadd.f32 %v2363_v56, %v2338_v57 }
 0x215   :  { %v2237_v62 = vpop.permute.xlu1 %2236  ;;  %v3869_v63 = vadd.f32 %v2392_v58, %v2367_v59 }
 0x216   :  { %v2177_v2 = vpop.permute.xlu0 %2176  ;;  %v2248_v10 = vmul.f32 %v3201_v0, %v2237_v62  ;;  %v3214_v62 = vld [vmem:[%s3669_s6 + $0xb0] sm:$0xff] }
 0x217   :  { %v2190_v5 = vmul.f32 %v2177_v2, %v2166_v61  ;;  %v3218_v0 = vld [vmem:[%s3669_s6 + $0xd0] sm:$0xff] }
 0x219   :  { %v2223_v11 = vadd.f32 %v2219_v4, %v2190_v5 }
 0x21a   :  { %v2266_v12 = vpop.permute.xlu2 %2265 }
 0x21b   :  { %v2252_v13 = vadd.f32 %v2248_v10, %v2223_v11  ;;  %v2277_v14 = vmul.f32 %v3205_v9, %v2266_v12  ;;  %v3222_v9 = vld [vmem:[%s3669_s6 + $0xf0] sm:$0xff] }
 0x21d   :  { %v2281_v16 = vadd.f32 %v2277_v14, %v2252_v13 }
 0x21e   :  { %v2295_v17 = vpop.permute.xlu1 %2294 }
 0x21f   :  { %v2306_v19 = vmul.f32 %v3209_v15, %v2295_v17  ;;  %v2324_v20 = vpop.permute.xlu0 %2323 }
 0x220   :  { %v2335_v22 = vmul.f32 %v3213_v18, %v2324_v20  ;;  %v3029_v18 = vld [vmem:[%s3549_s29 + $0x10] sm:$0xff]  ;;  %v2168_v20 = vld [vmem:[%s3669_s6 + $0x18] sm:$0xff]  ;;  %s4469_s29 = sld [smem:[#allocation11_spill]] }
 0x221   :  { %v2310_v21 = vadd.f32 %v2306_v19, %v2281_v16  ;;  %642 = vmatpush.msra.mxu2 %v3029_v18 }
 0x223   :  { %v2339_v24 = vadd.f32 %v2335_v22, %v2310_v21  ;;  %v2353_v25 = vpop.permute.xlu2 %2352  ;;  %v3199_v21 = vld [vmem:[%s3669_s6 + $0x38] sm:$0xff] }
 0x224   :  { %v2364_v26 = vmul.f32 %v3217_v23, %v2353_v25  ;;  %v3203_v22 = vld [vmem:[%s3669_s6 + $0x58] sm:$0xff] }
 0x226   :  { %v2368_v27 = vadd.f32 %v2364_v26, %v2339_v24 }
 0x228   :  { %v2382_v29 = vpop.permute.xlu1 %2381 }
 0x229   :  { %v2393_v30 = vmul.f32 %v3221_v28, %v2382_v29  ;;  %v2212_v37 = vpop.permute.xlu0 %2211 }
 0x22a   :  { %v2220_v43 = vmul.f32 %v3198_v36, %v2212_v37 }
 0x22b   :  { %v3877_v34 = vadd.f32 %v2393_v30, %v2368_v27  ;;  %v3207_v27 = vld [vmem:[%s3669_s6 + $0x78] sm:$0xff] }
 0x22d   :  { %v2241_v41 = vpop.permute.xlu2 %2240 }
 0x22e   :  { %v491_v35 = vpop.f32.mrf.mxu1  ;;  %v2249_v46 = vmul.f32 %v3202_v40, %v2241_v41 }
 0x22f   :  { %3025 = vmatmul.msk.f32.vlgmr.msrb.gmra.mxu3 %vm530_vm3, %v491_v35 }
 0x231   :  { %v2182_v42 = vpop.permute.xlu1 %2181 }
 0x232   :  { %v2191_v45 = vmul.f32 %v2182_v42, %v2167_v38  ;;  %v2357_v2 = vpop.permute.xlu0 %2356  ;;  %v3211_v38 = vld [vmem:[%s3669_s6 + $0x98] sm:$0xff] }
 0x233   :  { %v2365_v11 = vmul.f32 %v3218_v0, %v2357_v2 }
 0x234   :  { %v2224_v47 = vadd.f32 %v2220_v43, %v2191_v45  ;;  %v3215_v45 = vld [vmem:[%s3669_s6 + $0xb8] sm:$0xff] }
 0x236   :  { %v494_v48 = vpop.f32.mrf.mxu1  ;;  %v2253_v49 = vadd.f32 %v2249_v46, %v2224_v47  ;;  %v2299_v54 = vpop.permute.xlu2 %2298  ;;  %v3219_v47 = vld [vmem:[%s3669_s6 + $0xd8] sm:$0xff] }
 0x237   :  { %3026 = vmatmul.msk.f32.gmra.mxu3 %vm530_vm3, %v494_v48  ;;  %v2307_v58 = vmul.f32 %v3210_v53, %v2299_v54 }
 0x23b   :  { %v2270_v56 = vpop.permute.xlu1 %2269 }
 0x23c   :  { %v2278_v57 = vmul.f32 %v3206_v50, %v2270_v56  ;;  %v2245_v23 = vpop.permute.xlu0 %2244  ;;  %v3223_v50 = vld [vmem:[%s3669_s6 + $0xf8] sm:$0xff]  ;;  %s4475_s6 = sld [smem:[#allocation17_spill]] }
 0x23d   :  { %v2250_v30 = vmul.f32 %v3203_v22, %v2245_v23 }
 0x23e   :  { %v2282_v59 = vadd.f32 %v2278_v57, %v2253_v49  ;;  %v497_v60 = vpop.f32.mrf.mxu1 }
 0x23f   :  { %3027 = vmatmul.msk.f32.gmra.mxu3 %vm530_vm3, %v497_v60  ;;  %v2386_v10 = vpop.permute.xlu2 %2385 }
 0x240   :  { %v2311_v61 = vadd.f32 %v2307_v58, %v2282_v59  ;;  %v2394_v14 = vmul.f32 %v3222_v9, %v2386_v10 }
 0x244   :  { %v2328_v4 = vpop.permute.xlu1 %2327 }
 0x245   :  { %v2336_v5 = vmul.f32 %v3214_v62, %v2328_v4  ;;  %v2390_v48 = vpop.permute.xlu0 %2389 }
 0x246   :  { %v2395_v58 = vmul.f32 %v3223_v50, %v2390_v48  ;;  %v679_v48 = vld [vmem:[%s3564_s14 + $0x8] sm:$0xff]  ;;  %v681_v50 = vld [vmem:[%s3564_s14 + $0x18] sm:$0xff] }
 0x247   :  { %v2340_v12 = vadd.f32 %v2336_v5, %v2311_v61  ;;  %v500_v13 = vpop.f32.mrf.mxu1 }
 0x248   :  { %3028 = vmatmul.msk.f32.gmra.mxu3 %vm530_vm3, %v500_v13  ;;  %v2274_v28 = vpop.permute.xlu2 %2273 }
 0x249   :  { %v2369_v15 = vadd.f32 %v2365_v11, %v2340_v12  ;;  %v2279_v36 = vmul.f32 %v3207_v27, %v2274_v28 }
 0x24b   :  { %v3892_v16 = vadd.f32 %v2394_v14, %v2369_v15 }
 0x24d   :  { %v2187_v17 = vpop.permute.xlu1 %2186 }
 0x24e   :  { %v2192_v25 = vmul.f32 %v2187_v17, %v2168_v20 }
 0x251   :  { %v503_v19 = vpop.f32.mrf.mxu1  ;;  %v2332_v46 = vpop.permute.xlu2 %2331 }
 0x252   :  { %3021 = vmatmul.msk.f32.vlgmr.msrb.gmra.mxu2 %vm530_vm3, %v503_v19  ;;  %v2337_v49 = vmul.f32 %v3215_v45, %v2332_v46 }
 0x257   :  { %v2216_v24 = vpop.permute.xlu1 %2215 }
 0x258   :  { %v2221_v26 = vmul.f32 %v3199_v21, %v2216_v24  ;;  %v3425_v24 = vld [vmem:[%s3554_s3] ss:$0 sm:$0xff]  ;;  %s4470_s3 = sld [smem:[#allocation12_spill]] }
 0x259   :  { %v506_v29 = vpop.f32.mrf.mxu1 }
 0x25a   :  { %v2225_v35 = vadd.f32 %v2221_v26, %v2192_v25  ;;  %3022 = vmatmul.msk.f32.gmra.mxu2 %vm530_vm3, %v506_v29 }
 0x25c   :  { %v2254_v37 = vadd.f32 %v2250_v30, %v2225_v35 }
 0x25e   :  { %v2283_v39 = vadd.f32 %v2279_v36, %v2254_v37  ;;  %v3426_v36 = vld [vmem:[%s3559_s8] ss:$0 sm:$0xff]  ;;  %s4471_s8 = sld [smem:[#allocation13_spill]] }
 0x260   :  { %v2303_v40 = vpop.permute.xlu1 %2302 }
 0x261   :  { %v2308_v41 = vmul.f32 %v3211_v38, %v2303_v40  ;;  %v509_v42 = vpop.f32.mrf.mxu1 }
 0x262   :  { %3023 = vmatmul.msk.f32.gmra.mxu2 %vm530_vm3, %v509_v42 }
 0x263   :  { %v2312_v43 = vadd.f32 %v2308_v41, %v2283_v39 }
 0x265   :  { %v2341_v56 = vadd.f32 %v2337_v49, %v2312_v43  ;;  %v680_v49 = vld [vmem:[%s3564_s14 + $0x10] sm:$0xff] }
 0x269   :  { %v512_v53 = vpop.f32.mrf.mxu1  ;;  %v2361_v54 = vpop.permute.xlu1 %2360 }
 0x26a   :  { %v2366_v57 = vmul.f32 %v3219_v47, %v2361_v54  ;;  %3024 = vmatmul.msk.f32.gmra.mxu2 %vm530_vm3, %v512_v53  ;;  %v678_v47 = vld [vmem:[%s3564_s14] sm:$0xff]  ;;  %v683_v54 = vld [vmem:[%s3564_s14 + $0x28] sm:$0xff] }
 0x26b   :  { %v682_v53 = vld [vmem:[%s3564_s14 + $0x20] sm:$0xff] }
 0x26c   :  { %v2370_v59 = vadd.f32 %v2366_v57, %v2341_v56  ;;  %v684_v56 = vld [vmem:[%s3564_s14 + $0x30] sm:$0xff]  ;;  %v685_v57 = vld [vmem:[%s3564_s14 + $0x38] sm:$0xff] }
 0x26e   :  { %v3907_v60 = vadd.f32 %v2395_v58, %v2370_v59  ;;  %v781_v58 = vld [vmem:[%s3569_s19] sm:$0xf] }
 0x26f   :  { %3052 = vmatpush.msk.msra.mxu0 %vm279_vm1, %v781_v58  ;;  %v686_v59 = vld [vmem:[%s3564_s14 + $0x40] sm:$0xff] }
 0x271   :  { %v515_v61 = vpop.f32.mrf.mxu1 }
 0x272   :  { %3030 = vmatmul.msk.f32.vlgmr.msra.gmra.mxu2 %vm530_vm3, %v515_v61  ;;  %v687_v61 = vld [vmem:[%s3564_s14 + $0x48] sm:$0xff] }
 0x279   :  { %v518_v62 = vpop.f32.mrf.mxu1 }
 0x27a   :  { %3031 = vmatmul.msk.f32.gmra.mxu2 %vm530_vm3, %v518_v62  ;;  %v688_v62 = vld [vmem:[%s3564_s14 + $0x50] sm:$0xff] }
 0x281   :  { %v521_v0 = vpop.f32.mrf.mxu1 }
 0x282   :  { %3032 = vmatmul.msk.f32.gmra.mxu2 %vm530_vm3, %v521_v0  ;;  %v689_v0 = vld [vmem:[%s3564_s14 + $0x58] sm:$0xff]  ;;  %s4472_s14 = sld [smem:[#allocation14_spill]] }
 0x289   :  { %v524_v2 = vpop.f32.mrf.mxu1 }
 0x28a   :  { %3033 = vmatmul.msk.f32.gmra.mxu2 %vm530_vm3, %v524_v2  ;;  %v3075_v2 = vld [vmem:[%s3589_s12 + $0x4] sm:$0xf] }
 0x28b   :  { %3076 = vmatpush.msk.msrb.mxu0 %vm279_vm1, %v3075_v2  ;;  %v943_v2 = vld [vmem:[%s4463_s5 + $0x18] sm:$0xff] }
 0x2b2   :  { %v601_v10 = vpop.f32.mrf.mxu3 }
 0x2ba   :  { %v604_v13 = vpop.f32.mrf.mxu3 }
 0x2c2   :  { %v607_v15 = vpop.f32.mrf.mxu3 }
 0x2cb   :  { %v610_v21 = vpop.f32.mrf.mxu3 }
 0x2d5   :  { %v560_v4 = vpop.f32.mrf.mxu2 }
 0x2d6   :  { %v602_v22 = vadd.f32 %v601_v10, %v560_v4 }
 0x2dd   :  { %v563_v5 = vpop.f32.mrf.mxu2 }
 0x2de   :  { %v605_v19 = vadd.f32 %v604_v13, %v563_v5  ;;  %v3046_v5 = vld [vmem:[%s3569_s19 + $0x4] sm:$0xf] }
 0x2df   :  { %3047 = vmatpush.msk.msrb.mxu2 %vm279_vm1, %v3046_v5  ;;  %v945_v5 = vld [vmem:[%s4463_s5 + $0x28] sm:$0xff] }
 0x2e5   :  { %v566_v9 = vpop.f32.mrf.mxu2 }
 0x2e6   :  { %v608_v18 = vadd.f32 %v607_v15, %v566_v9 }
 0x2ed   :  { %v569_v11 = vpop.f32.mrf.mxu2 }
 0x2ee   :  { %v611_v23 = vadd.f32 %v610_v21, %v569_v11 }
 0x2f5   :  { %v644_v12 = vpop.f32.mrf.mxu2 }
 0x2f6   :  { %v656_v27 = vadd.f32 %v644_v12, %v602_v22  ;;  %v3057_v12 = vld [vmem:[%s3569_s19 + $0x8] sm:$0xf]  ;;  %s4473_s19 = sld [smem:[#allocation15_spill]] }
 0x2f7   :  { %3058 = vmatpush.msk.msra.mxu1 %vm279_vm1, %v3057_v12  ;;  %v949_v12 = vld [vmem:[%s4463_s5 + $0x48] sm:$0xff] }
 0x2f8   :  { %v663_v37 = vmul.f32 %v3425_v24, %v656_v27 }
 0x2fa   :  { %v670_v43 = vadd.f32 %v3426_v36, %v663_v37 }
 0x2fc   :  { %v674_v46 = vmax.f32 %v670_v43, 0.0 }
 0x2fd   :  { %v647_v14 = vpop.f32.mrf.mxu2 }
 0x2fe   :  { %v657_v25 = vadd.f32 %v647_v14, %v605_v19 }
 0x300   :  { %v664_v30 = vmul.f32 %v3425_v24, %v657_v25 }
 0x302   :  { %v671_v41 = vadd.f32 %v3426_v36, %v664_v30 }
 0x304   :  { %v675_v45 = vmax.f32 %v671_v41, 0.0 }
 0x305   :  { %v650_v17 = vpop.f32.mrf.mxu2 }
 0x306   :  { %v658_v20 = vadd.f32 %v650_v17, %v608_v18 }
 0x308   :  { %v665_v28 = vmul.f32 %v3425_v24, %v658_v20 }
 0x30a   :  { %v672_v39 = vadd.f32 %v3426_v36, %v665_v28 }
 0x30c   :  { %v676_v42 = vmax.f32 %v672_v39, 0.0 }
 0x30d   :  { %v653_v26 = vpop.f32.mrf.mxu2 }
 0x30e   :  { %v659_v29 = vadd.f32 %v653_v26, %v611_v23 }
 0x310   :  { %v666_v35 = vmul.f32 %v3425_v24, %v659_v29 }
 0x312   :  { %v673_v38 = vadd.f32 %v3426_v36, %v666_v35 }
 0x314   :  { %v677_v40 = vmax.f32 %v673_v38, 0.0  ;;  %v3427_v38 = vld [vmem:[%s3574_s24] ss:$0 sm:$0xff]  ;;  %s4474_s24 = sld [smem:[#allocation16_spill]] }
 0x316   :  { %740 = vmatpush.msra.mxu3 %v677_v40 }
 0x318   :  { %741 = vmatpush.msra.mxu3 %v676_v42 }
 0x31a   :  { %742 = vmatpush.msra.mxu3 %v675_v45 }
 0x31c   :  { %743 = vmatpush.msra.mxu3 %v674_v46 }
 0x31d   :  { %3034 = vmatmul.msk.f32.vlgmr.msra.gmra.mxu3 %vm173_vm0, %v678_v47  ;;  %v3428_v47 = vld [vmem:[%s4462_s0] ss:$0 sm:$0xff] }
 0x325   :  { %3035 = vmatmul.msk.f32.gmra.mxu3 %vm173_vm0, %v679_v48 }
 0x32d   :  { %3036 = vmatmul.msk.f32.gmra.mxu3 %vm173_vm0, %v680_v49 }
 0x335   :  { %3037 = vmatmul.msk.f32.gmra.mxu3 %vm173_vm0, %v681_v50 }
 0x33d   :  { %3038 = vmatmul.msk.f32.gmra.mxu3 %vm173_vm0, %v682_v53 }
 0x345   :  { %3039 = vmatmul.msk.f32.gmra.mxu3 %vm173_vm0, %v683_v54 }
 0x34d   :  { %3040 = vmatmul.msk.f32.gmra.mxu3 %vm173_vm0, %v684_v56 }
 0x355   :  { %3041 = vmatmul.msk.f32.gmra.mxu3 %vm173_vm0, %v685_v57 }
 0x35d   :  { %3042 = vmatmul.msk.f32.gmra.mxu3 %vm173_vm0, %v686_v59 }
 0x365   :  { %3043 = vmatmul.msk.f32.gmra.mxu3 %vm173_vm0, %v687_v61  ;;  %v940_v61 = vld [vmem:[%s4463_s5] sm:$0xff] }
 0x36d   :  { %3044 = vmatmul.msk.f32.gmra.mxu3 %vm173_vm0, %v688_v62  ;;  %v941_v62 = vld [vmem:[%s4463_s5 + $0x8] sm:$0xff] }
 0x375   :  { %3045 = vmatmul.msk.f32.gmra.mxu3 %vm173_vm0, %v689_v0  ;;  %v942_v0 = vld [vmem:[%s4463_s5 + $0x10] sm:$0xff] }
 0x3a0   :  { %v745_v4 = vpop.f32.mrf.mxu3 }
 0x3a1   :  { %3053 = vmatmul.msk.f32.vlgmr.msra.gmra.mxu0 %vm266_vm2, %v745_v4  ;;  %v944_v4 = vld [vmem:[%s4463_s5 + $0x20] sm:$0xff] }
 0x3a2   :  { %1264 = vmatpush.msra.mxu0 %v3777_v6 }
 0x3a4   :  { %1265 = vmatpush.msra.mxu0 %v3779_v7 }
 0x3a6   :  { %1266 = vmatpush.msra.mxu0 %v3769_v1 }
 0x3a8   :  { %1267 = vmatpush.msra.mxu0 %v3758_v44  ;;  %v748_v9 = vpop.f32.mrf.mxu3 }
 0x3a9   :  { %3054 = vmatmul.msk.f32.gmra.mxu0 %vm266_vm2, %v748_v9  ;;  %v946_v9 = vld [vmem:[%s4463_s5 + $0x30] sm:$0xff] }
 0x3b0   :  { %v751_v10 = vpop.f32.mrf.mxu3 }
 0x3b1   :  { %3055 = vmatmul.msk.f32.gmra.mxu0 %vm266_vm2, %v751_v10  ;;  %v947_v10 = vld [vmem:[%s4463_s5 + $0x38] sm:$0xff] }
 0x3b8   :  { %v754_v11 = vpop.f32.mrf.mxu3 }
 0x3b9   :  { %3056 = vmatmul.msk.f32.gmra.mxu0 %vm266_vm2, %v754_v11  ;;  %v948_v11 = vld [vmem:[%s4463_s5 + $0x40] sm:$0xff] }
 0x3c0   :  { %v757_v13 = vpop.f32.mrf.mxu3 }
 0x3c1   :  { %3048 = vmatmul.msk.f32.vlgmr.msrb.gmra.mxu2 %vm266_vm2, %v757_v13  ;;  %v950_v13 = vld [vmem:[%s4463_s5 + $0x50] sm:$0xff] }
 0x3c8   :  { %v760_v6 = vpop.f32.mrf.mxu3 }
 0x3c9   :  { %3049 = vmatmul.msk.f32.gmra.mxu2 %vm266_vm2, %v760_v6  ;;  %v951_v6 = vld [vmem:[%s4463_s5 + $0x58] sm:$0xff] }
 0x3d0   :  { %v763_v1 = vpop.f32.mrf.mxu3 }
 0x3d1   :  { %3050 = vmatmul.msk.f32.gmra.mxu2 %vm266_vm2, %v763_v1  ;;  %v1043_v1 = vld [vmem:[%s3589_s12] sm:$0xf] }
 0x3d2   :  { %3081 = vmatpush.msk.msrb.mxu1 %vm279_vm1, %v1043_v1 }
 0x3d8   :  { %v766_v44 = vpop.f32.mrf.mxu3 }
 0x3d9   :  { %3051 = vmatmul.msk.f32.gmra.mxu2 %vm266_vm2, %v766_v44 }
 0x3e0   :  { %v769_v7 = vpop.f32.mrf.mxu3 }
 0x3e1   :  { %3059 = vmatmul.msk.f32.vlgmr.msra.gmra.mxu1 %vm266_vm2, %v769_v7 }
 0x3e8   :  { %v772_v14 = vpop.f32.mrf.mxu3 }
 0x3e9   :  { %3060 = vmatmul.msk.f32.gmra.mxu1 %vm266_vm2, %v772_v14 }
 0x3f0   :  { %v775_v15 = vpop.f32.mrf.mxu3 }
 0x3f1   :  { %3061 = vmatmul.msk.f32.gmra.mxu1 %vm266_vm2, %v775_v15 }
 0x3f8   :  { %v778_v17 = vpop.f32.mrf.mxu3 }
 0x3f9   :  { %3062 = vmatmul.msk.f32.gmra.mxu1 %vm266_vm2, %v778_v17  ;;  %v3086_v17 = vld [vmem:[%s3589_s12 + $0x8] sm:$0xf]  ;;  %s4476_s12 = sld [smem:[#allocation18_spill]] }
 0x3fa   :  { %3087 = vmatpush.msk.msrb.mxu3 %vm279_vm1, %v3086_v17 }
 0x41e   :  { %v860_v19 = vpop.f32.mrf.mxu0 }
 0x426   :  { %v863_v22 = vpop.f32.mrf.mxu0 }
 0x42e   :  { %v866_v25 = vpop.f32.mrf.mxu0 }
 0x436   :  { %v869_v35 = vpop.f32.mrf.mxu0 }
 0x444   :  { %v816_v18 = vpop.f32.mrf.mxu2 }
 0x445   :  { %v861_v36 = vadd.f32 %v860_v19, %v816_v18 }
 0x44c   :  { %v819_v20 = vpop.f32.mrf.mxu2 }
 0x44d   :  { %v864_v29 = vadd.f32 %v863_v22, %v819_v20 }
 0x454   :  { %v822_v24 = vpop.f32.mrf.mxu2 }
 0x455   :  { %v867_v27 = vadd.f32 %v866_v25, %v822_v24 }
 0x45c   :  { %v825_v28 = vpop.f32.mrf.mxu2 }
 0x45d   :  { %v870_v37 = vadd.f32 %v869_v35, %v825_v28  ;;  %v4016_v28 = vld [vmem:[%s4464_s9 + $0x10] sm:$0xff]  ;;  %v4031_v35 = vld [vmem:[%s4464_s9 + $0x28] sm:$0xff] }
 0x45e   :  { %v906_v21 = vpop.f32.mrf.mxu1 }
 0x45f   :  { %v918_v41 = vadd.f32 %v906_v21, %v861_v36  ;;  %v4036_v36 = vld [vmem:[%s4464_s9 + $0x30] sm:$0xff] }
 0x461   :  { %v925_v48 = vmul.f32 %v3427_v38, %v918_v41 }
 0x463   :  { %v932_v57 = vadd.f32 %v3428_v47, %v925_v48  ;;  %v4053_v48 = vld [vmem:[%s4464_s9 + $0x48] sm:$0xff] }
 0x465   :  { %v936_v59 = vmax.f32 %v932_v57, 0.0 }
 0x466   :  { %v909_v23 = vpop.f32.mrf.mxu1 }
 0x467   :  { %v919_v39 = vadd.f32 %v909_v23, %v864_v29  ;;  %v4021_v29 = vld [vmem:[%s4464_s9 + $0x18] sm:$0xff] }
 0x469   :  { %v926_v45 = vmul.f32 %v3427_v38, %v919_v39 }
 0x46b   :  { %v933_v54 = vadd.f32 %v3428_v47, %v926_v45 }
 0x46d   :  { %v937_v58 = vmax.f32 %v933_v54, 0.0 }
 0x46e   :  { %v912_v26 = vpop.f32.mrf.mxu1 }
 0x46f   :  { %v920_v30 = vadd.f32 %v912_v26, %v867_v27  ;;  %v4006_v26 = vld [vmem:[%s4464_s9] sm:$0xff]  ;;  %v4011_v27 = vld [vmem:[%s4464_s9 + $0x8] sm:$0xff] }
 0x471   :  { %v927_v42 = vmul.f32 %v3427_v38, %v920_v30  ;;  %v4026_v30 = vld [vmem:[%s4464_s9 + $0x20] sm:$0xff] }
 0x473   :  { %v934_v50 = vadd.f32 %v3428_v47, %v927_v42  ;;  %v3429_v42 = vld [vmem:[%s4465_s13] ss:$0 sm:$0xff] }
 0x475   :  { %v938_v56 = vmax.f32 %v934_v50, 0.0 }
 0x476   :  { %v915_v40 = vpop.f32.mrf.mxu1 }
 0x477   :  { %v921_v43 = vadd.f32 %v915_v40, %v870_v37  ;;  %v4041_v37 = vld [vmem:[%s4464_s9 + $0x38] sm:$0xff]  ;;  %v4046_v40 = vld [vmem:[%s4464_s9 + $0x40] sm:$0xff] }
 0x479   :  { %v928_v46 = vmul.f32 %v3427_v38, %v921_v43 }
 0x47b   :  { %v935_v49 = vadd.f32 %v3428_v47, %v928_v46  ;;  %v3430_v47 = vld [vmem:[%s4466_s17] ss:$0 sm:$0xff] }
 0x47d   :  { %v939_v53 = vmax.f32 %v935_v49, 0.0 }
 0x47f   :  { %1002 = vmatpush.msra.mxu2 %v939_v53 }
 0x481   :  { %1003 = vmatpush.msra.mxu2 %v938_v56 }
 0x483   :  { %1004 = vmatpush.msra.mxu2 %v937_v58  ;;  %v4058_v58 = vld [vmem:[%s4464_s9 + $0x50] sm:$0xff] }
 0x485   :  { %1005 = vmatpush.msra.mxu2 %v936_v59 }
 0x486   :  { %3063 = vmatmul.msk.f32.vlgmr.msra.gmra.mxu2 %vm173_vm0, %v940_v61 }
 0x48e   :  { %3064 = vmatmul.msk.f32.gmra.mxu2 %vm173_vm0, %v941_v62 }
 0x496   :  { %3065 = vmatmul.msk.f32.gmra.mxu2 %vm173_vm0, %v942_v0 }
 0x49e   :  { %3066 = vmatmul.msk.f32.gmra.mxu2 %vm173_vm0, %v943_v2  ;;  %v4066_v2 = vld [vmem:[%s4464_s9 + $0x58] sm:$0xff] }
 0x4a6   :  { %3067 = vmatmul.msk.f32.gmra.mxu2 %vm173_vm0, %v944_v4 }
 0x4ae   :  { %3068 = vmatmul.msk.f32.gmra.mxu2 %vm173_vm0, %v945_v5 }
 0x4b6   :  { %3069 = vmatmul.msk.f32.gmra.mxu2 %vm173_vm0, %v946_v9 }
 0x4be   :  { %3070 = vmatmul.msk.f32.gmra.mxu2 %vm173_vm0, %v947_v10 }
 0x4c6   :  { %3071 = vmatmul.msk.f32.gmra.mxu2 %vm173_vm0, %v948_v11 }
 0x4ce   :  { %3072 = vmatmul.msk.f32.gmra.mxu2 %vm173_vm0, %v949_v12 }
 0x4d6   :  { %3073 = vmatmul.msk.f32.gmra.mxu2 %vm173_vm0, %v950_v13 }
 0x4de   :  { %3074 = vmatmul.msk.f32.gmra.mxu2 %vm173_vm0, %v951_v6 }
 0x509   :  { %v1007_v44 = vpop.f32.mrf.mxu2 }
 0x50a   :  { %3082 = vmatmul.msk.f32.vlgmr.msrb.gmra.mxu1 %vm266_vm2, %v1007_v44 }
 0x511   :  { %v1010_v7 = vpop.f32.mrf.mxu2 }
 0x512   :  { %3083 = vmatmul.msk.f32.gmra.mxu1 %vm266_vm2, %v1010_v7 }
 0x519   :  { %v1013_v14 = vpop.f32.mrf.mxu2 }
 0x51a   :  { %3084 = vmatmul.msk.f32.gmra.mxu1 %vm266_vm2, %v1013_v14 }
 0x521   :  { %v1016_v15 = vpop.f32.mrf.mxu2 }
 0x522   :  { %3085 = vmatmul.msk.f32.gmra.mxu1 %vm266_vm2, %v1016_v15 }
 0x529   :  { %v1019_v18 = vpop.f32.mrf.mxu2 }
 0x52a   :  { %3077 = vmatmul.msk.f32.vlgmr.msrb.gmra.mxu0 %vm266_vm2, %v1019_v18 }
 0x531   :  { %v1022_v19 = vpop.f32.mrf.mxu2 }
 0x532   :  { %3078 = vmatmul.msk.f32.gmra.mxu0 %vm266_vm2, %v1022_v19 }
 0x539   :  { %v1025_v20 = vpop.f32.mrf.mxu2 }
 0x53a   :  { %3079 = vmatmul.msk.f32.gmra.mxu0 %vm266_vm2, %v1025_v20 }
 0x541   :  { %v1028_v21 = vpop.f32.mrf.mxu2 }
 0x542   :  { %3080 = vmatmul.msk.f32.gmra.mxu0 %vm266_vm2, %v1028_v21 }
 0x549   :  { %v1031_v22 = vpop.f32.mrf.mxu2 }
 0x54a   :  { %3088 = vmatmul.msk.f32.vlgmr.msrb.gmra.mxu3 %vm266_vm2, %v1031_v22  ;;  %3092 = vmatmul.msk.f32.vlgmr.msra.gmra.mxu0 %vm173_vm0, %v4006_v26 }
 0x551   :  { %v1034_v23 = vpop.f32.mrf.mxu2 }
 0x552   :  { %3089 = vmatmul.msk.f32.gmra.mxu3 %vm266_vm2, %v1034_v23  ;;  %3093 = vmatmul.msk.f32.gmra.mxu0 %vm173_vm0, %v4011_v27 }
 0x559   :  { %v1037_v24 = vpop.f32.mrf.mxu2 }
 0x55a   :  { %3090 = vmatmul.msk.f32.gmra.mxu3 %vm266_vm2, %v1037_v24  ;;  %3094 = vmatmul.msk.f32.gmra.mxu0 %vm173_vm0, %v4016_v28 }
 0x561   :  { %v1040_v25 = vpop.f32.mrf.mxu2 }
 0x562   :  { %3091 = vmatmul.msk.f32.gmra.mxu3 %vm266_vm2, %v1040_v25  ;;  %3095 = vmatmul.msk.f32.gmra.mxu0 %vm173_vm0, %v4021_v29  ;;  %v3104_v25 = vld [vmem:[%s4467_s21 + $0x8] sm:$0xff] }
 0x563   :  { %1335 = vmatpush.msra.mxu1 %v3104_v25 }
 0x56a   :  { %3096 = vmatmul.msk.f32.gmra.mxu0 %vm173_vm0, %v4026_v30 }
 0x572   :  { %3097 = vmatmul.msk.f32.gmra.mxu0 %vm173_vm0, %v4031_v35 }
 0x57a   :  { %3098 = vmatmul.msk.f32.gmra.mxu0 %vm173_vm0, %v4036_v36 }
 0x582   :  { %3099 = vmatmul.msk.f32.gmra.mxu0 %vm173_vm0, %v4041_v37 }
 0x587   :  { %v1122_v39 = vpop.f32.mrf.mxu1 }
 0x58a   :  { %3100 = vmatmul.msk.f32.gmra.mxu0 %vm173_vm0, %v4046_v40 }
 0x58f   :  { %v1125_v49 = vpop.f32.mrf.mxu1 }
 0x592   :  { %3101 = vmatmul.msk.f32.gmra.mxu0 %vm173_vm0, %v4053_v48 }
 0x597   :  { %v1128_v59 = vpop.f32.mrf.mxu1 }
 0x59a   :  { %3102 = vmatmul.msk.f32.gmra.mxu0 %vm173_vm0, %v4058_v58 }
 0x59f   :  { %v1131_v11 = vpop.f32.mrf.mxu1 }
 0x5a2   :  { %3103 = vmatmul.msk.f32.gmra.mxu0 %vm173_vm0, %v4066_v2 }
 0x5a7   :  { %v1078_v38 = vpop.f32.mrf.mxu0 }
 0x5a8   :  { %v1123_v41 = vadd.f32 %v1122_v39, %v1078_v38  ;;  %v3113_v38 = vld [vmem:[%s4467_s21 + $0x10] sm:$0xff] }
 0x5a9   :  { %1419 = vmatpush.msrb.mxu1 %v3113_v38  ;;  %v3237_v38 = vld [vmem:[%s4468_s25 + $0x88] sm:$0xff] }
 0x5af   :  { %v1081_v43 = vpop.f32.mrf.mxu0 }
 0x5b0   :  { %v1126_v61 = vadd.f32 %v1125_v49, %v1081_v43  ;;  %v3232_v49 = vld [vmem:[%s4468_s25 + $0x60] sm:$0xff] }
 0x5b7   :  { %v1084_v57 = vpop.f32.mrf.mxu0 }
 0x5b8   :  { %v1129_v4 = vadd.f32 %v1128_v59, %v1084_v57  ;;  %v3236_v59 = vld [vmem:[%s4468_s25 + $0x80] sm:$0xff] }
 0x5bf   :  { %v1087_v9 = vpop.f32.mrf.mxu0 }
 0x5c0   :  { %v1132_v12 = vadd.f32 %v1131_v11, %v1087_v9 }
 0x5c7   :  { %v1269_v20 = vpop.f32.mrf.mxu0 }
 0x5cd   :  { %v1168_v45 = vpop.f32.mrf.mxu3 }
 0x5ce   :  { %v1180_v46 = vadd.f32 %v1168_v45, %v1123_v41  ;;  %v3224_v41 = vld [vmem:[%s4468_s25 + $0x20] sm:$0xff] }
 0x5cf   :  { %v1272_v21 = vpop.f32.mrf.mxu0  ;;  %v3228_v45 = vld [vmem:[%s4468_s25 + $0x40] sm:$0xff] }
 0x5d0   :  { %v1187_v50 = vmul.f32 %v3429_v42, %v1180_v46  ;;  %v2401_v46 = vld [vmem:[%s4468_s25 + $0x8] sm:$0xff] }
 0x5d2   :  { %v1194_v53 = vadd.f32 %v3430_v47, %v1187_v50 }
 0x5d4   :  { %v1198_v54 = vmax.f32 %v1194_v53, 0.0 }
 0x5d5   :  { %v1171_v56 = vpop.f32.mrf.mxu3 }
 0x5d6   :  { %2467 = vperm.xlu2 %3363, %v1198_v54   ;;  %2438 = vperm.xlu0 %3362, %v1198_v54   ;;  %v1181_v62 = vadd.f32 %v1171_v56, %v1126_v61 }
 0x5d7   :  { %2406 = vperm.xlu1 %3361, %v1198_v54   ;;  %v1275_v22 = vpop.f32.mrf.mxu0 }
 0x5d8   :  { %v1188_v5 = vmul.f32 %v3429_v42, %v1181_v62 }
 0x5da   :  { %v1195_v13 = vadd.f32 %v3430_v47, %v1188_v5 }
 0x5dc   :  { %v1199_v7 = vmax.f32 %v1195_v13, 0.0 }
 0x5dd   :  { %v1174_v0 = vpop.f32.mrf.mxu3 }
 0x5de   :  { %3364 = vset.pattern.permute.xlu2 %v3502_v31  ;;  %3365 = vset.pattern.permute.xlu0 %v3507_v55  ;;  %v1182_v10 = vadd.f32 %v1174_v0, %v1129_v4  ;;  %v3240_v4 = vld [vmem:[%s4468_s25 + $0xa0] sm:$0xff] }
 0x5df   :  { %3366 = vset.pattern.permute.xlu1 %v3508_v3  ;;  %2496 = vperm.xlu2 %3364, %v1198_v54   ;;  %v4111_v23 = vpop.f32.mrf.mxu0 }
 0x5e0   :  { %2525 = vperm.xlu0 %3365, %v1198_v54   ;;  %2554 = vperm.xlu1 %3366, %v1198_v54   ;;  %v1189_v1 = vmul.f32 %v3429_v42, %v1182_v10 }
 0x5e2   :  { %v1196_v15 = vadd.f32 %v3430_v47, %v1189_v1  ;;  %v1490_v1 = vld [vmem:[%s4469_s29] sm:$0xff] }
 0x5e4   :  { %v4075_v19 = vmax.f32 %v1196_v15, 0.0 }
 0x5e5   :  { %v1177_v6 = vpop.f32.mrf.mxu3 }
 0x5e6   :  { %v1183_v44 = vadd.f32 %v1177_v6, %v1132_v12  ;;  %v3244_v6 = vld [vmem:[%s4468_s25 + $0xc0] sm:$0xff] }
 0x5e7   :  { %3368 = vset.pattern.permute.xlu2 %v3509_v8  ;;  %v1281_v24 = vpop.f32.mrf.mxu0 }
 0x5e8   :  { %v1190_v14 = vmul.f32 %v3429_v42, %v1183_v44  ;;  %3367 = vset.pattern.permute.xlu0 %v3505_v51  ;;  %3370 = vset.pattern.permute.xlu1 %v3503_v32  ;;  %v3248_v44 = vld [vmem:[%s4468_s25 + $0xe0] sm:$0xff] }
 0x5e9   :  { %2612 = vperm.xlu2 %3368, %v1198_v54   ;;  %2583 = vperm.xlu0 %3367, %v1198_v54  }
 0x5ea   :  { %v1197_v17 = vadd.f32 %v3430_v47, %v1190_v14  ;;  %2442 = vperm.xlu1 %3370, %v1199_v7   ;;  %3105 = vmatmul.msk.f32.vlgmr.msra.gmra.mxu1 %vm530_vm3, %v1281_v24  ;;  %v3229_v24 = vld [vmem:[%s4468_s25 + $0x48] sm:$0xff] }
 0x5ec   :  { %v4073_v18 = vmax.f32 %v1197_v17, 0.0 }
 0x5ee   :  { %1449 = vmatpush.msrb.mxu2 %v4073_v18 }
 0x5f0   :  { %1450 = vmatpush.msrb.mxu2 %v4075_v19 }
 0x5f1   :  { %3369 = vset.pattern.permute.xlu2 %v3504_v33  ;;  %3373 = vset.pattern.permute.xlu0 %v3507_v55 }
 0x5f2   :  { %3371 = vset.pattern.permute.xlu1 %v3506_v52  ;;  %2529 = vperm.xlu0 %3373, %v1199_v7  }
 0x5f3   :  { %2471 = vperm.xlu1 %3371, %v1199_v7   ;;  %2411 = vperm.xlu2 %3369, %v1199_v7  }
 0x5f4   :  { %1451 = vmatpush.msrb.mxu2 %v1199_v7 }
 0x5f6   :  { %1452 = vmatpush.msrb.mxu2 %v1198_v54 }
 0x5f7   :  { %3118 = vmatmul.msk.f32.vlgmr.msrb.gmra.mxu2 %vm173_vm0, %v4006_v26 }
 0x5fa   :  { %3387 = vset.pattern.permute.xlu0 %v3506_v52 }
 0x5fb   :  { %3372 = vset.pattern.permute.xlu1 %v3502_v31  ;;  %3375 = vset.pattern.permute.xlu2 %v3505_v51 }
 0x5fc   :  { %2500 = vperm.xlu1 %3372, %v1199_v7   ;;  %2587 = vperm.xlu2 %3375, %v1199_v7  }
 0x5fd   :  { %2479 = vperm.xlu0 %3387, %v4073_v18  }
 0x5ff   :  { %3119 = vmatmul.msk.f32.gmra.mxu2 %vm173_vm0, %v4011_v27  ;;  %v1284_v27 = vpop.f32.mrf.mxu0 }
 0x600   :  { %3106 = vmatmul.msk.f32.gmra.mxu1 %vm530_vm3, %v1284_v27 }
 0x604   :  { %3374 = vset.pattern.permute.xlu1 %v3508_v3  ;;  %3378 = vset.pattern.permute.xlu2 %v3503_v32 }
 0x605   :  { %3389 = vset.pattern.permute.xlu0 %v3507_v55  ;;  %2558 = vperm.xlu1 %3374, %v1199_v7  }
 0x606   :  { %2446 = vperm.xlu2 %3378, %v4075_v19   ;;  %2537 = vperm.xlu0 %3389, %v4073_v18  }
 0x607   :  { %3120 = vmatmul.msk.f32.gmra.mxu2 %vm173_vm0, %v4016_v28  ;;  %v1305_v28 = vld [vmem:[%s4467_s21] sm:$0xff] }
 0x608   :  { %1376 = vmatpush.msra.mxu3 %v1305_v28 }
 0x609   :  { %3109 = vmatmul.msk.f32.vlgmr.msra.gmra.mxu3 %vm530_vm3, %v1269_v20 }
 0x60a   :  { %1518 = vmatpush.msrb.mxu3 %v1490_v1 }
 0x60d   :  { %3376 = vset.pattern.permute.xlu1 %v3509_v8 }
 0x60e   :  { %3380 = vset.pattern.permute.xlu2 %v3502_v31  ;;  %3392 = vset.pattern.permute.xlu0 %v3509_v8 }
 0x60f   :  { %2616 = vperm.xlu1 %3376, %v1199_v7   ;;  %2504 = vperm.xlu2 %3380, %v4075_v19  }
 0x610   :  { %2624 = vperm.xlu0 %3392, %v4073_v18   ;;  %3121 = vmatmul.msk.f32.gmra.mxu2 %vm173_vm0, %v4021_v29  ;;  %v1287_v29 = vpop.f32.mrf.mxu0 }
 0x611   :  { %3107 = vmatmul.msk.f32.gmra.mxu1 %vm530_vm3, %v1287_v29  ;;  %3110 = vmatmul.msk.f32.gmra.mxu3 %vm530_vm3, %v1272_v21  ;;  %v3233_v29 = vld [vmem:[%s4468_s25 + $0x68] sm:$0xff] }
 0x617   :  { %3377 = vset.pattern.permute.xlu1 %v3504_v33  ;;  %3381 = vset.pattern.permute.xlu2 %v3507_v55 }
 0x618   :  { %2533 = vperm.xlu2 %3381, %v4075_v19   ;;  %2416 = vperm.xlu1 %3377, %v4075_v19  }
 0x619   :  { %3122 = vmatmul.msk.f32.gmra.mxu2 %vm173_vm0, %v4026_v30  ;;  %3396 = vset.pattern.permute.xlu0 %v3502_v31 }
 0x61a   :  { %3111 = vmatmul.msk.f32.gmra.mxu3 %vm530_vm3, %v1275_v22 }
 0x620   :  { %3383 = vset.pattern.permute.xlu2 %v3505_v51  ;;  %3379 = vset.pattern.permute.xlu1 %v3506_v52 }
 0x621   :  { %3123 = vmatmul.msk.f32.gmra.mxu2 %vm173_vm0, %v4031_v35  ;;  %2591 = vperm.xlu2 %3383, %v4075_v19   ;;  %v1290_v35 = vpop.f32.mrf.mxu0 }
 0x622   :  { %2475 = vperm.xlu1 %3379, %v4075_v19   ;;  %3108 = vmatmul.msk.f32.gmra.mxu1 %vm530_vm3, %v1290_v35 }
 0x623   :  { %3112 = vmatmul.msk.f32.gmra.mxu3 %vm530_vm3, %v4111_v23 }
 0x629   :  { %3124 = vmatmul.msk.f32.gmra.mxu2 %vm173_vm0, %v4036_v36  ;;  %3385 = vset.pattern.permute.xlu2 %v3504_v33 }
 0x62a   :  { %3382 = vset.pattern.permute.xlu1 %v3508_v3  ;;  %2421 = vperm.xlu2 %3385, %v4073_v18  }
 0x62b   :  { %2562 = vperm.xlu1 %3382, %v4075_v19  }
 0x630   :  { %v2468_v26 = vpop.permute.xlu2 %2467 }
 0x631   :  { %3125 = vmatmul.msk.f32.gmra.mxu2 %vm173_vm0, %v4041_v37  ;;  %v2400_v37 = vld [vmem:[%s4468_s25] sm:$0xff]  ;;  %v2482_v53 = vmul.f32 %v3228_v45, %v2468_v26 }
 0x632   :  { %3388 = vset.pattern.permute.xlu2 %v3502_v31 }
 0x633   :  { %3384 = vset.pattern.permute.xlu1 %v3509_v8  ;;  %2508 = vperm.xlu2 %3388, %v4073_v18  }
 0x634   :  { %2620 = vperm.xlu1 %3384, %v4075_v19  }
 0x639   :  { %3126 = vmatmul.msk.f32.gmra.mxu2 %vm173_vm0, %v4046_v40  ;;  %v2497_v30 = vpop.permute.xlu2 %2496  ;;  %v1293_v40 = vpop.f32.mrf.mxu0 }
 0x63a   :  { %3114 = vmatmul.msk.f32.vlgmr.msrb.gmra.mxu1 %vm530_vm3, %v1293_v40  ;;  %v2511_v57 = vmul.f32 %v3232_v49, %v2497_v30  ;;  %v3241_v40 = vld [vmem:[%s4468_s25 + $0xa8] sm:$0xff] }
 0x63b   :  { %3391 = vset.pattern.permute.xlu2 %v3505_v51 }
 0x63c   :  { %3386 = vset.pattern.permute.xlu1 %v3503_v32  ;;  %2595 = vperm.xlu2 %3391, %v4073_v18  }
 0x63d   :  { %2450 = vperm.xlu1 %3386, %v4073_v18  }
 0x641   :  { %3127 = vmatmul.msk.f32.gmra.mxu2 %vm173_vm0, %v4053_v48  ;;  %v1296_v62 = vpop.f32.mrf.mxu0 }
 0x642   :  { %3115 = vmatmul.msk.f32.gmra.mxu1 %vm530_vm3, %v1296_v62 }
 0x643   :  { %v2613_v36 = vpop.permute.xlu2 %2612 }
 0x644   :  { %3394 = vset.pattern.permute.xlu2 %v3503_v32 }
 0x645   :  { %3390 = vset.pattern.permute.xlu1 %v3508_v3 }
 0x646   :  { %2566 = vperm.xlu1 %3390, %v4073_v18   ;;  %v2627_v18 = vmul.f32 %v3248_v44, %v2613_v36  ;;  %v3234_v44 = vld [vmem:[%s4468_s25 + $0x70] sm:$0xff] }
 0x648   :  { %v2439_v39 = vpop.permute.xlu0 %2438 }
 0x649   :  { %3128 = vmatmul.msk.f32.gmra.mxu2 %vm173_vm0, %v4058_v58  ;;  %v2407_v42 = vpop.permute.xlu1 %2406  ;;  %v2453_v47 = vmul.f32 %v3224_v41, %v2439_v39  ;;  %v1299_v13 = vpop.f32.mrf.mxu0 }
 0x64a   :  { %v2424_v43 = vmul.f32 %v2407_v42, %v2400_v37  ;;  %3116 = vmatmul.msk.f32.gmra.mxu1 %vm530_vm3, %v1299_v13  ;;  %v3245_v42 = vld [vmem:[%s4468_s25 + $0xc8] sm:$0xff] }
 0x64c   :  { %v2428_v48 = vadd.f32 %v2424_v43, %v3869_v63 }
 0x64d   :  { %v2412_v50 = vpop.permute.xlu2 %2411 }
 0x64e   :  { %v2457_v54 = vadd.f32 %v2453_v47, %v2428_v48  ;;  %v2425_v56 = vmul.f32 %v2412_v50, %v2401_v46  ;;  %3393 = vset.pattern.permute.xlu1 %v3504_v33 }
 0x650   :  { %v2429_v58 = vadd.f32 %v2425_v56, %v3877_v34  ;;  %v2486_v61 = vadd.f32 %v2482_v53, %v2457_v54  ;;  %v3134_v53 = vld [vmem:[%s4469_s29 + $0x8] sm:$0xff] }
 0x651   :  { %3129 = vmatmul.msk.f32.gmra.mxu2 %vm173_vm0, %v4066_v2  ;;  %v3225_v2 = vld [vmem:[%s4468_s25 + $0x28] sm:$0xff]  ;;  %v1302_v22 = vpop.f32.mrf.mxu0  ;;  %1565 = vmatpush.msra.mxu1 %v3134_v53 }
 0x652   :  { %v2526_v63 = vpop.permute.xlu0 %2525  ;;  %v2515_v0 = vadd.f32 %v2511_v57, %v2486_v61  ;;  %v2555_v5 = vpop.permute.xlu1 %2554  ;;  %3117 = vmatmul.msk.f32.gmra.mxu1 %vm530_vm3, %v1302_v22  ;;  %v3249_v56 = vld [vmem:[%s4468_s25 + $0xe8] sm:$0xff]  ;;  %v2403_v61 = vld [vmem:[%s4468_s25 + $0x18] sm:$0xff]  ;;  %v3139_v22 = vld [vmem:[%s4469_s29 + $0x10] sm:$0xff] }
 0x653   :  { %v2540_v34 = vmul.f32 %v3236_v59, %v2526_v63  ;;  %v2569_v10 = vmul.f32 %v3240_v4, %v2555_v5  ;;  %v2402_v5 = vld [vmem:[%s4468_s25 + $0x10] sm:$0xff]  ;;  %1612 = vmatpush.msra.mxu3 %v3139_v22 }
 0x655   :  { %v2544_v9 = vadd.f32 %v2540_v34, %v2515_v0  ;;  %v3226_v34 = vld [vmem:[%s4468_s25 + $0x30] sm:$0xff] }
 0x656   :  { %v2588_v11 = vpop.permute.xlu2 %2587 }
 0x657   :  { %v2573_v12 = vadd.f32 %v2569_v10, %v2544_v9  ;;  %v2599_v47 = vmul.f32 %v3245_v42, %v2588_v11 }
 0x65b   :  { %v2584_v7 = vpop.permute.xlu0 %2583 }
 0x65c   :  { %v2598_v14 = vmul.f32 %v3244_v6, %v2584_v7  ;;  %v2443_v15 = vpop.permute.xlu1 %2442 }
 0x65d   :  { %v2454_v17 = vmul.f32 %v3225_v2, %v2443_v15  ;;  %v3230_v2 = vld [vmem:[%s4468_s25 + $0x50] sm:$0xff] }
 0x65e   :  { %v2602_v19 = vadd.f32 %v2598_v14, %v2573_v12  ;;  %v3238_v14 = vld [vmem:[%s4468_s25 + $0x90] sm:$0xff] }
 0x65f   :  { %v2458_v20 = vadd.f32 %v2454_v17, %v2429_v58 }
 0x660   :  { %v2447_v21 = vpop.permute.xlu2 %2446  ;;  %v4175_v23 = vadd.f32 %v2627_v18, %v2602_v19 }
 0x661   :  { %v2455_v12 = vmul.f32 %v3226_v34, %v2447_v21  ;;  %v3242_v21 = vld [vmem:[%s4468_s25 + $0xb0] sm:$0xff] }
 0x664   :  { %v2530_v39 = vpop.permute.xlu0 %2529 }
 0x665   :  { %v2472_v25 = vpop.permute.xlu1 %2471  ;;  %v2541_v41 = vmul.f32 %v3237_v38, %v2530_v39 }
 0x666   :  { %v2483_v26 = vmul.f32 %v3229_v24, %v2472_v25 }
 0x668   :  { %v2487_v27 = vadd.f32 %v2483_v26, %v2458_v20 }
 0x669   :  { %v2505_v28 = vpop.permute.xlu2 %2504 }
 0x66a   :  { %v2513_v15 = vmul.f32 %v3234_v44, %v2505_v28 }
 0x66e   :  { %v2501_v30 = vpop.permute.xlu1 %2500 }
 0x66f   :  { %v2512_v35 = vmul.f32 %v3233_v29, %v2501_v30  ;;  %v2480_v42 = vpop.permute.xlu0 %2479 }
 0x671   :  { %v2516_v36 = vadd.f32 %v2512_v35, %v2487_v27  ;;  %v3250_v35 = vld [vmem:[%s4468_s25 + $0xf0] sm:$0xff] }
 0x672   :  { %v2534_v37 = vpop.permute.xlu2 %2533 }
 0x673   :  { %v2545_v45 = vadd.f32 %v2541_v41, %v2516_v36  ;;  %v2542_v18 = vmul.f32 %v3238_v14, %v2534_v37  ;;  %v3231_v41 = vld [vmem:[%s4468_s25 + $0x58] sm:$0xff] }
 0x677   :  { %v2559_v43 = vpop.permute.xlu1 %2558 }
 0x678   :  { %v2570_v46 = vmul.f32 %v3241_v40, %v2559_v43  ;;  %v3227_v40 = vld [vmem:[%s4468_s25 + $0x38] sm:$0xff] }
 0x67a   :  { %v2574_v48 = vadd.f32 %v2570_v46, %v2545_v45  ;;  %v1454_v49 = vpop.f32.mrf.mxu2  ;;  %v3235_v46 = vld [vmem:[%s4468_s25 + $0x78] sm:$0xff] }
 0x67b   :  { %v2592_v50 = vpop.permute.xlu2 %2591  ;;  %3130 = vmatmul.msk.f32.vlgmr.msrb.gmra.mxu3 %vm530_vm3, %v1454_v49 }
 0x67c   :  { %v2603_v54 = vadd.f32 %v2599_v47, %v2574_v48  ;;  %v2485_v48 = vmul.f32 %v3231_v41, %v2480_v42 }
 0x681   :  { %v2617_v57 = vpop.permute.xlu1 %2616 }
 0x682   :  { %v2628_v58 = vmul.f32 %v3249_v56, %v2617_v57  ;;  %v1457_v59 = vpop.f32.mrf.mxu2  ;;  %v1337_v57 = vpop.f32.mrf.mxu1 }
 0x683   :  { %3131 = vmatmul.msk.f32.gmra.mxu3 %vm530_vm3, %v1457_v59 }
 0x684   :  { %v4188_v62 = vadd.f32 %v2628_v58, %v2603_v54  ;;  %v2422_v63 = vpop.permute.xlu2 %2421 }
 0x685   :  { %v2427_v0 = vmul.f32 %v2422_v63, %v2403_v61 }
 0x687   :  { %v2431_v4 = vadd.f32 %v2427_v0, %v3907_v60 }
 0x68a   :  { %v2417_v9 = vpop.permute.xlu1 %2416  ;;  %v1460_v10 = vpop.f32.mrf.mxu2 }
 0x68b   :  { %v2426_v11 = vmul.f32 %v2417_v9, %v2402_v5  ;;  %3132 = vmatmul.msk.f32.gmra.mxu3 %vm530_vm3, %v1460_v10  ;;  %v1340_v61 = vpop.f32.mrf.mxu1 }
 0x68c   :  { %v1378_v59 = vpop.f32.mrf.mxu3 }
 0x68d   :  { %v2430_v13 = vadd.f32 %v2426_v11, %v3892_v16  ;;  %v3246_v16 = vld [vmem:[%s4468_s25 + $0xd0] sm:$0xff]  ;;  %v2509_v47 = vpop.permute.xlu2 %2508  ;;  %v1379_v22 = vadd.f32 %v1378_v59, %v1337_v57  ;;  %v3432_v57 = vld [vmem:[%s4471_s8] ss:$0 sm:$0xff] }
 0x68e   :  { %v2600_v27 = vmul.f32 %v3246_v16, %v2592_v50  ;;  %v2514_v50 = vmul.f32 %v3235_v46, %v2509_v47 }
 0x68f   :  { %v2459_v6 = vadd.f32 %v2455_v12, %v2430_v13 }
 0x693   :  { %v1463_v1 = vpop.f32.mrf.mxu2 }
 0x694   :  { %v2476_v7 = vpop.permute.xlu1 %2475  ;;  %3133 = vmatmul.msk.f32.gmra.mxu3 %vm530_vm3, %v1463_v1  ;;  %v1381_v0 = vpop.f32.mrf.mxu3 }
 0x695   :  { %v2484_v60 = vmul.f32 %v3230_v2, %v2476_v7  ;;  %v1382_v5 = vadd.f32 %v1381_v0, %v1340_v61 }
 0x697   :  { %v2488_v17 = vadd.f32 %v2484_v60, %v2459_v6 }
 0x699   :  { %v2517_v19 = vadd.f32 %v2513_v15, %v2488_v17 }
 0x69b   :  { %v2546_v20 = vadd.f32 %v2542_v18, %v2517_v19 }
 0x69c   :  { %v1466_v24 = vpop.f32.mrf.mxu2 }
 0x69d   :  { %v2563_v25 = vpop.permute.xlu1 %2562  ;;  %3135 = vmatmul.msk.f32.vlgmr.msra.gmra.mxu1 %vm530_vm3, %v1466_v24  ;;  %v1384_v9 = vpop.f32.mrf.mxu3 }
 0x69e   :  { %v2571_v26 = vmul.f32 %v3242_v21, %v2563_v25 }
 0x6a0   :  { %v2575_v29 = vadd.f32 %v2571_v26, %v2546_v20 }
 0x6a2   :  { %v2604_v28 = vadd.f32 %v2600_v27, %v2575_v29 }
 0x6a4   :  { %v1469_v30 = vpop.f32.mrf.mxu2 }
 0x6a5   :  { %3136 = vmatmul.msk.f32.gmra.mxu1 %vm530_vm3, %v1469_v30 }
 0x6a6   :  { %v2621_v36 = vpop.permute.xlu1 %2620  ;;  %v1387_v6 = vpop.f32.mrf.mxu3 }
 0x6a7   :  { %v2629_v37 = vmul.f32 %v3250_v35, %v2621_v36 }
 0x6a9   :  { %v4205_v38 = vadd.f32 %v2629_v37, %v2604_v28 }
 0x6ac   :  { %v1472_v39 = vpop.f32.mrf.mxu2 }
 0x6ad   :  { %3137 = vmatmul.msk.f32.gmra.mxu1 %vm530_vm3, %v1472_v39 }
 0x6af   :  { %v2451_v43 = vpop.permute.xlu1 %2450 }
 0x6b0   :  { %v2456_v45 = vmul.f32 %v3227_v40, %v2451_v43 }
 0x6b2   :  { %v2460_v49 = vadd.f32 %v2456_v45, %v2431_v4  ;;  %v1343_v4 = vpop.f32.mrf.mxu1  ;;  %v3431_v45 = vld [vmem:[%s4470_s3] ss:$0 sm:$0xff] }
 0x6b3   :  { %v1385_v10 = vadd.f32 %v1384_v9, %v1343_v4 }
 0x6b4   :  { %v2489_v53 = vadd.f32 %v2485_v48, %v2460_v49  ;;  %v1475_v54 = vpop.f32.mrf.mxu2 }
 0x6b5   :  { %3138 = vmatmul.msk.f32.gmra.mxu1 %vm530_vm3, %v1475_v54 }
 0x6b6   :  { %v4212_v56 = vadd.f32 %v2514_v50, %v2489_v53 }
 0x6ba   :  { %v1346_v12 = vpop.f32.mrf.mxu1 }
 0x6bb   :  { %v1388_v16 = vadd.f32 %v1387_v6, %v1346_v12  ;;  %v1650_v12 = vld [vmem:[%s4472_s14 + $0x10] sm:$0xff]  ;;  %v1652_v6 = vld [vmem:[%s4472_s14 + $0x20] sm:$0xff] }
 0x6bc   :  { %v1478_v58 = vpop.f32.mrf.mxu2 }
 0x6bd   :  { %3140 = vmatmul.msk.f32.vlgmr.msra.gmra.mxu3 %vm530_vm3, %v1478_v58 }
 0x6c2   :  { %v1421_v13 = vpop.f32.mrf.mxu1 }
 0x6c3   :  { %v1433_v29 = vadd.f32 %v1421_v13, %v1379_v22  ;;  %v1651_v13 = vld [vmem:[%s4472_s14 + $0x18] sm:$0xff] }
 0x6c4   :  { %v1481_v63 = vpop.f32.mrf.mxu2 }
 0x6c5   :  { %3141 = vmatmul.msk.f32.gmra.mxu3 %vm530_vm3, %v1481_v63 }
 0x6ca   :  { %v1424_v2 = vpop.f32.mrf.mxu1 }
 0x6cb   :  { %v1434_v26 = vadd.f32 %v1424_v2, %v1382_v5  ;;  %v1653_v2 = vld [vmem:[%s4472_s14 + $0x28] sm:$0xff] }
 0x6cc   :  { %v1484_v34 = vpop.f32.mrf.mxu2 }
 0x6cd   :  { %3142 = vmatmul.msk.f32.gmra.mxu3 %vm530_vm3, %v1484_v34 }
 0x6d2   :  { %v1427_v44 = vpop.f32.mrf.mxu1 }
 0x6d3   :  { %v1435_v24 = vadd.f32 %v1427_v44, %v1385_v10  ;;  %v1648_v10 = vld [vmem:[%s4472_s14] sm:$0xff]  ;;  %v1655_v44 = vld [vmem:[%s4472_s14 + $0x38] sm:$0xff] }
 0x6d4   :  { %v1487_v11 = vpop.f32.mrf.mxu2 }
 0x6d5   :  { %3143 = vmatmul.msk.f32.gmra.mxu3 %vm530_vm3, %v1487_v11  ;;  %v1649_v11 = vld [vmem:[%s4472_s14 + $0x8] sm:$0xff] }
 0x6da   :  { %v1430_v60 = vpop.f32.mrf.mxu1 }
 0x6db   :  { %v1436_v28 = vadd.f32 %v1430_v60, %v1388_v16  ;;  %v1657_v60 = vld [vmem:[%s4472_s14 + $0x48] sm:$0xff] }
 0x6fe   :  { %v1520_v1 = vpop.f32.mrf.mxu3 }
 0x6ff   :  { %v1532_v37 = vadd.f32 %v1520_v1, %v1433_v29  ;;  %v1654_v1 = vld [vmem:[%s4472_s14 + $0x30] sm:$0xff] }
 0x706   :  { %v1523_v7 = vpop.f32.mrf.mxu3 }
 0x707   :  { %v1533_v30 = vadd.f32 %v1523_v7, %v1434_v26  ;;  %v1656_v7 = vld [vmem:[%s4472_s14 + $0x40] sm:$0xff] }
 0x70e   :  { %v1526_v14 = vpop.f32.mrf.mxu3 }
 0x70f   :  { %v1534_v27 = vadd.f32 %v1526_v14, %v1435_v24  ;;  %v1658_v14 = vld [vmem:[%s4472_s14 + $0x50] sm:$0xff] }
 0x710   :  { %v3165_v24 = vld [vmem:[%s4473_s19 + $0x10] sm:$0xff] }
 0x717   :  { %v1529_v17 = vpop.f32.mrf.mxu3 }
 0x718   :  { %v1535_v39 = vadd.f32 %v1529_v17, %v1436_v28  ;;  %v1751_v17 = vld [vmem:[%s4473_s19] sm:$0xff] }
 0x719   :  { %1822 = vmatpush.msrb.mxu3 %v1751_v17  ;;  %v1904_v17 = vld [vmem:[%s4476_s12 + $0x18] sm:$0xff] }
 0x71a   :  { %v1567_v15 = vpop.f32.mrf.mxu1 }
 0x71b   :  { %v1579_v42 = vadd.f32 %v1567_v15, %v1532_v37  ;;  %v1659_v15 = vld [vmem:[%s4472_s14 + $0x58] sm:$0xff] }
 0x722   :  { %v1570_v18 = vpop.f32.mrf.mxu1 }
 0x723   :  { %v1580_v40 = vadd.f32 %v1570_v18, %v1533_v30  ;;  %v3156_v18 = vld [vmem:[%s4473_s19 + $0x8] sm:$0xff] }
 0x724   :  { %1781 = vmatpush.msrb.mxu1 %v3156_v18  ;;  %v1905_v18 = vld [vmem:[%s4476_s12 + $0x20] sm:$0xff] }
 0x726   :  { %1865 = vmatpush.msra.mxu1 %v3165_v24  ;;  %v1910_v24 = vld [vmem:[%s4476_s12 + $0x48] sm:$0xff] }
 0x72a   :  { %v1573_v21 = vpop.f32.mrf.mxu1 }
 0x72b   :  { %v1581_v35 = vadd.f32 %v1573_v21, %v1534_v27 }
 0x732   :  { %v1576_v36 = vpop.f32.mrf.mxu1 }
 0x733   :  { %v1582_v43 = vadd.f32 %v1576_v36, %v1535_v39 }
 0x740   :  { %v1614_v19 = vpop.f32.mrf.mxu3 }
 0x741   :  { %v1626_v48 = vadd.f32 %v1614_v19, %v1579_v42 }
 0x743   :  { %v1633_v58 = vmul.f32 %v3431_v45, %v1626_v48 }
 0x745   :  { %v1640_v34 = vadd.f32 %v3432_v57, %v1633_v58  ;;  %v3433_v58 = vld [vmem:[%s4474_s24] ss:$0 sm:$0xff] }
 0x747   :  { %v1644_v9 = vmax.f32 %v1640_v34, 0.0 }
 0x748   :  { %v1617_v20 = vpop.f32.mrf.mxu3 }
 0x749   :  { %v1627_v46 = vadd.f32 %v1617_v20, %v1580_v40 }
 0x74b   :  { %v1634_v53 = vmul.f32 %v3431_v45, %v1627_v46 }
 0x74d   :  { %v1641_v0 = vadd.f32 %v3432_v57, %v1634_v53 }
 0x74f   :  { %v1645_v4 = vmax.f32 %v1641_v0, 0.0 }
 0x750   :  { %v1620_v25 = vpop.f32.mrf.mxu3 }
 0x751   :  { %v1628_v41 = vadd.f32 %v1620_v25, %v1581_v35 }
 0x753   :  { %v1635_v49 = vmul.f32 %v3431_v45, %v1628_v41 }
 0x755   :  { %v1642_v61 = vadd.f32 %v3432_v57, %v1635_v49 }
 0x757   :  { %v1646_v5 = vmax.f32 %v1642_v61, 0.0 }
 0x758   :  { %v1623_v47 = vpop.f32.mrf.mxu3 }
 0x759   :  { %v1629_v50 = vadd.f32 %v1623_v47, %v1582_v43 }
 0x75b   :  { %v1636_v54 = vmul.f32 %v3431_v45, %v1629_v50 }
 0x75d   :  { %v1643_v59 = vadd.f32 %v3432_v57, %v1636_v54 }
 0x75f   :  { %v1647_v63 = vmax.f32 %v1643_v59, 0.0 }
 0x761   :  { %1710 = vmatpush.msrb.mxu0 %v1647_v63 }
 0x763   :  { %1711 = vmatpush.msrb.mxu0 %v1646_v5 }
 0x765   :  { %1712 = vmatpush.msrb.mxu0 %v1645_v4 }
 0x767   :  { %1713 = vmatpush.msrb.mxu0 %v1644_v9  ;;  %v3434_v9 = vld [vmem:[%s4475_s6] ss:$0 sm:$0xff] }
 0x768   :  { %3144 = vmatmul.msk.f32.vlgmr.msrb.gmra.mxu0 %vm173_vm0, %v1648_v10 }
 0x770   :  { %3145 = vmatmul.msk.f32.gmra.mxu0 %vm173_vm0, %v1649_v11 }
 0x778   :  { %3146 = vmatmul.msk.f32.gmra.mxu0 %vm173_vm0, %v1650_v12 }
 0x780   :  { %3147 = vmatmul.msk.f32.gmra.mxu0 %vm173_vm0, %v1651_v13 }
 0x788   :  { %3148 = vmatmul.msk.f32.gmra.mxu0 %vm173_vm0, %v1652_v6 }
 0x790   :  { %3149 = vmatmul.msk.f32.gmra.mxu0 %vm173_vm0, %v1653_v2 }
 0x798   :  { %3150 = vmatmul.msk.f32.gmra.mxu0 %vm173_vm0, %v1654_v1 }
 0x7a0   :  { %3151 = vmatmul.msk.f32.gmra.mxu0 %vm173_vm0, %v1655_v44 }
 0x7a8   :  { %3152 = vmatmul.msk.f32.gmra.mxu0 %vm173_vm0, %v1656_v7 }
 0x7b0   :  { %3153 = vmatmul.msk.f32.gmra.mxu0 %vm173_vm0, %v1657_v60  ;;  %v1901_v60 = vld [vmem:[%s4476_s12] sm:$0xff] }
 0x7b8   :  { %3154 = vmatmul.msk.f32.gmra.mxu0 %vm173_vm0, %v1658_v14  ;;  %v1902_v14 = vld [vmem:[%s4476_s12 + $0x8] sm:$0xff] }
 0x7c0   :  { %3155 = vmatmul.msk.f32.gmra.mxu0 %vm173_vm0, %v1659_v15  ;;  %v1903_v15 = vld [vmem:[%s4476_s12 + $0x10] sm:$0xff] }
 0x7e5   :  { %v1715_v19 = vpop.f32.mrf.mxu0 }
 0x7e6   :  { %3161 = vmatmul.msk.f32.vlgmr.msrb.gmra.mxu3 %vm530_vm3, %v1715_v19  ;;  %v1906_v19 = vld [vmem:[%s4476_s12 + $0x28] sm:$0xff] }
 0x7ed   :  { %v1718_v20 = vpop.f32.mrf.mxu0 }
 0x7ee   :  { %3162 = vmatmul.msk.f32.gmra.mxu3 %vm530_vm3, %v1718_v20  ;;  %v1907_v20 = vld [vmem:[%s4476_s12 + $0x30] sm:$0xff] }
 0x7f5   :  { %v1721_v21 = vpop.f32.mrf.mxu0 }
 0x7f6   :  { %3163 = vmatmul.msk.f32.gmra.mxu3 %vm530_vm3, %v1721_v21  ;;  %v1908_v21 = vld [vmem:[%s4476_s12 + $0x38] sm:$0xff] }
 0x7fd   :  { %v1724_v22 = vpop.f32.mrf.mxu0 }
 0x7fe   :  { %3164 = vmatmul.msk.f32.gmra.mxu3 %vm530_vm3, %v1724_v22  ;;  %v1909_v22 = vld [vmem:[%s4476_s12 + $0x40] sm:$0xff] }
 0x805   :  { %v1727_v16 = vpop.f32.mrf.mxu0 }
 0x806   :  { %3157 = vmatmul.msk.f32.vlgmr.msrb.gmra.mxu1 %vm530_vm3, %v1727_v16  ;;  %v1911_v16 = vld [vmem:[%s4476_s12 + $0x50] sm:$0xff] }
 0x80d   :  { %v1730_v25 = vpop.f32.mrf.mxu0 }
 0x80e   :  { %3158 = vmatmul.msk.f32.gmra.mxu1 %vm530_vm3, %v1730_v25  ;;  %v1912_v25 = vld [vmem:[%s4476_s12 + $0x58] sm:$0xff] }
 0x815   :  { %v1733_v26 = vpop.f32.mrf.mxu0 }
 0x816   :  { %3159 = vmatmul.msk.f32.gmra.mxu1 %vm530_vm3, %v1733_v26  ;;  %v2004_v26 = vld [vmem:[%s4477_s7] sm:$0xff] }
 0x817   :  { %2075 = vmatpush.msrb.mxu1 %v2004_v26 }
 0x81d   :  { %v1736_v27 = vpop.f32.mrf.mxu0 }
 0x81e   :  { %3160 = vmatmul.msk.f32.gmra.mxu1 %vm530_vm3, %v1736_v27  ;;  %v3182_v27 = vld [vmem:[%s4477_s7 + $0x8] sm:$0xff] }
 0x81f   :  { %2034 = vmatpush.msra.mxu3 %v3182_v27 }
 0x825   :  { %v1739_v29 = vpop.f32.mrf.mxu0 }
 0x826   :  { %3166 = vmatmul.msk.f32.vlgmr.msra.gmra.mxu1 %vm530_vm3, %v1739_v29 }
 0x82d   :  { %v1742_v28 = vpop.f32.mrf.mxu0 }
 0x82e   :  { %3167 = vmatmul.msk.f32.gmra.mxu1 %vm530_vm3, %v1742_v28 }
 0x835   :  { %v1745_v30 = vpop.f32.mrf.mxu0 }
 0x836   :  { %3168 = vmatmul.msk.f32.gmra.mxu1 %vm530_vm3, %v1745_v30 }
 0x83d   :  { %v1748_v35 = vpop.f32.mrf.mxu0 }
 0x83e   :  { %3169 = vmatmul.msk.f32.gmra.mxu1 %vm530_vm3, %v1748_v35 }
 0x869   :  { %v1824_v40 = vpop.f32.mrf.mxu3 }
 0x871   :  { %v1827_v43 = vpop.f32.mrf.mxu3 }
 0x879   :  { %v1830_v46 = vpop.f32.mrf.mxu3 }
 0x881   :  { %v1833_v53 = vpop.f32.mrf.mxu3 }
 0x883   :  { %v1783_v36 = vpop.f32.mrf.mxu1 }
 0x884   :  { %v1825_v54 = vadd.f32 %v1824_v40, %v1783_v36  ;;  %v3191_v36 = vld [vmem:[%s4477_s7 + $0x10] sm:$0xff] }
 0x885   :  { %2118 = vmatpush.msrb.mxu3 %v3191_v36  ;;  %v2636_v36 = vld [vmem:[%s4480_s15 + $0x8] sm:$0xff] }
 0x88b   :  { %v1786_v37 = vpop.f32.mrf.mxu1 }
 0x88c   :  { %v1828_v49 = vadd.f32 %v1827_v43, %v1786_v37 }
 0x893   :  { %v1789_v39 = vpop.f32.mrf.mxu1 }
 0x894   :  { %v1831_v48 = vadd.f32 %v1830_v46, %v1789_v39 }
 0x89b   :  { %v1792_v41 = vpop.f32.mrf.mxu1 }
 0x89c   :  { %v1834_v57 = vadd.f32 %v1833_v53, %v1792_v41 }
 0x8a3   :  { %v1867_v42 = vpop.f32.mrf.mxu1 }
 0x8a4   :  { %v1879_v63 = vadd.f32 %v1867_v42, %v1825_v54 }
 0x8a6   :  { %v1886_v10 = vmul.f32 %v3433_v58, %v1879_v63 }
 0x8a8   :  { %v1893_v1 = vadd.f32 %v3434_v9, %v1886_v10 }
 0x8aa   :  { %v1897_v7 = vmax.f32 %v1893_v1, 0.0 }
 0x8ab   :  { %v1870_v45 = vpop.f32.mrf.mxu1 }
 0x8ac   :  { %v1880_v59 = vadd.f32 %v1870_v45, %v1828_v49 }
 0x8ae   :  { %v1887_v34 = vmul.f32 %v3433_v58, %v1880_v59 }
 0x8b0   :  { %v1894_v6 = vadd.f32 %v3434_v9, %v1887_v34 }
 0x8b2   :  { %v1898_v44 = vmax.f32 %v1894_v6, 0.0 }
 0x8b3   :  { %v1873_v47 = vpop.f32.mrf.mxu1 }
 0x8b4   :  { %v1881_v50 = vadd.f32 %v1873_v47, %v1831_v48 }
 0x8b6   :  { %v1888_v0 = vmul.f32 %v3433_v58, %v1881_v50 }
 0x8b8   :  { %v1895_v12 = vadd.f32 %v3434_v9, %v1888_v0 }
 0x8ba   :  { %v1899_v2 = vmax.f32 %v1895_v12, 0.0 }
 0x8bb   :  { %v1876_v61 = vpop.f32.mrf.mxu1 }
 0x8bc   :  { %v1882_v5 = vadd.f32 %v1876_v61, %v1834_v57  ;;  %v3435_v57 = vld [vmem:[%s4478_s10] ss:$0 sm:$0xff] }
 0x8bd   :  { %v3436_v61 = vld [vmem:[%s4479_s11] ss:$0 sm:$0xff] }
 0x8be   :  { %v1889_v4 = vmul.f32 %v3433_v58, %v1882_v5 }
 0x8c0   :  { %v1896_v11 = vadd.f32 %v3434_v9, %v1889_v4 }
 0x8c2   :  { %v1900_v13 = vmax.f32 %v1896_v11, 0.0 }
 0x8c4   :  { %1963 = vmatpush.msra.mxu2 %v1900_v13 }
 0x8c6   :  { %1964 = vmatpush.msra.mxu2 %v1899_v2 }
 0x8c8   :  { %1965 = vmatpush.msra.mxu2 %v1898_v44 }
 0x8ca   :  { %1966 = vmatpush.msra.mxu2 %v1897_v7 }
 0x8cb   :  { %3170 = vmatmul.msk.f32.vlgmr.msra.gmra.mxu2 %vm173_vm0, %v1901_v60 }
 0x8d3   :  { %3171 = vmatmul.msk.f32.gmra.mxu2 %vm173_vm0, %v1902_v14 }
 0x8db   :  { %3172 = vmatmul.msk.f32.gmra.mxu2 %vm173_vm0, %v1903_v15 }
 0x8e3   :  { %3173 = vmatmul.msk.f32.gmra.mxu2 %vm173_vm0, %v1904_v17 }
 0x8eb   :  { %3174 = vmatmul.msk.f32.gmra.mxu2 %vm173_vm0, %v1905_v18 }
 0x8f3   :  { %3175 = vmatmul.msk.f32.gmra.mxu2 %vm173_vm0, %v1906_v19 }
 0x8fb   :  { %3176 = vmatmul.msk.f32.gmra.mxu2 %vm173_vm0, %v1907_v20 }
 0x903   :  { %3177 = vmatmul.msk.f32.gmra.mxu2 %vm173_vm0, %v1908_v21 }
 0x90b   :  { %3178 = vmatmul.msk.f32.gmra.mxu2 %vm173_vm0, %v1909_v22 }
 0x913   :  { %3179 = vmatmul.msk.f32.gmra.mxu2 %vm173_vm0, %v1910_v24  ;;  %v2567_v24 = vpop.permute.xlu1 %2566 }
 0x91b   :  { %3180 = vmatmul.msk.f32.gmra.mxu2 %vm173_vm0, %v1911_v16  ;;  %v3252_v16 = vld [vmem:[%s4480_s15 + $0x20] sm:$0xff] }
 0x923   :  { %3181 = vmatmul.msk.f32.gmra.mxu2 %vm173_vm0, %v1912_v25 }
 0x94e   :  { %v1968_v29 = vpop.f32.mrf.mxu2 }
 0x94f   :  { %3187 = vmatmul.msk.f32.vlgmr.msrb.gmra.mxu1 %vm530_vm3, %v1968_v29 }
 0x956   :  { %v1971_v28 = vpop.f32.mrf.mxu2 }
 0x957   :  { %3188 = vmatmul.msk.f32.gmra.mxu1 %vm530_vm3, %v1971_v28 }
 0x95e   :  { %v1974_v30 = vpop.f32.mrf.mxu2 }
 0x95f   :  { %3189 = vmatmul.msk.f32.gmra.mxu1 %vm530_vm3, %v1974_v30 }
 0x966   :  { %v1977_v35 = vpop.f32.mrf.mxu2 }
 0x967   :  { %3190 = vmatmul.msk.f32.gmra.mxu1 %vm530_vm3, %v1977_v35  ;;  %v3256_v35 = vld [vmem:[%s4480_s15 + $0x40] sm:$0xff] }
 0x96e   :  { %v1980_v37 = vpop.f32.mrf.mxu2 }
 0x96f   :  { %3183 = vmatmul.msk.f32.vlgmr.msra.gmra.mxu3 %vm530_vm3, %v1980_v37  ;;  %v3253_v37 = vld [vmem:[%s4480_s15 + $0x28] sm:$0xff] }
 0x976   :  { %v1983_v39 = vpop.f32.mrf.mxu2 }
 0x977   :  { %3184 = vmatmul.msk.f32.gmra.mxu3 %vm530_vm3, %v1983_v39 }
 0x97e   :  { %v1986_v40 = vpop.f32.mrf.mxu2 }
 0x97f   :  { %3185 = vmatmul.msk.f32.gmra.mxu3 %vm530_vm3, %v1986_v40 }
 0x986   :  { %v1989_v41 = vpop.f32.mrf.mxu2 }
 0x987   :  { %3186 = vmatmul.msk.f32.gmra.mxu3 %vm530_vm3, %v1989_v41 }
 0x98e   :  { %v1992_v42 = vpop.f32.mrf.mxu2 }
 0x98f   :  { %3192 = vmatmul.msk.f32.vlgmr.msrb.gmra.mxu3 %vm530_vm3, %v1992_v42 }
 0x996   :  { %v1995_v43 = vpop.f32.mrf.mxu2 }
 0x997   :  { %3193 = vmatmul.msk.f32.gmra.mxu3 %vm530_vm3, %v1995_v43  ;;  %v3264_v43 = vld [vmem:[%s4480_s15 + $0x80] sm:$0xff] }
 0x99e   :  { %v1998_v45 = vpop.f32.mrf.mxu2 }
 0x99f   :  { %3194 = vmatmul.msk.f32.gmra.mxu3 %vm530_vm3, %v1998_v45 }
 0x9a6   :  { %v2001_v46 = vpop.f32.mrf.mxu2 }
 0x9a7   :  { %3195 = vmatmul.msk.f32.gmra.mxu3 %vm530_vm3, %v2001_v46 }
 0x9cc   :  { %v2077_v53 = vpop.f32.mrf.mxu1 }
 0x9d4   :  { %v2080_v5 = vpop.f32.mrf.mxu1 }
 0x9dc   :  { %v2083_v6 = vpop.f32.mrf.mxu1 }
 0x9e4   :  { %v2086_v60 = vpop.f32.mrf.mxu1 }
 0x9f2   :  { %v2036_v47 = vpop.f32.mrf.mxu3 }
 0x9f3   :  { %v2078_v54 = vadd.f32 %v2077_v53, %v2036_v47 }
 0x9fa   :  { %v2039_v48 = vpop.f32.mrf.mxu3 }
 0x9fb   :  { %v2081_v4 = vadd.f32 %v2080_v5, %v2039_v48  ;;  %v3261_v5 = vld [vmem:[%s4480_s15 + $0x68] sm:$0xff] }
 0xa02   :  { %v2042_v49 = vpop.f32.mrf.mxu3 }
 0xa03   :  { %v2084_v1 = vadd.f32 %v2083_v6, %v2042_v49 }
 0xa0a   :  { %v2045_v50 = vpop.f32.mrf.mxu3 }
 0xa0b   :  { %v2087_v17 = vadd.f32 %v2086_v60, %v2045_v50  ;;  %v3239_v60 = vld [vmem:[%s4468_s25 + $0x98] sm:$0xff] }
 0xa12   :  { %v2120_v58 = vpop.f32.mrf.mxu3 }
 0xa13   :  { %v2132_v59 = vadd.f32 %v2120_v58, %v2078_v54 }
 0xa15   :  { %v2139_v63 = vmul.f32 %v3435_v57, %v2132_v59 }
 0xa17   :  { %v2146_v0 = vadd.f32 %v3436_v61, %v2139_v63 }
 0xa19   :  { %v4302_v34 = vmax.f32 %v2146_v0, 0.0  ;;  %v3257_v0 = vld [vmem:[%s4480_s15 + $0x48] sm:$0xff] }
 0xa1a   :  { %v2123_v9 = vpop.f32.mrf.mxu3 }
 0xa1b   :  { %v2133_v10 = vadd.f32 %v2123_v9, %v2081_v4  ;;  %2731 = vperm.xlu0 %3396, %v4302_v34   ;;  %2673 = vperm.xlu2 %3394, %v4302_v34  }
 0xa1c   :  { %2641 = vperm.xlu1 %3393, %v4302_v34  }
 0xa1d   :  { %v2140_v11 = vmul.f32 %v3435_v57, %v2133_v10 }
 0xa1f   :  { %v2147_v12 = vadd.f32 %v3436_v61, %v2140_v11 }
 0xa21   :  { %v4307_v13 = vmax.f32 %v2147_v12, 0.0 }
 0xa22   :  { %v2126_v2 = vpop.f32.mrf.mxu3 }
 0xa23   :  { %3399 = vset.pattern.permute.xlu0 %v3504_v33  ;;  %3397 = vset.pattern.permute.xlu2 %v3507_v55  ;;  %v2134_v44 = vadd.f32 %v2126_v2, %v2084_v1 }
 0xa24   :  { %3395 = vset.pattern.permute.xlu1 %v3506_v52  ;;  %2760 = vperm.xlu2 %3397, %v4302_v34  }
 0xa25   :  { %2702 = vperm.xlu1 %3395, %v4302_v34   ;;  %2646 = vperm.xlu0 %3399, %v4307_v13   ;;  %v2141_v7 = vmul.f32 %v3435_v57, %v2134_v44 }
 0xa27   :  { %v2148_v15 = vadd.f32 %v3436_v61, %v2141_v7 }
 0xa29   :  { %v2152_v19 = vmax.f32 %v2148_v15, 0.0 }
 0xa2a   :  { %v2129_v14 = vpop.f32.mrf.mxu3 }
 0xa2b   :  { %v2135_v18 = vadd.f32 %v2129_v14, %v2087_v17  ;;  %v3243_v14 = vld [vmem:[%s4468_s25 + $0xb8] sm:$0xff] }
 0xa2c   :  { %3400 = vset.pattern.permute.xlu2 %v3503_v32 }
 0xa2d   :  { %3398 = vset.pattern.permute.xlu1 %v3508_v3  ;;  %3404 = vset.pattern.permute.xlu0 %v3508_v3  ;;  %v2142_v20 = vmul.f32 %v3435_v57, %v2135_v18  ;;  %v3268_v57 = vld [vmem:[%s4480_s15 + $0xa0] sm:$0xff]  ;;  %v2572_v18 = vmul.f32 %v3243_v14, %v2567_v24 }
 0xa2e   :  { %2789 = vperm.xlu1 %3398, %v4302_v34   ;;  %2677 = vperm.xlu2 %3400, %v4307_v13  }
 0xa2f   :  { %2793 = vperm.xlu0 %3404, %v4307_v13   ;;  %v2149_v21 = vadd.f32 %v3436_v61, %v2142_v20 }
 0xa31   :  { %v2153_v22 = vmax.f32 %v2149_v21, 0.0  ;;  %v3247_v21 = vld [vmem:[%s4468_s25 + $0xd8] sm:$0xff] }
 0xa36   :  { %3401 = vset.pattern.permute.xlu1 %v3506_v52  ;;  %3402 = vset.pattern.permute.xlu2 %v3502_v31 }
 0xa37   :  { %3408 = vset.pattern.permute.xlu0 %v3506_v52  ;;  %2706 = vperm.xlu1 %3401, %v4307_v13  }
 0xa38   :  { %2735 = vperm.xlu2 %3402, %v4307_v13   ;;  %2710 = vperm.xlu0 %3408, %v2152_v19  }
 0xa3f   :  { %3403 = vset.pattern.permute.xlu1 %v3507_v55 }
 0xa40   :  { %3405 = vset.pattern.permute.xlu2 %v3505_v51  ;;  %3417 = vset.pattern.permute.xlu0 %v3507_v55 }
 0xa41   :  { %2764 = vperm.xlu1 %3403, %v4307_v13   ;;  %2822 = vperm.xlu2 %3405, %v4307_v13  }
 0xa42   :  { %2772 = vperm.xlu0 %3417, %v2153_v22  }
 0xa49   :  { %3407 = vset.pattern.permute.xlu1 %v3503_v32  ;;  %3406 = vset.pattern.permute.xlu2 %v3504_v33 }
 0xa4a   :  { %3418 = vset.pattern.permute.xlu0 %v3509_v8  ;;  %2681 = vperm.xlu1 %3407, %v2152_v19  }
 0xa4b   :  { %2651 = vperm.xlu2 %3406, %v2152_v19   ;;  %2855 = vperm.xlu0 %3418, %v2152_v19  }
 0xa52   :  { %3410 = vset.pattern.permute.xlu1 %v3507_v55  ;;  %v4342_v55 = vpop.permute.xlu2 %2595 }
 0xa53   :  { %3409 = vset.pattern.permute.xlu2 %v3502_v31  ;;  %2768 = vperm.xlu1 %3410, %v2152_v19  }
 0xa54   :  { %2739 = vperm.xlu2 %3409, %v2152_v19  }
 0xa5b   :  { %3412 = vset.pattern.permute.xlu1 %v3505_v51 }
 0xa5c   :  { %3411 = vset.pattern.permute.xlu2 %v3508_v3  ;;  %2826 = vperm.xlu1 %3412, %v2152_v19  }
 0xa5d   :  { %2797 = vperm.xlu2 %3411, %v2152_v19  }
 0xa64   :  { %3414 = vset.pattern.permute.xlu1 %v3503_v32  ;;  %v2538_v32 = vpop.permute.xlu0 %2537 }
 0xa65   :  { %3413 = vset.pattern.permute.xlu2 %v3504_v33  ;;  %2685 = vperm.xlu1 %3414, %v2153_v22   ;;  %v2543_v15 = vmul.f32 %v3239_v60, %v2538_v32  ;;  %v3255_v32 = vld [vmem:[%s4480_s15 + $0x38] sm:$0xff] }
 0xa66   :  { %2656 = vperm.xlu2 %3413, %v2153_v22  }
 0xa67   :  { %v2547_v17 = vadd.f32 %v2543_v15, %v4212_v56  ;;  %v2156_v15 = vld [vmem:[%s3694_s20] sm:$0xff] }
 0xa6d   :  { %3416 = vset.pattern.permute.xlu1 %v3502_v31  ;;  %v4348_v31 = vpop.permute.xlu0 %2624 }
 0xa6e   :  { %3415 = vset.pattern.permute.xlu2 %v3506_v52  ;;  %2743 = vperm.xlu1 %3416, %v2153_v22  }
 0xa6f   :  { %2714 = vperm.xlu2 %3415, %v2153_v22  }
 0xa75   :  { %v2674_v33 = vpop.permute.xlu2 %2673 }
 0xa76   :  { %3419 = vset.pattern.permute.xlu1 %v3505_v51  ;;  %v2635_v51 = vld [vmem:[%s4480_s15] sm:$0xff]  ;;  %v2688_v29 = vmul.f32 %v3252_v16, %v2674_v33  ;;  %v2576_v33 = vadd.f32 %v2572_v18, %v2547_v17  ;;  %v2638_v16 = vld [vmem:[%s4480_s15 + $0x18] sm:$0xff]  ;;  %v3270_v17 = vld [vmem:[%s4480_s15 + $0xb0] sm:$0xff] }
 0xa77   :  { %3420 = vset.pattern.permute.xlu2 %v3508_v3  ;;  %2818 = vperm.xlu1 %3419, %v4302_v34   ;;  %v3274_v18 = vld [vmem:[%s4480_s15 + $0xd0] sm:$0xff] }
 0xa78   :  { %2801 = vperm.xlu2 %3420, %v2153_v22  }
 0xa7e   :  { %v2761_v52 = vpop.permute.xlu2 %2760 }
 0xa7f   :  { %2830 = vperm.xlu1 %3419, %v2153_v22  }
 0xa80   :  { %3421 = vset.pattern.permute.xlu2 %v3509_v8 }
 0xa81   :  { %2859 = vperm.xlu2 %3421, %v2153_v22  }
 0xa87   :  { %3422 = vset.pattern.permute.xlu1 %v3509_v8  ;;  %v3260_v8 = vld [vmem:[%s4480_s15 + $0x60] sm:$0xff] }
 0xa88   :  { %2847 = vperm.xlu1 %3422, %v4302_v34   ;;  %v2678_v26 = vpop.permute.xlu2 %2677 }
 0xa89   :  { %2851 = vperm.xlu2 %3421, %v4307_v13   ;;  %v2689_v46 = vmul.f32 %v3253_v37, %v2678_v26  ;;  %v3254_v26 = vld [vmem:[%s4480_s15 + $0x30] sm:$0xff]  ;;  %v2163_v37 = vld [vmem:[%s3694_s20 + $0x38] sm:$0xff] }
 0xa8a   :  { %2912 = vmatpush.msra.mxu0 %v2163_v37 }
 0xa8d   :  { %v2732_v3 = vpop.permute.xlu0 %2731 }
 0xa8e   :  { %v2642_v25 = vpop.permute.xlu1 %2641  ;;  %v2746_v47 = vmul.f32 %v3260_v8, %v2732_v3  ;;  %v2637_v3 = vld [vmem:[%s4480_s15 + $0x10] sm:$0xff] }
 0xa8f   :  { %v2659_v27 = vmul.f32 %v2642_v25, %v2635_v51  ;;  %v3251_v51 = vld [vmem:[%s4468_s25 + $0xf8] sm:$0xff]  ;;  %v2162_v8 = vld [vmem:[%s3694_s20 + $0x30] sm:$0xff] }
 0xa90   :  { %v2630_v56 = vmul.f32 %v3251_v51, %v4348_v31  ;;  %2913 = vmatpush.msra.mxu0 %v2162_v8 }
 0xa91   :  { %v2663_v28 = vadd.f32 %v2659_v27, %v4175_v23  ;;  %v2775_v23 = vmul.f32 %v3264_v43, %v2761_v52  ;;  %v2601_v52 = vmul.f32 %v3247_v21, %v4342_v55  ;;  %v3263_v43 = vld [vmem:[%s4480_s15 + $0x78] sm:$0xff] }
 0xa92   :  { %v2736_v45 = vpop.permute.xlu2 %2735 }
 0xa93   :  { %v2692_v30 = vadd.f32 %v2688_v29, %v2663_v28  ;;  %v2747_v9 = vmul.f32 %v3261_v5, %v2736_v45  ;;  %v2605_v25 = vadd.f32 %v2601_v52, %v2576_v33  ;;  %v3267_v5 = vld [vmem:[%s4480_s15 + $0x98] sm:$0xff] }
 0xa95   :  { %v2634_v55 = vadd.f32 %v2630_v56, %v2605_v25 }
 0xa97   :  { %v2703_v39 = vpop.permute.xlu1 %2702  ;;  %v2647_v40 = vpop.permute.xlu0 %2646 }
 0xa98   :  { %v2717_v41 = vmul.f32 %v3256_v35, %v2703_v39  ;;  %v2660_v42 = vmul.f32 %v2647_v40, %v2636_v36  ;;  %v2161_v40 = vld [vmem:[%s3694_s20 + $0x28] sm:$0xff] }
 0xa99   :  { %2914 = vmatpush.msra.mxu0 %v2161_v40  ;;  %v3276_v40 = vld [vmem:[%s4480_s15 + $0xe0] sm:$0xff] }
 0xa9a   :  { %v2721_v48 = vadd.f32 %v2717_v41, %v2692_v30  ;;  %v2664_v49 = vadd.f32 %v2660_v42, %v4188_v62  ;;  %v3258_v41 = vld [vmem:[%s4480_s15 + $0x50] sm:$0xff]  ;;  %v3259_v42 = vld [vmem:[%s4480_s15 + $0x58] sm:$0xff] }
 0xa9b   :  { %v4363_v61 = vpop.permute.xlu2 %2822 }
 0xa9c   :  { %v2750_v50 = vadd.f32 %v2746_v47, %v2721_v48  ;;  %v2693_v53 = vadd.f32 %v2689_v46, %v2664_v49  ;;  %v2160_v47 = vld [vmem:[%s3694_s20 + $0x20] sm:$0xff] }
 0xa9d   :  { %2915 = vmatpush.msra.mxu0 %v2160_v47 }
 0xa9e   :  { %v2779_v54 = vadd.f32 %v2775_v23, %v2750_v50  ;;  %v2159_v50 = vld [vmem:[%s3694_s20 + $0x18] sm:$0xff] }
 0xa9f   :  { %2916 = vmatpush.msra.mxu0 %v2159_v50 }
 0xaa0   :  { %v2790_v58 = vpop.permute.xlu1 %2789 }
 0xaa1   :  { %v2804_v59 = vmul.f32 %v3268_v57, %v2790_v58  ;;  %v4380_v19 = vpop.permute.xlu0 %2793 }
 0xaa3   :  { %v4365_v63 = vadd.f32 %v2804_v59, %v2779_v54  ;;  %v2158_v59 = vld [vmem:[%s3694_s20 + $0x10] sm:$0xff] }
 0xaa4   :  { %2917 = vmatpush.msra.mxu0 %v2158_v59 }
 0xaa5   :  { %v2652_v62 = vpop.permute.xlu2 %2651 }
 0xaa6   :  { %v2661_v24 = vmul.f32 %v2652_v62, %v2637_v3  ;;  %v3279_v3 = vld [vmem:[%s4480_s15 + $0xf8] sm:$0xff] }
 0xaa8   :  { %v2665_v39 = vadd.f32 %v2661_v24, %v4205_v38  ;;  %v3262_v38 = vld [vmem:[%s4480_s15 + $0x70] sm:$0xff]  ;;  %v3273_v24 = vld [vmem:[%s4480_s15 + $0xc8] sm:$0xff] }
 0xaa9   :  { %v2707_v34 = vpop.permute.xlu1 %2706 }
 0xaaa   :  { %v2718_v4 = vmul.f32 %v3257_v0, %v2707_v34  ;;  %v2711_v27 = vpop.permute.xlu0 %2710  ;;  %v3265_v0 = vld [vmem:[%s4480_s15 + $0x88] sm:$0xff] }
 0xaab   :  { %v2719_v48 = vmul.f32 %v3258_v41, %v2711_v27  ;;  %v3278_v27 = vld [vmem:[%s4480_s15 + $0xf0] sm:$0xff] }
 0xaac   :  { %v2722_v10 = vadd.f32 %v2718_v4, %v2693_v53  ;;  %v3266_v53 = vld [vmem:[%s4480_s15 + $0x90] sm:$0xff] }
 0xaae   :  { %v4369_v11 = vadd.f32 %v2747_v9, %v2722_v10  ;;  %v2740_v13 = vpop.permute.xlu2 %2739 }
 0xaaf   :  { %v2748_v9 = vmul.f32 %v3262_v38, %v2740_v13  ;;  %v3269_v13 = vld [vmem:[%s4480_s15 + $0xa8] sm:$0xff]  ;;  %v3438_v38 = vld [vmem:[%s3699_s27] ss:$0 sm:$0xff] }
 0xab0   :  { %v2805_v25 = vmul.f32 %v3269_v13, %v4380_v19 }
 0xab3   :  { %v4371_v12 = vpop.permute.xlu1 %2764 }
 0xab4   :  { %v2773_v54 = vpop.permute.xlu0 %2772 }
 0xab5   :  { %v2778_v60 = vmul.f32 %v3267_v5, %v2773_v54 }
 0xab7   :  { %v4373_v2 = vpop.permute.xlu2 %2797 }
 0xabc   :  { %v2682_v6 = vpop.permute.xlu1 %2681 }
 0xabd   :  { %v2690_v30 = vmul.f32 %v3254_v26, %v2682_v6  ;;  %v2157_v6 = vld [vmem:[%s3694_s20 + $0x8] sm:$0xff]  ;;  %s4481_s20 = sld [smem:[#allocation24_spill]] }
 0xabe   :  { %2918 = vmatpush.msra.mxu0 %v2157_v6 }
 0xabf   :  { %v2694_v45 = vadd.f32 %v2690_v30, %v2665_v39  ;;  %v3277_v30 = vld [vmem:[%s4480_s15 + $0xe8] sm:$0xff] }
 0xac0   :  { %v2657_v44 = vpop.permute.xlu2 %2656  ;;  %2919 = vmatpush.msra.mxu0 %v2156_v15 }
 0xac1   :  { %v2662_v29 = vmul.f32 %v2657_v44, %v2638_v16  ;;  %v2723_v57 = vadd.f32 %v2719_v48, %v2694_v45  ;;  %v2776_v44 = vmul.f32 %v3265_v0, %v4371_v12  ;;  %v2806_v12 = vmul.f32 %v3270_v17, %v4373_v2  ;;  %v3437_v48 = vld [vmem:[%s3689_s30] ss:$0 sm:$0xff]  ;;  %s3453_s30 = scalar_lea.hbm %s3452_s23, 2 }
 0xac2   :  { %p3454_p0 = scmp.ne.s32.totalorder %s3452_s23, %s3453_s30  ;;  %p3457_p2 = scmp.lt.s32.totalorder %s3455_s26, %s3453_s30 }
 0xac3   :  { %v2666_v31 = vadd.f32 %v2662_v29, %v2634_v55  ;;  %v2752_v14 = vadd.f32 %v2748_v9, %v2723_v57  ;;  %v2780_v33 = vadd.f32 %v2776_v44, %v4369_v11  ;;  %v2856_v29 = vpop.permute.xlu0 %2855  ;;  %v2154_v47 = vld [vmem:[%s4481_s20] sm:$0x3] }
 0xac4   :  { %v2864_v37 = vmul.f32 %v3278_v27, %v2856_v29  ;;  %p3458_p3 = por %p3457_p2, %p3456_p1 }
 0xac5   :  { %v2769_v1 = vpop.permute.xlu1 %2768  ;;  %v2809_v11 = vadd.f32 %v2805_v25, %v2780_v33 }
 0xac6   :  { %v2777_v10 = vmul.f32 %v3266_v53, %v2769_v1  ;;  %v3275_v1 = vld [vmem:[%s4480_s15 + $0xd8] sm:$0xff]  ;;  %p3459_p4 = pnand %p3458_p3, %p3454_p0 }
 0xac8   :  { %v2781_v21 = vadd.f32 %v2777_v10, %v2752_v14 }
 0xac9   :  { %v2715_v20 = vpop.permute.xlu2 %2714 }
 0xaca   :  { %v2720_v49 = vmul.f32 %v3259_v42, %v2715_v20  ;;  %v3271_v20 = vld [vmem:[%s4480_s15 + $0xb8] sm:$0xff]  ;;  %v2810_v26 = vadd.f32 %v2806_v12, %v2781_v21 }
 0xace   :  { %v4375_v7 = vpop.permute.xlu1 %2826 }
 0xacf   :  { %v2835_v52 = vmul.f32 %v3274_v18, %v4375_v7 }
 0xad2   :  { %v2802_v28 = vpop.permute.xlu2 %2801 }
 0xad3   :  { %v2807_v51 = vmul.f32 %v3271_v20, %v2802_v28  ;;  %v2834_v28 = vmul.f32 %v3273_v24, %v4363_v61 }
 0xad7   :  { %v2686_v22 = vpop.permute.xlu1 %2685 }
 0xad8   :  { %v2691_v35 = vmul.f32 %v3255_v32, %v2686_v22 }
 0xada   :  { %v2695_v46 = vadd.f32 %v2691_v35, %v2666_v31  ;;  %v2839_v35 = vadd.f32 %v2835_v52, %v2810_v26  ;;  %v2838_v31 = vadd.f32 %v2834_v28, %v2809_v11 }
 0xadb   :  { %v2860_v34 = vpop.permute.xlu2 %2859 }
 0xadc   :  { %v2724_v58 = vadd.f32 %v2720_v49, %v2695_v46  ;;  %v2865_v2 = vmul.f32 %v3279_v3, %v2860_v34  ;;  %v2868_v41 = vadd.f32 %v2864_v37, %v2839_v35 }
 0xae0   :  { %v2744_v36 = vpop.permute.xlu1 %2743 }
 0xae1   :  { %v2749_v23 = vmul.f32 %v3263_v43, %v2744_v36  ;;  %v3272_v36 = vld [vmem:[%s4480_s15 + $0xc0] sm:$0xff] }
 0xae3   :  { %v2753_v62 = vadd.f32 %v2749_v23, %v2724_v58  ;;  %v2852_v55 = vpop.permute.xlu2 %2851 }
 0xae4   :  { %v2863_v8 = vmul.f32 %v3277_v30, %v2852_v55 }
 0xae5   :  { %v2782_v22 = vadd.f32 %v2778_v60, %v2753_v62 }
 0xae6   :  { %v2867_v42 = vadd.f32 %v2863_v8, %v2838_v31 }
 0xae7   :  { %v2811_v32 = vadd.f32 %v2807_v51, %v2782_v22 }
 0xae9   :  { %v2819_v4 = vpop.permute.xlu1 %2818 }
 0xaea   :  { %v2833_v39 = vmul.f32 %v3272_v36, %v2819_v4 }
 0xaec   :  { %v2837_v45 = vadd.f32 %v2833_v39, %v4365_v63 }
 0xaf1   :  { %v2831_v16 = vpop.permute.xlu1 %2830 }
 0xaf2   :  { %v2836_v56 = vmul.f32 %v3275_v1, %v2831_v16 }
 0xaf4   :  { %v2840_v7 = vadd.f32 %v2836_v56, %v2811_v32 }
 0xaf6   :  { %v2869_v19 = vadd.f32 %v2865_v2, %v2840_v7 }
 0xaf8   :  { %2888 = vmatpush.msra.mxu1 %v2869_v19 }
 0xafa   :  { %v2848_v43 = vpop.permute.xlu1 %2847  ;;  %2889 = vmatpush.msra.mxu1 %v2868_v41 }
 0xafb   :  { %v2862_v46 = vmul.f32 %v3276_v40, %v2848_v43 }
 0xafc   :  { %2890 = vmatpush.msra.mxu1 %v2867_v42 }
 0xafd   :  { %v2866_v61 = vadd.f32 %v2862_v46, %v2837_v45 }
 0xaff   :  { %2891 = vmatpush.msra.mxu1 %v2866_v61 }
 0xb00   :  { %3280 = vmatmul.msk.f32.vlgmr.msra.gmra.mxu1 %vm173_vm0, %v2154_v47 }
 0xb7d   :  { %v2893_v49 = vpop.f32.mrf.mxu1 }
 0xb7e   :  { %v2894_v23 = vadd.f32 %v3437_v48, %v2893_v49 }
 0xb80   :  { %v2896_v50 = vmax.f32 %v2894_v23, 0.0 }
 0xb82   :  { %3281 = vmatmul.msk.f32.vlgmr.msra.gmra.mxu0 %vm2900_vm4, %v2896_v50 }
 0xbff   :  { %v2921_v63 = vpop.f32.mrf.mxu0 }
 0xc00   :  { %v2922_v53 = vadd.f32 %v3438_v38, %v2921_v63 }
 0xc02   :  { %2925 = vst.msk [vmem:[#allocation2] sm:$0x3] %vm2924_vm5, %v2922_v53 }
 0xc03   :  { %3462 = shalt.err (!%p3459_p4)
}
 0xc04   :  { %2936 = dma.vmem_to_hbm [thread:$0]  %s2932_s18, 32, %s2934_s22, [#allocation3]  }
 0xc05   :  { %3463 = dma.done.wait [#allocation3], 32  }
 0xc06   :  { %3464 = vsyncadd [#allocation3], 4294967264 }
 0xc07   :  { %2941 = vsyncpa [#allocation3], 1 }

</bundles_post_ra>
